<compile_context>
chip_gen: v7x
topology: tpu7x:2x2x1
jax: 0.10.0
libtpu: 0.0.40
codegen_flags: <defaults>
</compile_context>

<pallas_src>
import functools

import jax
import jax.numpy as jnp
from jax import lax
from jax.experimental import pallas as pl
from jax.experimental.pallas import tpu as pltpu


# ---------------- fused Pallas kernel ----------------

def fused_convnet_kernel(x_ref, wc_ref, bc_ref, wf_ref, bf_ref, out_ref):
    # x_ref : (4, 196, TB) bf16 VMEM -- p = kh*2+kw, s = h_out*14 + w_out,
    #                                   batch in the lane (last) axis
    # wc_ref: (4, 4)       f32  SMEM -- conv weight [out_c, patch_pos]
    # bc_ref: (4,)         f32  SMEM -- conv bias
    # wf_ref: (4, 10, 196) f32  VMEM -- fc weight split per conv channel (o, s)
    # bf_ref: (10, 1)      f32  VMEM -- fc bias (class-major column)
    # out_ref:(10, TB)     f32  VMEM -- softmax probabilities (class-major)
    tb = out_ref.shape[1]

    # Load the 4 patch-position slabs once and upcast bf16 -> f32 once
    # (hoisted so the converts are not repeated for every conv channel).
    x0 = x_ref[0].astype(jnp.float32)
    x1 = x_ref[1].astype(jnp.float32)
    x2 = x_ref[2].astype(jnp.float32)
    x3 = x_ref[3].astype(jnp.float32)

    logits = jnp.zeros((10, tb), dtype=jnp.float32)
    for c in range(4):  # static unroll over the 4 conv output channels
        # VPU conv: 4 scalar * (196, TB) FMAs, fully lane-dense.
        s = x0 * wc_ref[c, 0]
        s = s + x1 * wc_ref[c, 1]
        s = s + x2 * wc_ref[c, 2]
        s = s + x3 * wc_ref[c, 3]
        s = jnp.maximum(s + bc_ref[c], 0.0)
        # MXU: (10, 196) @ (196, TB), accumulated in f32.
        logits = logits + jnp.dot(wf_ref[c], s,
                                  preferred_element_type=jnp.float32)

    logits = logits + bf_ref[...]

    # softmax over the class axis (sublane axis, 10 rows)
    m = jnp.max(logits, axis=0, keepdims=True)
    e = jnp.exp(logits - m)
    denom = jnp.sum(e, axis=0, keepdims=True)
    out_ref[...] = e * pl.reciprocal(denom, approx=True)   # EUP vrcp slot


# ---------------- one-time parameter preparation ----------------

def prepare_params(conv_w, conv_b, fc_w, fc_b):
    """Hoisted out of the forward: do all weight reshapes exactly once."""
    # conv weight (4,1,2,2) -> (out_c=4, patch_pos=kh*2+kw)
    wc = conv_w.astype(jnp.float32).reshape(4, 4)
    bc = conv_b.astype(jnp.float32).reshape(4)
    # fc weight (10, 784) with PyTorch channel-major flatten: j = c*196 + s
    #   -> (4, 10, 196)  so wf[c, o, s] == fc_w[o, c*196 + s]
    wf = fc_w.astype(jnp.float32).reshape(10, 4, 196).transpose(1, 0, 2)
    bf = fc_b.astype(jnp.float32).reshape(10, 1)
    return wc, bc, wf, bf


# ---------------- forward ----------------

def _round_up(v, m):
    return ((v + m - 1) // m) * m


@functools.partial(jax.jit, static_argnames=("tb",))
def classical_convnet_forward(x, params, tb=1024):
    wc, bc, wf, bf = params
    B = x.shape[0]
    assert x.shape[1:] == (1, 28, 28)

    # Re-layout x once (fused XLA cast/reshape/transpose) to batch-in-lanes:
    # (B,1,28,28) -> (B,14,2,14,2) -> (kh,kw,h,w,B) -> (4, 196, B) bf16
    xp = (x.astype(jnp.bfloat16)
           .reshape(B, 14, 2, 14, 2)
           .transpose(2, 4, 1, 3, 0)
           .reshape(4, 196, B))

    # Batch tile: big enough to amortize per-step overhead, but split into
    # >=2 grid iterations when possible so both v7x TensorCores get work.
    if B <= 256:
        tb_eff = 256
    else:
        tb_eff = max(256, min(tb, _round_up((B + 1) // 2, 256)))
    nb = (B + tb_eff - 1) // tb_eff
    Bp = nb * tb_eff
    if Bp != B:  # pad batch so the grid divides evenly; padded cols discarded
        xp = jnp.pad(xp, ((0, 0), (0, 0), (0, Bp - B)))

    out = pl.pallas_call(
        fused_convnet_kernel,
        out_shape=jax.ShapeDtypeStruct((10, Bp), jnp.float32),
        grid=(nb,),
        in_specs=[
            pl.BlockSpec((4, 196, tb_eff), lambda i: (0, 0, i)),   # x tile
            pl.BlockSpec(memory_space=pltpu.MemorySpace.SMEM),     # conv w
            pl.BlockSpec(memory_space=pltpu.MemorySpace.SMEM),     # conv b
            pl.BlockSpec((4, 10, 196), lambda i: (0, 0, 0)),       # fc w (resident)
            pl.BlockSpec((10, 1), lambda i: (0, 0)),               # fc b (resident)
        ],
        out_specs=pl.BlockSpec((10, tb_eff), lambda i: (0, i)),
        compiler_params=pltpu.CompilerParams(
            dimension_semantics=("parallel",),
            vmem_limit_bytes=64 * 1024 * 1024),
    )(xp, wc, bc, wf, bf)

    out = out[:, :B] if Bp != B else out
    return out.T  # (B, 10)


# ---------------- pure-JAX reference (correctness check) ----------------

def reference_forward(x, conv_w, conv_b, fc_w, fc_b):
    y = lax.conv_general_dilated(
        x, conv_w, window_strides=(2, 2), padding="VALID",
        dimension_numbers=("NCHW", "OIHW", "NCHW"))
    y = jnp.maximum(y + conv_b.reshape(1, 4, 1, 1), 0.0)
    flat = y.reshape(x.shape[0], -1)            # channel-major flatten(1)
    logits = flat @ fc_w.T + fc_b
    return jax.nn.softmax(logits, axis=-1)


if __name__ == "__main__":
    key = jax.random.PRNGKey(0)
    k_x, k_cw, k_cb, k_fw, k_fb = jax.random.split(key, 5)

    B = 2
    x = jax.random.normal(k_x, (B, 1, 28, 28), dtype=jnp.float32)

    # deterministic PyTorch-style uniform init (fan-in based bounds)
    k_conv = 1.0 / (1 * 2 * 2) ** 0.5
    conv_w = jax.random.uniform(k_cw, (4, 1, 2, 2), jnp.float32, -k_conv, k_conv)
    conv_b = jax.random.uniform(k_cb, (4,), jnp.float32, -k_conv, k_conv)

    k_fc = 1.0 / (28 ** 2) ** 0.5
    fc_w = jax.random.uniform(k_fw, (10, 784), jnp.float32, -k_fc, k_fc)
    fc_b = jax.random.uniform(k_fb, (10,), jnp.float32, -k_fc, k_fc)

    params = prepare_params(conv_w, conv_b, fc_w, fc_b)   # one-time prep
    out = classical_convnet_forward(x, params)
    out = jax.block_until_ready(out)

    ref = reference_forward(x, conv_w, conv_b, fc_w, fc_b)
    assert out.shape == (B, 10)
    # bf16 input + approx reciprocal -> loosened tolerance vs the f32 reference
    assert jnp.allclose(out, ref, atol=1e-2, rtol=0.0), "mismatch vs reference"
    assert jnp.allclose(jnp.sum(out, axis=-1), 1.0, atol=5e-3), "rows not normalized"

    print("KERNEL_OK")
</pallas_src>

<mosaic_0001>
module attributes {stable_mosaic.version = 11 : i64} {
  func.func @fused_convnet_kernel(%arg0: i32, %arg1: memref<4x196x256xbf16, #tpu.memory_space<vmem>>, %arg2: memref<4x4xf32, #tpu.memory_space<smem>>, %arg3: memref<4xf32, #tpu.memory_space<smem>>, %arg4: memref<4x10x196xf32, #tpu.memory_space<vmem>>, %arg5: memref<10x1xf32, #tpu.memory_space<vmem>>, %arg6: memref<10x256xf32, #tpu.memory_space<vmem>>) attributes {dimension_semantics = [#tpu.dimension_semantics<parallel>], iteration_bounds = array<i64: 1>, scalar_prefetch = 0 : i64, scratch_operands = 0 : i64, tpu.core_type = #tpu.core_type<tc>, window_params = [{transform_indices = @transform_0, window_bounds = array<i64: 4, 196, 256>}, {transform_indices = @transform_1, window_bounds = array<i64: 4, 4>}, {transform_indices = @transform_2, window_bounds = array<i64: 4>}, {pipeline_mode = #tpu.pipeline_mode<synchronous>, transform_indices = @transform_3, window_bounds = array<i64: 4, 10, 196>}, {pipeline_mode = #tpu.pipeline_mode<synchronous>, transform_indices = @transform_4, window_bounds = array<i64: 10, 1>}, {transform_indices = @transform_5, window_bounds = array<i64: 10, 256>}]} {
    %c0 = arith.constant 0 : index
    %c0_0 = arith.constant 0 : index
    %c0_1 = arith.constant 0 : index
    %0 = vector.load %arg1[%c0, %c0_0, %c0_1] : memref<4x196x256xbf16, #tpu.memory_space<vmem>>, vector<1x196x256xbf16>
    %1 = vector.shape_cast %0 : vector<1x196x256xbf16> to vector<196x256xbf16>
    %2 = arith.extf %1 : vector<196x256xbf16> to vector<196x256xf32>
    %c1 = arith.constant 1 : index
    %c0_2 = arith.constant 0 : index
    %c0_3 = arith.constant 0 : index
    %3 = vector.load %arg1[%c1, %c0_2, %c0_3] : memref<4x196x256xbf16, #tpu.memory_space<vmem>>, vector<1x196x256xbf16>
    %4 = vector.shape_cast %3 : vector<1x196x256xbf16> to vector<196x256xbf16>
    %5 = arith.extf %4 : vector<196x256xbf16> to vector<196x256xf32>
    %c2 = arith.constant 2 : index
    %c0_4 = arith.constant 0 : index
    %c0_5 = arith.constant 0 : index
    %6 = vector.load %arg1[%c2, %c0_4, %c0_5] : memref<4x196x256xbf16, #tpu.memory_space<vmem>>, vector<1x196x256xbf16>
    %7 = vector.shape_cast %6 : vector<1x196x256xbf16> to vector<196x256xbf16>
    %8 = arith.extf %7 : vector<196x256xbf16> to vector<196x256xf32>
    %c3 = arith.constant 3 : index
    %c0_6 = arith.constant 0 : index
    %c0_7 = arith.constant 0 : index
    %9 = vector.load %arg1[%c3, %c0_6, %c0_7] : memref<4x196x256xbf16, #tpu.memory_space<vmem>>, vector<1x196x256xbf16>
    %10 = vector.shape_cast %9 : vector<1x196x256xbf16> to vector<196x256xbf16>
    %11 = arith.extf %10 : vector<196x256xbf16> to vector<196x256xf32>
    %cst = arith.constant 0.000000e+00 : f32
    %12 = vector.broadcast %cst : f32 to vector<10x256xf32>
    %c0_8 = arith.constant 0 : index
    %c0_9 = arith.constant 0 : index
    %13 = memref.load %arg2[%c0_8, %c0_9] : memref<4x4xf32, #tpu.memory_space<smem>>
    %14 = vector.broadcast %13 : f32 to vector<196x256xf32>
    %15 = arith.mulf %2, %14 : vector<196x256xf32>
    %c0_10 = arith.constant 0 : index
    %c1_11 = arith.constant 1 : index
    %16 = memref.load %arg2[%c0_10, %c1_11] : memref<4x4xf32, #tpu.memory_space<smem>>
    %17 = vector.broadcast %16 : f32 to vector<196x256xf32>
    %18 = arith.mulf %5, %17 : vector<196x256xf32>
    %19 = arith.addf %15, %18 : vector<196x256xf32>
    %c0_12 = arith.constant 0 : index
    %c2_13 = arith.constant 2 : index
    %20 = memref.load %arg2[%c0_12, %c2_13] : memref<4x4xf32, #tpu.memory_space<smem>>
    %21 = vector.broadcast %20 : f32 to vector<196x256xf32>
    %22 = arith.mulf %8, %21 : vector<196x256xf32>
    %23 = arith.addf %19, %22 : vector<196x256xf32>
    %c0_14 = arith.constant 0 : index
    %c3_15 = arith.constant 3 : index
    %24 = memref.load %arg2[%c0_14, %c3_15] : memref<4x4xf32, #tpu.memory_space<smem>>
    %25 = vector.broadcast %24 : f32 to vector<196x256xf32>
    %26 = arith.mulf %11, %25 : vector<196x256xf32>
    %27 = arith.addf %23, %26 : vector<196x256xf32>
    %c0_16 = arith.constant 0 : index
    %28 = memref.load %arg3[%c0_16] : memref<4xf32, #tpu.memory_space<smem>>
    %29 = vector.broadcast %28 : f32 to vector<196x256xf32>
    %30 = arith.addf %27, %29 : vector<196x256xf32>
    %cst_17 = arith.constant 0.000000e+00 : f32
    %31 = vector.broadcast %cst_17 : f32 to vector<196x256xf32>
    %32 = arith.maximumf %30, %31 : vector<196x256xf32>
    %c0_18 = arith.constant 0 : index
    %c0_19 = arith.constant 0 : index
    %c0_20 = arith.constant 0 : index
    %33 = vector.load %arg4[%c0_18, %c0_19, %c0_20] : memref<4x10x196xf32, #tpu.memory_space<vmem>>, vector<1x10x196xf32>
    %34 = vector.shape_cast %33 : vector<1x10x196xf32> to vector<10x196xf32>
    %cst_21 = arith.constant dense<0.000000e+00> : vector<10x256xf32>
    %35 = tpu.matmul %34, %32, %cst_21 {dimension_numbers = #tpu.dot_dimension_numbers<[1], [0], [0], [1], [0, 0, 1, 1], [], []>} : vector<10x196xf32>, vector<196x256xf32>, vector<10x256xf32> -> vector<10x256xf32>
    %36 = arith.addf %12, %35 : vector<10x256xf32>
    %c1_22 = arith.constant 1 : index
    %c0_23 = arith.constant 0 : index
    %37 = memref.load %arg2[%c1_22, %c0_23] : memref<4x4xf32, #tpu.memory_space<smem>>
    %38 = vector.broadcast %37 : f32 to vector<196x256xf32>
    %39 = arith.mulf %2, %38 : vector<196x256xf32>
    %c1_24 = arith.constant 1 : index
    %c1_25 = arith.constant 1 : index
    %40 = memref.load %arg2[%c1_24, %c1_25] : memref<4x4xf32, #tpu.memory_space<smem>>
    %41 = vector.broadcast %40 : f32 to vector<196x256xf32>
    %42 = arith.mulf %5, %41 : vector<196x256xf32>
    %43 = arith.addf %39, %42 : vector<196x256xf32>
    %c1_26 = arith.constant 1 : index
    %c2_27 = arith.constant 2 : index
    %44 = memref.load %arg2[%c1_26, %c2_27] : memref<4x4xf32, #tpu.memory_space<smem>>
    %45 = vector.broadcast %44 : f32 to vector<196x256xf32>
    %46 = arith.mulf %8, %45 : vector<196x256xf32>
    %47 = arith.addf %43, %46 : vector<196x256xf32>
    %c1_28 = arith.constant 1 : index
    %c3_29 = arith.constant 3 : index
    %48 = memref.load %arg2[%c1_28, %c3_29] : memref<4x4xf32, #tpu.memory_space<smem>>
    %49 = vector.broadcast %48 : f32 to vector<196x256xf32>
    %50 = arith.mulf %11, %49 : vector<196x256xf32>
    %51 = arith.addf %47, %50 : vector<196x256xf32>
    %c1_30 = arith.constant 1 : index
    %52 = memref.load %arg3[%c1_30] : memref<4xf32, #tpu.memory_space<smem>>
    %53 = vector.broadcast %52 : f32 to vector<196x256xf32>
    %54 = arith.addf %51, %53 : vector<196x256xf32>
    %cst_31 = arith.constant 0.000000e+00 : f32
    %55 = vector.broadcast %cst_31 : f32 to vector<196x256xf32>
    %56 = arith.maximumf %54, %55 : vector<196x256xf32>
    %c1_32 = arith.constant 1 : index
    %c0_33 = arith.constant 0 : index
    %c0_34 = arith.constant 0 : index
    %57 = vector.load %arg4[%c1_32, %c0_33, %c0_34] : memref<4x10x196xf32, #tpu.memory_space<vmem>>, vector<1x10x196xf32>
    %58 = vector.shape_cast %57 : vector<1x10x196xf32> to vector<10x196xf32>
    %cst_35 = arith.constant dense<0.000000e+00> : vector<10x256xf32>
    %59 = tpu.matmul %58, %56, %cst_35 {dimension_numbers = #tpu.dot_dimension_numbers<[1], [0], [0], [1], [0, 0, 1, 1], [], []>} : vector<10x196xf32>, vector<196x256xf32>, vector<10x256xf32> -> vector<10x256xf32>
    %60 = arith.addf %36, %59 : vector<10x256xf32>
    %c2_36 = arith.constant 2 : index
    %c0_37 = arith.constant 0 : index
    %61 = memref.load %arg2[%c2_36, %c0_37] : memref<4x4xf32, #tpu.memory_space<smem>>
    %62 = vector.broadcast %61 : f32 to vector<196x256xf32>
    %63 = arith.mulf %2, %62 : vector<196x256xf32>
    %c2_38 = arith.constant 2 : index
    %c1_39 = arith.constant 1 : index
    %64 = memref.load %arg2[%c2_38, %c1_39] : memref<4x4xf32, #tpu.memory_space<smem>>
    %65 = vector.broadcast %64 : f32 to vector<196x256xf32>
    %66 = arith.mulf %5, %65 : vector<196x256xf32>
    %67 = arith.addf %63, %66 : vector<196x256xf32>
    %c2_40 = arith.constant 2 : index
    %c2_41 = arith.constant 2 : index
    %68 = memref.load %arg2[%c2_40, %c2_41] : memref<4x4xf32, #tpu.memory_space<smem>>
    %69 = vector.broadcast %68 : f32 to vector<196x256xf32>
    %70 = arith.mulf %8, %69 : vector<196x256xf32>
    %71 = arith.addf %67, %70 : vector<196x256xf32>
    %c2_42 = arith.constant 2 : index
    %c3_43 = arith.constant 3 : index
    %72 = memref.load %arg2[%c2_42, %c3_43] : memref<4x4xf32, #tpu.memory_space<smem>>
    %73 = vector.broadcast %72 : f32 to vector<196x256xf32>
    %74 = arith.mulf %11, %73 : vector<196x256xf32>
    %75 = arith.addf %71, %74 : vector<196x256xf32>
    %c2_44 = arith.constant 2 : index
    %76 = memref.load %arg3[%c2_44] : memref<4xf32, #tpu.memory_space<smem>>
    %77 = vector.broadcast %76 : f32 to vector<196x256xf32>
    %78 = arith.addf %75, %77 : vector<196x256xf32>
    %cst_45 = arith.constant 0.000000e+00 : f32
    %79 = vector.broadcast %cst_45 : f32 to vector<196x256xf32>
    %80 = arith.maximumf %78, %79 : vector<196x256xf32>
    %c2_46 = arith.constant 2 : index
    %c0_47 = arith.constant 0 : index
    %c0_48 = arith.constant 0 : index
    %81 = vector.load %arg4[%c2_46, %c0_47, %c0_48] : memref<4x10x196xf32, #tpu.memory_space<vmem>>, vector<1x10x196xf32>
    %82 = vector.shape_cast %81 : vector<1x10x196xf32> to vector<10x196xf32>
    %cst_49 = arith.constant dense<0.000000e+00> : vector<10x256xf32>
    %83 = tpu.matmul %82, %80, %cst_49 {dimension_numbers = #tpu.dot_dimension_numbers<[1], [0], [0], [1], [0, 0, 1, 1], [], []>} : vector<10x196xf32>, vector<196x256xf32>, vector<10x256xf32> -> vector<10x256xf32>
    %84 = arith.addf %60, %83 : vector<10x256xf32>
    %c3_50 = arith.constant 3 : index
    %c0_51 = arith.constant 0 : index
    %85 = memref.load %arg2[%c3_50, %c0_51] : memref<4x4xf32, #tpu.memory_space<smem>>
    %86 = vector.broadcast %85 : f32 to vector<196x256xf32>
    %87 = arith.mulf %2, %86 : vector<196x256xf32>
    %c3_52 = arith.constant 3 : index
    %c1_53 = arith.constant 1 : index
    %88 = memref.load %arg2[%c3_52, %c1_53] : memref<4x4xf32, #tpu.memory_space<smem>>
    %89 = vector.broadcast %88 : f32 to vector<196x256xf32>
    %90 = arith.mulf %5, %89 : vector<196x256xf32>
    %91 = arith.addf %87, %90 : vector<196x256xf32>
    %c3_54 = arith.constant 3 : index
    %c2_55 = arith.constant 2 : index
    %92 = memref.load %arg2[%c3_54, %c2_55] : memref<4x4xf32, #tpu.memory_space<smem>>
    %93 = vector.broadcast %92 : f32 to vector<196x256xf32>
    %94 = arith.mulf %8, %93 : vector<196x256xf32>
    %95 = arith.addf %91, %94 : vector<196x256xf32>
    %c3_56 = arith.constant 3 : index
    %c3_57 = arith.constant 3 : index
    %96 = memref.load %arg2[%c3_56, %c3_57] : memref<4x4xf32, #tpu.memory_space<smem>>
    %97 = vector.broadcast %96 : f32 to vector<196x256xf32>
    %98 = arith.mulf %11, %97 : vector<196x256xf32>
    %99 = arith.addf %95, %98 : vector<196x256xf32>
    %c3_58 = arith.constant 3 : index
    %100 = memref.load %arg3[%c3_58] : memref<4xf32, #tpu.memory_space<smem>>
    %101 = vector.broadcast %100 : f32 to vector<196x256xf32>
    %102 = arith.addf %99, %101 : vector<196x256xf32>
    %cst_59 = arith.constant 0.000000e+00 : f32
    %103 = vector.broadcast %cst_59 : f32 to vector<196x256xf32>
    %104 = arith.maximumf %102, %103 : vector<196x256xf32>
    %c3_60 = arith.constant 3 : index
    %c0_61 = arith.constant 0 : index
    %c0_62 = arith.constant 0 : index
    %105 = vector.load %arg4[%c3_60, %c0_61, %c0_62] : memref<4x10x196xf32, #tpu.memory_space<vmem>>, vector<1x10x196xf32>
    %106 = vector.shape_cast %105 : vector<1x10x196xf32> to vector<10x196xf32>
    %cst_63 = arith.constant dense<0.000000e+00> : vector<10x256xf32>
    %107 = tpu.matmul %106, %104, %cst_63 {dimension_numbers = #tpu.dot_dimension_numbers<[1], [0], [0], [1], [0, 0, 1, 1], [], []>} : vector<10x196xf32>, vector<196x256xf32>, vector<10x256xf32> -> vector<10x256xf32>
    %108 = arith.addf %84, %107 : vector<10x256xf32>
    %c0_64 = arith.constant 0 : index
    %c0_65 = arith.constant 0 : index
    %109 = vector.load %arg5[%c0_64, %c0_65] : memref<10x1xf32, #tpu.memory_space<vmem>>, vector<10x1xf32>
    %110 = vector.broadcast %109 : vector<10x1xf32> to vector<10x256xf32>
    %111 = arith.addf %108, %110 : vector<10x256xf32>
    %cst_66 = arith.constant dense<0xFF800000> : vector<256xf32>
    %112 = vector.multi_reduction <maximumf>, %111, %cst_66 [0] : vector<10x256xf32> to vector<256xf32>
    %113 = vector.shape_cast %112 : vector<256xf32> to vector<1x256xf32>
    %114 = vector.broadcast %113 : vector<1x256xf32> to vector<10x256xf32>
    %115 = arith.subf %111, %114 : vector<10x256xf32>
    %116 = math.exp %115 : vector<10x256xf32>
    %cst_67 = arith.constant dense<0.000000e+00> : vector<256xf32>
    %117 = vector.multi_reduction <add>, %116, %cst_67 [0] : vector<10x256xf32> to vector<256xf32>
    %118 = vector.shape_cast %117 : vector<256xf32> to vector<1x256xf32>
    %119 = tpu.reciprocal %118 {approx = true} : vector<1x256xf32> -> vector<1x256xf32>
    %120 = vector.broadcast %119 : vector<1x256xf32> to vector<10x256xf32>
    %121 = arith.mulf %116, %120 : vector<10x256xf32>
    %c0_68 = arith.constant 0 : index
    %c0_69 = arith.constant 0 : index
    %122 = vector.load %arg6[%c0_68, %c0_69] : memref<10x256xf32, #tpu.memory_space<vmem>>, vector<10x256xf32>
    tpu.vector_store %arg6[%c0_68, %c0_69], %121 {strides = array<i32>} : memref<10x256xf32, #tpu.memory_space<vmem>>, vector<10x256xf32>,
    return
  }
  func.func @transform_0(%arg0: i32) -> (i32, i32, i32) {
    %c0_i32 = arith.constant 0 : i32
    %c0_i32_0 = arith.constant 0 : i32
    %c0_i32_1 = arith.constant 0 : i32
    return %c0_i32, %c0_i32_0, %arg0 : i32, i32, i32
  }
  func.func @transform_1(%arg0: i32) -> (i32, i32) {
    %c0_i32 = arith.constant 0 : i32
    %c0_i32_0 = arith.constant 0 : i32
    %c0_i32_1 = arith.constant 0 : i32
    return %c0_i32, %c0_i32_0 : i32, i32
  }
  func.func @transform_2(%arg0: i32) -> i32 {
    %c0_i32 = arith.constant 0 : i32
    %c0_i32_0 = arith.constant 0 : i32
    return %c0_i32 : i32
  }
  func.func @transform_3(%arg0: i32) -> (i32, i32, i32) {
    %c0_i32 = arith.constant 0 : i32
    %c0_i32_0 = arith.constant 0 : i32
    %c0_i32_1 = arith.constant 0 : i32
    %c0_i32_2 = arith.constant 0 : i32
    return %c0_i32, %c0_i32_0, %c0_i32_1 : i32, i32, i32
  }
  func.func @transform_4(%arg0: i32) -> (i32, i32) {
    %c0_i32 = arith.constant 0 : i32
    %c0_i32_0 = arith.constant 0 : i32
    %c0_i32_1 = arith.constant 0 : i32
    return %c0_i32, %c0_i32_0 : i32, i32
  }
  func.func @transform_5(%arg0: i32) -> (i32, i32) {
    %c0_i32 = arith.constant 0 : i32
    %c0_i32_0 = arith.constant 0 : i32
    return %c0_i32, %arg0 : i32, i32
  }
}

</mosaic_0001>

<bundles_post_ra>
// kernel: classical_convnet_forward.1
= control target key start
LH: loop header
LB: loop body
LE: loop exit
PB: predicated region body
PF: predicated region fallthrough
CT: control target
= control target key end

     0   :  { %10 = vsyncpa [#allocation3], 0  ;;  %s5751_s0 = inlined_call_operand.hbm [shape: bf16[4,196,256], index: 0, kind: input, shape index: {}]   ;;  %s5752_s1 = inlined_call_operand.hbm [shape: f32[4,4], index: 1, kind: input, shape index: {}]   ;;  %s5753_s2 = inlined_call_operand.hbm [shape: f32[4], index: 2, kind: input, shape index: {}]   ;;  %s5754_s3 = inlined_call_operand.hbm [shape: f32[4,10,196], index: 3, kind: input, shape index: {}]   ;;  %s5755_s4 = inlined_call_operand.hbm [shape: f32[10,1], index: 4, kind: input, shape index: {}]   ;;  %s5756_s5 = inlined_call_operand.hbm [shape: f32[10,256], index: 5, kind: output, shape index: {}]  }
   0x1   :  { %11 = vsyncpa [#allocation5], 0 }
   0x2   :  { %12 = vsyncpa [#allocation8], 0 }
   0x3   :  { %13 = vsyncpa [#allocation10], 0 }
   0x4   :  { %14 = vsyncpa [#allocation4], 0  ;;  %s3082_s18 = smov [#allocation9]   ;;  %s2964_s22 = scalar_lea.hbm %s5754_s3, 2048 }
   0x5   :  { %s48_s19 = sshll.u32 %s3082_s18, 4  ;;  %p2965_p0 = scmp.ne.s32.totalorder %s5754_s3, %s2964_s22  ;;  %s49_s19 = int_to_ptr.vmem [resolvable:$true] %s48_s19 }
   0x6   :  { %p2968_p1 = scmp.lt.u32.totalorder %s2964_s22, %s5754_s3 }
   0x8   :  { %p2970_p2 = pnand %p2968_p1, %p2965_p0 }
   0xa   :  { %2973 = shalt.err (!%p2970_p2)
}
   0xb   :  { %s2974_s27 = scalar_lea.vmem %s49_s19, 2048  ;;  %p2979_p4 = scmp.lt.s32.totalorder %s49_s19, %s49_s19 }
   0xc   :  { %p2975_p3 = scmp.ne.s32.totalorder %s49_s19, %s2974_s27  ;;  %p2980_p5 = scmp.lt.s32.totalorder %s2974_s27, %s2974_s27 }
   0xe   :  { %p2981_p6 = por %p2980_p5, %p2979_p4 }
  0x10   :  { %p2982_p7 = pnand %p2981_p6, %p2975_p3 }
  0x12   :  { %2985 = shalt.err (!%p2982_p7)
}
  0x13   :  { %s3083_s28 = smov 256   ;;  %s3084_s29 = smov 16  }
  0x14   :  { %54 = dma.hbm_to_vmem [thread:$0]  %s5754_s3, 2048, %s49_s19, [#allocation10], %s3083_s28, %s3083_s28, %s3084_s29  }
  0x15   :  { %s3085_s7 = smov [#allocation2]   ;;  %s2986_s11 = scalar_lea.hbm %s5751_s0, 12800 }
  0x16   :  { %s20_s8 = sshll.u32 %s3085_s7, 4  ;;  %p2987_p8 = scmp.ne.s32.totalorder %s5751_s0, %s2986_s11  ;;  %s21_s8 = int_to_ptr.vmem [resolvable:$true] %s20_s8 }
  0x17   :  { %p2990_p9 = scmp.lt.u32.totalorder %s2986_s11, %s5751_s0 }
  0x19   :  { %p2992_p10 = pnand %p2990_p9, %p2987_p8 }
  0x1b   :  { %2995 = shalt.err (!%p2992_p10)
}
  0x1c   :  { %s2996_s16 = scalar_lea.vmem %s21_s8, 12800  ;;  %p3001_p12 = scmp.lt.s32.totalorder %s21_s8, %s21_s8 }
  0x1d   :  { %p2997_p11 = scmp.ne.s32.totalorder %s21_s8, %s2996_s16  ;;  %p3002_p13 = scmp.lt.s32.totalorder %s2996_s16, %s2996_s16 }
  0x1f   :  { %p3003_p0 = por %p3002_p13, %p3001_p12 }
  0x21   :  { %p3004_p1 = pnand %p3003_p0, %p2997_p11 }
  0x23   :  { %3007 = shalt.err (!%p3004_p1)
}
  0x24   :  { %s3086_s3 = smov 128   ;;  %s3087_s17 = smov 8  }
  0x25   :  { %26 = dma.hbm_to_vmem [thread:$0]  %s5751_s0, 12800, %s21_s8, [#allocation3], %s3086_s3, %s3086_s3, %s3087_s17  }
  0x26   :  { %s3008_s22 = scalar_lea.hbm %s5752_s1, 64 }
  0x27   :  { %p3009_p2 = scmp.ne.s32.totalorder %s5752_s1, %s3008_s22  ;;  %p3012_p3 = scmp.lt.u32.totalorder %s3008_s22, %s5752_s1 }
  0x29   :  { %p3014_p4 = pnand %p3012_p3, %p3009_p2 }
  0x2b   :  { %3017 = shalt.err (!%p3014_p4)
}
  0x2c   :  { %s3088_s27 = smov [#allocation6]   ;;  %s3018_s8 = scalar_lea.hbm %s5753_s2, 16 }
  0x2d   :  { %34 = dma.hbm_to_smem %s5752_s1, 64, %s3088_s27, [#allocation5]  }
  0x2e   :  { %p3019_p5 = scmp.ne.s32.totalorder %s5753_s2, %s3018_s8  ;;  %p3022_p6 = scmp.lt.u32.totalorder %s3018_s8, %s5753_s2 }
  0x30   :  { %p3024_p7 = pnand %p3022_p6, %p3019_p5 }
  0x32   :  { %3027 = shalt.err (!%p3024_p7)
}
  0x33   :  { %s3089_s13 = smov [#allocation7]   ;;  %s3090_s1 = smov [#allocation11]  }
  0x34   :  { %42 = dma.hbm_to_smem %s5753_s2, 16, %s3089_s13, [#allocation8]  }
  0x35   :  { %s60_s16 = sshll.u32 %s3090_s1, 4  ;;  %s3028_s20 = scalar_lea.hbm %s5755_s4, 256  ;;  %s61_s16 = int_to_ptr.vmem [resolvable:$true] %s60_s16 }
  0x36   :  { %p3029_p8 = scmp.ne.s32.totalorder %s5755_s4, %s3028_s20  ;;  %p3032_p9 = scmp.lt.u32.totalorder %s3028_s20, %s5755_s4 }
  0x38   :  { %p3034_p10 = pnand %p3032_p9, %p3029_p8 }
  0x3a   :  { %3037 = shalt.err (!%p3034_p10)
}
  0x3b   :  { %s3038_s25 = scalar_lea.vmem %s61_s16, 256  ;;  %p3043_p12 = scmp.lt.s32.totalorder %s61_s16, %s61_s16 }
  0x3c   :  { %p3039_p11 = scmp.ne.s32.totalorder %s61_s16, %s3038_s25  ;;  %p3044_p13 = scmp.lt.s32.totalorder %s3038_s25, %s3038_s25 }
  0x3e   :  { %p3045_p0 = por %p3044_p13, %p3043_p12 }
  0x40   :  { %p3046_p1 = pnand %p3045_p0, %p3039_p11 }
  0x42   :  { %3049 = shalt.err (!%p3046_p1)
}
  0x43   :  { %66 = dma.hbm_to_vmem [thread:$0]  %s5755_s4, 256, %s61_s16, [#allocation10], %s3086_s3, %s3086_s3, %s3087_s17  }
  0x44   :  { %3072 = dma.done.wait [#allocation3], 12800  }
  0x45   :  { %3073 = vsyncadd [#allocation3], 4294954496 }
  0x46   :  { %3074 = dma.done.wait [#allocation5], 64  }
  0x47   :  { %3075 = vsyncadd [#allocation5], 4294967232 }
  0x48   :  { %3076 = dma.done.wait [#allocation8], 16  }
  0x49   :  { %3077 = vsyncadd [#allocation8], 4294967280 }
  0x4a   :  { %3078 = dma.done.wait [#allocation10], 2304  }
  0x4b   :  { %3079 = vsyncadd [#allocation10], 4294964992 }
  0x4c   :  { %82 = sfence }
  0x4d   :  { %v83_v0 = vld [vmem:[#allocation2] sm:$0xff]  ;;  %v84_v1 = vld [vmem:[#allocation2 + $0x8] sm:$0xff]  ;;  %s3192_s27 = sld [smem:[#allocation6 + $0x80]]  ;;  %v160_v5 = vld [vmem:[#allocation2 + $0xd0] sm:$0xff]  ;;  %s3200_s4 = sld [smem:[#allocation6 + $0x81]]  ;;  %vm1322_vm0 = vcmask 1043456  }
  0x4e   :  { %v159_v2 = vld [vmem:[#allocation2 + $0xc8] sm:$0xff]  ;;  %v3194_v3 = vunpack.c.h.bf16 %v83_v0  ;;  %v3196_v4 = vunpack.c.h.bf16 %v84_v1  ;;  %v235_v7 = vld [vmem:[#allocation2 + $0x190] sm:$0xff]  ;;  %v236_v8 = vld [vmem:[#allocation2 + $0x198] sm:$0xff]  ;;  %v3202_v9 = vunpack.c.l.bf16 %v83_v0  ;;  %v3204_v10 = vunpack.c.h.bf16 %v160_v5  ;;  %s3210_s3 = sld [smem:[#allocation6 + $0x82]]  ;;  %s3212_s17 = sld [smem:[#allocation6 + $0x83]] }
  0x4f   :  { %v3198_v6 = vunpack.c.h.bf16 %v159_v2  ;;  %v3206_v11 = vunpack.c.h.bf16 %v235_v7  ;;  %v3208_v12 = vunpack.c.h.bf16 %v236_v8  ;;  %v311_v13 = vld [vmem:[#allocation2 + $0x258] sm:$0xff]  ;;  %v312_v14 = vld [vmem:[#allocation2 + $0x260] sm:$0xff]  ;;  %v3214_v15 = vunpack.c.l.bf16 %v84_v1  ;;  %s3220_s30 = sld [smem:[#allocation7 + $0x1]]  ;;  %s3222_s6 = sld [smem:[#allocation6 + $0x100]]  ;;  %v85_v20 = vld [vmem:[#allocation2 + $0x10] sm:$0xff] }
  0x50   :  { %v3216_v16 = vunpack.c.h.bf16 %v311_v13  ;;  %v3218_v17 = vunpack.c.h.bf16 %v312_v14  ;;  %v3224_v18 = vunpack.c.l.bf16 %v159_v2  ;;  %v3226_v19 = vunpack.c.l.bf16 %v160_v5  ;;  %v3228_v21 = vld [vmem:[#allocation2 + $0x18] sm:$0xff]  ;;  %s3230_s0 = sld [smem:[#allocation6 + $0x101]]  ;;  %s3232_s7 = sld [smem:[#allocation6 + $0x102]]  ;;  %v3244_v27 = vld [vmem:[#allocation2 + $0xe0] sm:$0xff]  ;;  %v3263_v33 = vld [vmem:[#allocation2 + $0x1a8] sm:$0xff] }
  0x51   :  { %v3234_v22 = vunpack.c.l.bf16 %v235_v7  ;;  %v3236_v23 = vunpack.c.l.bf16 %v236_v8  ;;  %v3238_v24 = vunpack.c.l.bf16 %v311_v13  ;;  %v3240_v25 = vunpack.c.l.bf16 %v312_v14  ;;  %v3242_v26 = vld [vmem:[#allocation2 + $0xd8] sm:$0xff]  ;;  %s3246_s8 = sld [smem:[#allocation6 + $0x103]]  ;;  %s3248_s9 = sld [smem:[#allocation7 + $0x2]]  ;;  %v3261_v32 = vld [vmem:[#allocation2 + $0x1a0] sm:$0xff] }
  0x52   :  { %v3250_v28 = vunpack.c.h.bf16 %v85_v20  ;;  %v3253_v29 = vunpack.c.h.bf16 %v3228_v21  ;;  %v3256_v30 = vunpack.c.h.bf16 %v3242_v26  ;;  %v3259_v31 = vunpack.c.h.bf16 %v3244_v27  ;;  %s4731_s10 = sld [smem:[#allocation6]]  ;;  %s4733_s11 = sld [smem:[#allocation6 + $0x1]] }
  0x53   :  { %v3266_v34 = vstv %s3192_s27  ;;  %v3269_v35 = vunpack.c.h.bf16 %v3261_v32  ;;  %v3272_v36 = vunpack.c.h.bf16 %v3263_v33  ;;  %v3274_v37 = vunpack.c.l.bf16 %v85_v20  ;;  %s4744_s12 = sld [smem:[#allocation6 + $0x2]]  ;;  %s4756_s13 = sld [smem:[#allocation6 + $0x3]] }
  0x54   :  { %v853_v38 = vmul.f32 %v3266_v34, %v3194_v3  ;;  %v855_v39 = vmul.f32 %v3266_v34, %v3196_v4  ;;  %v3281_v40 = vstv %s3200_s4  ;;  %v852_v41 = vmul.f32 %v3266_v34, %v3202_v9  ;;  %s4762_s14 = sld [smem:[#allocation7]]  ;;  %s4775_s1 = sld [smem:[#allocation6 + $0x181]] }
  0x55   :  { %6087 = vst [vmem:[#allocation18_spill] sm:$0xff] %v3269_v35  ;;  %6088 = vst [vmem:[#allocation19_spill] sm:$0xff] %v3272_v36  ;;  %v905_v42 = vmul.f32 %v3281_v40, %v3198_v6  ;;  %v907_v43 = vmul.f32 %v3281_v40, %v3204_v10  ;;  %v3290_v44 = vstv %s3210_s3  ;;  %v3293_v45 = vstv %s3212_s17  ;;  %s4771_s15 = sld [smem:[#allocation6 + $0x180]]  ;;  %s4785_s16 = sld [smem:[#allocation6 + $0x182]] }
  0x56   :  { %6089 = vst [vmem:[#allocation20_spill] sm:$0xff] %v3274_v37  ;;  %v1007_v46 = vmul.f32 %v3290_v44, %v3206_v11  ;;  %v1009_v47 = vmul.f32 %v3290_v44, %v3208_v12  ;;  %v1109_v48 = vmul.f32 %v3293_v45, %v3216_v16  ;;  %v1111_v49 = vmul.f32 %v3293_v45, %v3218_v17  ;;  %s4792_s18 = sld [smem:[#allocation6 + $0x183]]  ;;  %s3092_s20 = smov [#allocation12]  }
  0x57   :  { %v955_v50 = vadd.f32 %v905_v42, %v853_v38  ;;  %v957_v51 = vadd.f32 %v907_v43, %v855_v39  ;;  %v3304_v52 = vstv %s3220_s30  ;;  %v3307_v53 = vstv %s3222_s6  ;;  %s4794_s19 = sld [smem:[#allocation7 + $0x3]]  ;;  %s2687_s21 = sshll.u32 %s3092_s20, 4  ;;  %s2688_s21 = int_to_ptr.vmem [resolvable:$true] %s2687_s21 }
  0x58   :  { %v1498_v54 = vmul.f32 %v3307_v53, %v3194_v3  ;;  %v1500_v55 = vmul.f32 %v3307_v53, %v3196_v4  ;;  %v3314_v56 = vstv %s3230_s0  ;;  %v3317_v57 = vstv %s3232_s7  ;;  %s3050_s22 = scalar_lea.vmem %s2688_s21, 512  ;;  %p3055_p3 = scmp.lt.s32.totalorder %s2688_s21, %s2688_s21 }
  0x59   :  { %v1057_v58 = vadd.f32 %v1007_v46, %v955_v50  ;;  %v1059_v59 = vadd.f32 %v1009_v47, %v957_v51  ;;  %v1550_v60 = vmul.f32 %v3314_v56, %v3198_v6  ;;  %v1552_v61 = vmul.f32 %v3314_v56, %v3204_v10  ;;  %p3051_p2 = scmp.ne.s32.totalorder %s2688_s21, %s3050_s22  ;;  %p3056_p4 = scmp.lt.s32.totalorder %s3050_s22, %s3050_s22 }
  0x5a   :  { %v1652_v62 = vmul.f32 %v3317_v57, %v3206_v11  ;;  %v1654_v63 = vmul.f32 %v3317_v57, %v3208_v12  ;;  %v3328_v0 = vstv %s3246_s8  ;;  %v3331_v1 = vstv %s3248_s9 }
  0x5b   :  { %v1159_v2 = vadd.f32 %v1109_v48, %v1057_v58  ;;  %v1161_v5 = vadd.f32 %v1111_v49, %v1059_v59  ;;  %v1600_v7 = vadd.f32 %v1550_v60, %v1498_v54  ;;  %v1602_v8 = vadd.f32 %v1552_v61, %v1500_v55  ;;  %p3057_p5 = por %p3056_p4, %p3055_p3 }
  0x5c   :  { %v1754_v13 = vmul.f32 %v3328_v0, %v3216_v16  ;;  %v1756_v14 = vmul.f32 %v3328_v0, %v3218_v17  ;;  %v854_v20 = vmul.f32 %v3266_v34, %v3214_v15  ;;  %v904_v38 = vmul.f32 %v3281_v40, %v3224_v18 }
  0x5d   :  { %v1211_v39 = vadd.f32 %v3304_v52, %v1159_v2  ;;  %v1213_v42 = vadd.f32 %v3304_v52, %v1161_v5  ;;  %v1702_v43 = vadd.f32 %v1652_v62, %v1600_v7  ;;  %v1704_v46 = vadd.f32 %v1654_v63, %v1602_v8  ;;  %p3058_p6 = pnand %p3057_p5, %p3051_p2 }
  0x5e   :  { %v906_v47 = vmul.f32 %v3281_v40, %v3226_v19  ;;  %v954_v48 = vadd.f32 %v904_v38, %v852_v41  ;;  %v1006_v49 = vmul.f32 %v3290_v44, %v3234_v22  ;;  %v1008_v50 = vmul.f32 %v3290_v44, %v3236_v23 }
  0x5f   :  { %v1261_v51 = vmax.f32 %v1211_v39, 0.0  ;;  %v1263_v54 = vmax.f32 %v1213_v42, 0.0  ;;  %v1804_v55 = vadd.f32 %v1754_v13, %v1702_v43  ;;  %v1806_v58 = vadd.f32 %v1756_v14, %v1704_v46  ;;  %v3365_v43 = vld [vmem:[#allocation2 + $0x268] sm:$0xff] }
  0x60   :  { %v956_v59 = vadd.f32 %v906_v47, %v854_v20  ;;  %v1056_v60 = vadd.f32 %v1006_v49, %v954_v48  ;;  %v1108_v61 = vmul.f32 %v3293_v45, %v3238_v24  ;;  %v1110_v62 = vmul.f32 %v3293_v45, %v3240_v25 }
  0x61   :  { %v2736_v63 = vpack.c.bf16 %v1263_v54, %v1261_v51  ;;  %v1856_v41 = vadd.f32 %v3331_v1, %v1804_v55  ;;  %v1858_v2 = vadd.f32 %v3331_v1, %v1806_v58  ;;  %v1497_v5 = vmul.f32 %v3307_v53, %v3202_v9 }
  0x62   :  { %v1058_v7 = vadd.f32 %v1008_v50, %v956_v59  ;;  %v1158_v8 = vadd.f32 %v1108_v61, %v1056_v60  ;;  %v1499_v13 = vmul.f32 %v3307_v53, %v3214_v15  ;;  %v1549_v14 = vmul.f32 %v3314_v56, %v3224_v18  ;;  %v314_v50 = vld [vmem:[#allocation2 + $0x270] sm:$0xff] }
  0x63   :  { %2737 = vmatprep.subr.bf16.mxu1 %v2736_v63  ;;  %v1906_v20 = vmax.f32 %v1856_v41, 0.0  ;;  %v1908_v38 = vmax.f32 %v1858_v2, 0.0  ;;  %v1551_v39 = vmul.f32 %v3314_v56, %v3226_v19  ;;  %v1651_v42 = vmul.f32 %v3317_v57, %v3234_v22 }
  0x64   :  { %v1160_v46 = vadd.f32 %v1110_v62, %v1058_v7  ;;  %v1210_v47 = vadd.f32 %v3304_v52, %v1158_v8  ;;  %v1599_v48 = vadd.f32 %v1549_v14, %v1497_v5  ;;  %v1653_v49 = vmul.f32 %v3317_v57, %v3236_v23 }
  0x65   :  { %v2832_v51 = vpack.c.bf16 %v1908_v38, %v1906_v20  ;;  %v1601_v54 = vadd.f32 %v1551_v39, %v1499_v13  ;;  %v1753_v55 = vmul.f32 %v3328_v0, %v3238_v24  ;;  %v1755_v58 = vmul.f32 %v3328_v0, %v3240_v25 }
  0x66   :  { %v1212_v59 = vadd.f32 %v3304_v52, %v1160_v46  ;;  %v1260_v60 = vmax.f32 %v1210_v47, 0.0  ;;  %v1701_v61 = vadd.f32 %v1651_v42, %v1599_v48  ;;  %v3376_v62 = vunpack.c.h.bf16 %v3365_v43 }
  0x67   :  { %2833 = vmatprep.subr.bf16.mxu0 %v2832_v51  ;;  %v1703_v63 = vadd.f32 %v1653_v49, %v1601_v54  ;;  %v3378_v41 = vunpack.c.h.bf16 %v314_v50  ;;  %v857_v2 = vmul.f32 %v3266_v34, %v3250_v28  ;;  %v859_v5 = vmul.f32 %v3266_v34, %v3253_v29 }
  0x68   :  { %6090 = vst [vmem:[#allocation21_spill] sm:$0xff] %v3376_v62  ;;  %v1262_v7 = vmax.f32 %v1212_v59, 0.0  ;;  %v1803_v8 = vadd.f32 %v1753_v55, %v1701_v61  ;;  %v909_v13 = vmul.f32 %v3281_v40, %v3256_v30  ;;  %v911_v14 = vmul.f32 %v3281_v40, %v3259_v31 }
  0x69   :  { %6091 = vst [vmem:[#allocation22_spill] sm:$0xff] %v3378_v41  ;;  %v1805_v20 = vadd.f32 %v1755_v58, %v1703_v63  ;;  %v1011_v38 = vmul.f32 %v3290_v44, %v3269_v35  ;;  %v1013_v39 = vmul.f32 %v3290_v44, %v3272_v36  ;;  %v1113_v42 = vmul.f32 %v3293_v45, %v3376_v62 }
  0x6a   :  { %v2738_v46 = vpack.c.bf16 %v1262_v7, %v1260_v60  ;;  %v1855_v47 = vadd.f32 %v3331_v1, %v1803_v8  ;;  %v959_v48 = vadd.f32 %v909_v13, %v857_v2  ;;  %v961_v49 = vadd.f32 %v911_v14, %v859_v5 }
  0x6b   :  { %v1857_v51 = vadd.f32 %v3331_v1, %v1805_v20  ;;  %v1115_v54 = vmul.f32 %v3293_v45, %v3378_v41  ;;  %v1502_v55 = vmul.f32 %v3307_v53, %v3250_v28  ;;  %v1504_v58 = vmul.f32 %v3307_v53, %v3253_v29 }
  0x6c   :  { %2739 = vmatpush1.bf16.msra.mxu1 %v2738_v46  ;;  %v1905_v59 = vmax.f32 %v1855_v47, 0.0  ;;  %v1061_v61 = vadd.f32 %v1011_v38, %v959_v48  ;;  %v1063_v63 = vadd.f32 %v1013_v39, %v961_v49  ;;  %v1554_v60 = vmul.f32 %v3314_v56, %v3256_v30 }
  0x6d   :  { %v1907_v2 = vmax.f32 %v1857_v51, 0.0  ;;  %v1556_v5 = vmul.f32 %v3314_v56, %v3259_v31  ;;  %v1656_v7 = vmul.f32 %v3317_v57, %v3269_v35  ;;  %v1658_v8 = vmul.f32 %v3317_v57, %v3272_v36 }
  0x6e   :  { %v1163_v13 = vadd.f32 %v1113_v42, %v1061_v61  ;;  %v1165_v14 = vadd.f32 %v1115_v54, %v1063_v63  ;;  %v1604_v20 = vadd.f32 %v1554_v60, %v1502_v55  ;;  %v1758_v38 = vmul.f32 %v3328_v0, %v3376_v62 }
  0x6f   :  { %v2834_v39 = vpack.c.bf16 %v1907_v2, %v1905_v59  ;;  %v1606_v46 = vadd.f32 %v1556_v5, %v1504_v58  ;;  %v1760_v47 = vmul.f32 %v3328_v0, %v3378_v41  ;;  %v3415_v48 = vunpack.c.l.bf16 %v3228_v21 }
  0x70   :  { %v1215_v49 = vadd.f32 %v3304_v52, %v1163_v13  ;;  %v1217_v51 = vadd.f32 %v3304_v52, %v1165_v14  ;;  %v1706_v35 = vadd.f32 %v1656_v7, %v1604_v20  ;;  %v3420_v42 = vunpack.c.l.bf16 %v3242_v26 }
  0x71   :  { %6092 = vst [vmem:[#allocation23_spill] sm:$0xff] %v3415_v48  ;;  %2835 = vmatpush1.bf16.msra.mxu0 %v2834_v39  ;;  %v1708_v54 = vadd.f32 %v1658_v8, %v1606_v46  ;;  %v3423_v55 = vunpack.c.l.bf16 %v3244_v27  ;;  %v3426_v58 = vunpack.c.l.bf16 %v3261_v32  ;;  %v3429_v59 = vunpack.c.l.bf16 %v3263_v33 }
  0x72   :  { %6093 = vst [vmem:[#allocation24_spill] sm:$0xff] %v3420_v42  ;;  %v1265_v21 = vmax.f32 %v1215_v49, 0.0  ;;  %v1267_v61 = vmax.f32 %v1217_v51, 0.0  ;;  %v1808_v63 = vadd.f32 %v1758_v38, %v1706_v35  ;;  %v3432_v60 = vunpack.c.l.bf16 %v3365_v43 }
  0x73   :  { %6094 = vst [vmem:[#allocation25_spill] sm:$0xff] %v3423_v55  ;;  %6095 = vst [vmem:[#allocation26_spill] sm:$0xff] %v3426_v58  ;;  %v1810_v2 = vadd.f32 %v1760_v47, %v1708_v54  ;;  %v3434_v26 = vunpack.c.l.bf16 %v314_v50  ;;  %v856_v5 = vmul.f32 %v3266_v34, %v3274_v37  ;;  %v858_v27 = vmul.f32 %v3266_v34, %v3415_v48 }
  0x74   :  { %6096 = vst [vmem:[#allocation27_spill] sm:$0xff] %v3429_v59  ;;  %6097 = vst [vmem:[#allocation28_spill] sm:$0xff] %v3432_v60  ;;  %v2740_v32 = vpack.c.bf16 %v1267_v61, %v1265_v21  ;;  %v1860_v7 = vadd.f32 %v3331_v1, %v1808_v63  ;;  %v908_v33 = vmul.f32 %v3281_v40, %v3420_v42  ;;  %vm1315_vm1 = vcmask 556032  }
  0x75   :  { %6098 = vst [vmem:[#allocation29_spill] sm:$0xff] %v3434_v26  ;;  %v910_v35 = vmul.f32 %v3281_v40, %v3423_v55  ;;  %v1862_v43 = vadd.f32 %v3331_v1, %v1810_v2  ;;  %v1010_v50 = vmul.f32 %v3290_v44, %v3426_v58  ;;  %v1012_v8 = vmul.f32 %v3290_v44, %v3429_v59  ;;  %v3464_v2 = vld [vmem:[#allocation2 + $0x20] sm:$0xff] }
  0x76   :  { %v1112_v13 = vmul.f32 %v3293_v45, %v3432_v60  ;;  %2741 = vmatprep.subr.bf16.mxu1 %v2740_v32  ;;  %v1910_v14 = vmax.f32 %v1860_v7, 0.0  ;;  %v958_v20 = vadd.f32 %v908_v33, %v856_v5  ;;  %v1114_v39 = vmul.f32 %v3293_v45, %v3434_v26  ;;  %v3466_v5 = vld [vmem:[#allocation2 + $0x28] sm:$0xff] }
  0x77   :  { %v960_v38 = vadd.f32 %v910_v35, %v858_v27  ;;  %v1912_v46 = vmax.f32 %v1862_v43, 0.0  ;;  %v1501_v47 = vmul.f32 %v3307_v53, %v3274_v37  ;;  %v1503_v49 = vmul.f32 %v3307_v53, %v3415_v48  ;;  %v3468_v27 = vld [vmem:[#allocation2 + $0xe8] sm:$0xff]  ;;  %v3474_v43 = vld [vmem:[#allocation2 + $0xf0] sm:$0xff] }
  0x78   :  { %v1553_v51 = vmul.f32 %v3314_v56, %v3420_v42  ;;  %v1060_v54 = vadd.f32 %v1010_v50, %v958_v20  ;;  %v1555_v61 = vmul.f32 %v3314_v56, %v3423_v55  ;;  %v1655_v63 = vmul.f32 %v3317_v57, %v3426_v58  ;;  %v239_v58 = vld [vmem:[#allocation2 + $0x1b0] sm:$0xff]  ;;  %v240_v55 = vld [vmem:[#allocation2 + $0x1b8] sm:$0xff] }
  0x79   :  { %v1062_v21 = vadd.f32 %v1012_v8, %v960_v38  ;;  %v2836_v32 = vpack.c.bf16 %v1912_v46, %v1910_v14  ;;  %v1657_v33 = vmul.f32 %v3317_v57, %v3429_v59  ;;  %v1757_v35 = vmul.f32 %v3328_v0, %v3432_v60  ;;  %v3478_v42 = vld [vmem:[#allocation2 + $0x278] sm:$0xff] }
  0x7a   :  { %v1603_v7 = vadd.f32 %v1553_v51, %v1501_v47  ;;  %v1162_v50 = vadd.f32 %v1112_v13, %v1060_v54  ;;  %v1605_v20 = vadd.f32 %v1555_v61, %v1503_v49  ;;  %v1759_v38 = vmul.f32 %v3328_v0, %v3434_v26  ;;  %v316_v13 = vld [vmem:[#allocation2 + $0x280] sm:$0xff] }
  0x7b   :  { %v1164_v8 = vadd.f32 %v1114_v39, %v1062_v21  ;;  %2837 = vmatprep.subr.bf16.mxu0 %v2836_v32  ;;  %v3481_v46 = vunpack.c.h.bf16 %v3464_v2  ;;  %v3484_v47 = vunpack.c.h.bf16 %v3466_v5  ;;  %v3487_v51 = vunpack.c.h.bf16 %v3468_v27 }
  0x7c   :  { %v1705_v14 = vadd.f32 %v1655_v63, %v1603_v7  ;;  %v1214_v39 = vadd.f32 %v3304_v52, %v1162_v50  ;;  %v1707_v54 = vadd.f32 %v1657_v33, %v1605_v20  ;;  %v3492_v21 = vunpack.c.h.bf16 %v3474_v43 }
  0x7d   :  { %6099 = vst [vmem:[#allocation30_spill] sm:$0xff] %v3481_v46  ;;  %6100 = vst [vmem:[#allocation31_spill] sm:$0xff] %v3484_v47  ;;  %v1216_v49 = vadd.f32 %v3304_v52, %v1164_v8  ;;  %v3494_v63 = vunpack.c.h.bf16 %v239_v58  ;;  %v3496_v32 = vunpack.c.h.bf16 %v240_v55  ;;  %v3499_v7 = vunpack.c.h.bf16 %v3478_v42 }
  0x7e   :  { %6101 = vst [vmem:[#allocation32_spill] sm:$0xff] %v3487_v51  ;;  %6102 = vst [vmem:[#allocation33_spill] sm:$0xff] %v3492_v21  ;;  %v1807_v61 = vadd.f32 %v1757_v35, %v1705_v14  ;;  %v1264_v26 = vmax.f32 %v1214_v39, 0.0  ;;  %v1809_v59 = vadd.f32 %v1759_v38, %v1707_v54  ;;  %v3501_v48 = vunpack.c.h.bf16 %v316_v13 }
  0x7f   :  { %6103 = vst [vmem:[#allocation34_spill] sm:$0xff] %v3494_v63  ;;  %6104 = vst [vmem:[#allocation35_spill] sm:$0xff] %v3496_v32  ;;  %v1266_v60 = vmax.f32 %v1216_v49, 0.0  ;;  %v861_v33 = vmul.f32 %v3266_v34, %v3481_v46  ;;  %v863_v35 = vmul.f32 %v3266_v34, %v3484_v47  ;;  %v913_v8 = vmul.f32 %v3281_v40, %v3487_v51 }
  0x80   :  { %6105 = vst [vmem:[#allocation36_spill] sm:$0xff] %v3499_v7  ;;  %6106 = vst [vmem:[#allocation37_spill] sm:$0xff] %v3501_v48  ;;  %v1859_v50 = vadd.f32 %v3331_v1, %v1807_v61  ;;  %v1861_v14 = vadd.f32 %v3331_v1, %v1809_v59  ;;  %v915_v39 = vmul.f32 %v3281_v40, %v3492_v21  ;;  %vm2627_vm2 = vcmask 1041408  }
  0x81   :  { %v2742_v20 = vpack.c.bf16 %v1266_v60, %v1264_v26  ;;  %v1015_v38 = vmul.f32 %v3290_v44, %v3494_v63  ;;  %v963_v54 = vadd.f32 %v913_v8, %v861_v33  ;;  %v1017_v61 = vmul.f32 %v3290_v44, %v3496_v32 }
  0x82   :  { %v1909_v49 = vmax.f32 %v1859_v50, 0.0  ;;  %v1117_v37 = vmul.f32 %v3293_v45, %v3499_v7  ;;  %v1911_v41 = vmax.f32 %v1861_v14, 0.0  ;;  %v965_v62 = vadd.f32 %v915_v39, %v863_v35 }
  0x83   :  { %2743 = vmatpush1.bf16.msra.mxu1 %v2742_v20  ;;  %v1119_v59 = vmul.f32 %v3293_v45, %v3501_v48  ;;  %v1506_v60 = vmul.f32 %v3307_v53, %v3481_v46  ;;  %v1065_v26 = vadd.f32 %v1015_v38, %v963_v54  ;;  %v1508_v50 = vmul.f32 %v3307_v53, %v3484_v47 }
  0x84   :  { %v1558_v33 = vmul.f32 %v3314_v56, %v3487_v51  ;;  %v1560_v8 = vmul.f32 %v3314_v56, %v3492_v21  ;;  %v2838_v36 = vpack.c.bf16 %v1911_v41, %v1909_v49  ;;  %v1067_v20 = vadd.f32 %v1017_v61, %v965_v62 }
  0x85   :  { %v1660_v35 = vmul.f32 %v3317_v57, %v3494_v63  ;;  %v1662_v14 = vmul.f32 %v3317_v57, %v3496_v32  ;;  %v1167_v39 = vadd.f32 %v1117_v37, %v1065_v26  ;;  %v1762_v54 = vmul.f32 %v3328_v0, %v3499_v7 }
  0x86   :  { %v1608_v46 = vadd.f32 %v1558_v33, %v1506_v60  ;;  %v1610_v38 = vadd.f32 %v1560_v8, %v1508_v50  ;;  %2839 = vmatpush1.bf16.msra.mxu0 %v2838_v36  ;;  %v1169_v47 = vadd.f32 %v1119_v59, %v1067_v20  ;;  %v1764_v51 = vmul.f32 %v3328_v0, %v3501_v48 }
  0x87   :  { %v3538_v41 = vunpack.c.l.bf16 %v3464_v2  ;;  %v3541_v62 = vunpack.c.l.bf16 %v3466_v5  ;;  %v1219_v49 = vadd.f32 %v3304_v52, %v1167_v39  ;;  %v3545_v60 = vunpack.c.l.bf16 %v3468_v27 }
  0x88   :  { %v1710_v61 = vadd.f32 %v1660_v35, %v1608_v46  ;;  %v1712_v37 = vadd.f32 %v1662_v14, %v1610_v38  ;;  %v1221_v26 = vadd.f32 %v3304_v52, %v1169_v47  ;;  %v3549_v36 = vunpack.c.l.bf16 %v3474_v43 }
  0x89   :  { %6107 = vst [vmem:[#allocation38_spill] sm:$0xff] %v3538_v41  ;;  %6108 = vst [vmem:[#allocation39_spill] sm:$0xff] %v3541_v62  ;;  %v3551_v59 = vunpack.c.l.bf16 %v239_v58  ;;  %v3553_v50 = vunpack.c.l.bf16 %v240_v55  ;;  %v1269_v2 = vmax.f32 %v1219_v49, 0.0  ;;  %v3556_v8 = vunpack.c.l.bf16 %v3478_v42 }
  0x8a   :  { %6109 = vst [vmem:[#allocation40_spill] sm:$0xff] %v3545_v60  ;;  %6110 = vst [vmem:[#allocation41_spill] sm:$0xff] %v3549_v36  ;;  %v1812_v33 = vadd.f32 %v1762_v54, %v1710_v61  ;;  %v1814_v5 = vadd.f32 %v1764_v51, %v1712_v37  ;;  %v1271_v46 = vmax.f32 %v1221_v26, 0.0  ;;  %v3558_v20 = vunpack.c.l.bf16 %v316_v13 }
  0x8b   :  { %6111 = vst [vmem:[#allocation42_spill] sm:$0xff] %v3551_v59  ;;  %6112 = vst [vmem:[#allocation43_spill] sm:$0xff] %v3553_v50  ;;  %v860_v27 = vmul.f32 %v3266_v34, %v3538_v41  ;;  %v862_v43 = vmul.f32 %v3266_v34, %v3541_v62  ;;  %v912_v47 = vmul.f32 %v3281_v40, %v3545_v60 }
  0x8c   :  { %6113 = vst [vmem:[#allocation44_spill] sm:$0xff] %v3556_v8  ;;  %6114 = vst [vmem:[#allocation45_spill] sm:$0xff] %v3558_v20  ;;  %v1864_v58 = vadd.f32 %v3331_v1, %v1812_v33  ;;  %v1866_v55 = vadd.f32 %v3331_v1, %v1814_v5  ;;  %v914_v42 = vmul.f32 %v3281_v40, %v3549_v36 }
  0x8d   :  { %v2744_v51 = vpack.c.bf16 %v1271_v46, %v1269_v2  ;;  %v1014_v13 = vmul.f32 %v3290_v44, %v3551_v59  ;;  %v1016_v35 = vmul.f32 %v3290_v44, %v3553_v50  ;;  %v1116_v14 = vmul.f32 %v3293_v45, %v3556_v8 }
  0x8e   :  { %v1914_v39 = vmax.f32 %v1864_v58, 0.0  ;;  %v1916_v38 = vmax.f32 %v1866_v55, 0.0  ;;  %v962_v54 = vadd.f32 %v912_v47, %v860_v27  ;;  %v964_v49 = vadd.f32 %v914_v42, %v862_v43  ;;  %v3586_v43 = vld [vmem:[#allocation2 + $0x30] sm:$0xff]  ;;  %v3588_v58 = vld [vmem:[#allocation2 + $0x38] sm:$0xff] }
  0x8f   :  { %2745 = vmatprep.subr.bf16.mxu1 %v2744_v51  ;;  %v1118_v61 = vmul.f32 %v3293_v45, %v3558_v20  ;;  %v1505_v37 = vmul.f32 %v3307_v53, %v3538_v41  ;;  %v1507_v26 = vmul.f32 %v3307_v53, %v3541_v62  ;;  %v1557_v2 = vmul.f32 %v3314_v56, %v3545_v60  ;;  %v3590_v55 = vld [vmem:[#allocation2 + $0xf8] sm:$0xff] }
  0x90   :  { %v2840_v33 = vpack.c.bf16 %v1916_v38, %v1914_v39  ;;  %v1064_v5 = vadd.f32 %v1014_v13, %v962_v54  ;;  %v1066_v46 = vadd.f32 %v1016_v35, %v964_v49  ;;  %v1559_v27 = vmul.f32 %v3314_v56, %v3549_v36  ;;  %v3598_v35 = vld [vmem:[#allocation2 + $0x100] sm:$0xff] }
  0x91   :  { %v1607_v47 = vadd.f32 %v1557_v2, %v1505_v37  ;;  %v1659_v42 = vmul.f32 %v3317_v57, %v3551_v59  ;;  %v1661_v51 = vmul.f32 %v3317_v57, %v3553_v50  ;;  %v1761_v13 = vmul.f32 %v3328_v0, %v3556_v8  ;;  %v241_v36 = vld [vmem:[#allocation2 + $0x1c0] sm:$0xff]  ;;  %v242_v37 = vld [vmem:[#allocation2 + $0x1c8] sm:$0xff] }
  0x92   :  { %2841 = vmatprep.subr.bf16.mxu0 %v2840_v33  ;;  %v1166_v39 = vadd.f32 %v1116_v14, %v1064_v5  ;;  %v1168_v38 = vadd.f32 %v1118_v61, %v1066_v46  ;;  %v1609_v54 = vadd.f32 %v1559_v27, %v1507_v26  ;;  %v1763_v49 = vmul.f32 %v3328_v0, %v3558_v20  ;;  %v3602_v2 = vld [vmem:[#allocation2 + $0x288] sm:$0xff]  ;;  %v318_v14 = vld [vmem:[#allocation2 + $0x290] sm:$0xff] }
  0x93   :  { %v1709_v59 = vadd.f32 %v1659_v42, %v1607_v47  ;;  %v3605_v60 = vunpack.c.h.bf16 %v3586_v43  ;;  %v3608_v50 = vunpack.c.h.bf16 %v3588_v58  ;;  %v3611_v8 = vunpack.c.h.bf16 %v3590_v55 }
  0x94   :  { %v1218_v61 = vadd.f32 %v3304_v52, %v1166_v39  ;;  %v1220_v26 = vadd.f32 %v3304_v52, %v1168_v38  ;;  %v1711_v33 = vadd.f32 %v1661_v51, %v1609_v54  ;;  %v3616_v5 = vunpack.c.h.bf16 %v3598_v35 }
  0x95   :  { %6115 = vst [vmem:[#allocation46_spill] sm:$0xff] %v3605_v60  ;;  %6116 = vst [vmem:[#allocation47_spill] sm:$0xff] %v3608_v50  ;;  %v1811_v46 = vadd.f32 %v1761_v13, %v1709_v59  ;;  %v3618_v27 = vunpack.c.h.bf16 %v241_v36  ;;  %v3620_v47 = vunpack.c.h.bf16 %v242_v37  ;;  %v3623_v42 = vunpack.c.h.bf16 %v3602_v2 }
  0x96   :  { %6117 = vst [vmem:[#allocation48_spill] sm:$0xff] %v3611_v8  ;;  %6118 = vst [vmem:[#allocation49_spill] sm:$0xff] %v3616_v5  ;;  %v1268_v20 = vmax.f32 %v1218_v61, 0.0  ;;  %v1270_v62 = vmax.f32 %v1220_v26, 0.0  ;;  %v1813_v41 = vadd.f32 %v1763_v49, %v1711_v33  ;;  %v3625_v48 = vunpack.c.h.bf16 %v318_v14 }
  0x97   :  { %6119 = vst [vmem:[#allocation50_spill] sm:$0xff] %v3618_v27  ;;  %6120 = vst [vmem:[#allocation51_spill] sm:$0xff] %v3620_v47  ;;  %v1863_v39 = vadd.f32 %v3331_v1, %v1811_v46  ;;  %v865_v51 = vmul.f32 %v3266_v34, %v3605_v60  ;;  %v867_v59 = vmul.f32 %v3266_v34, %v3608_v50 }
  0x98   :  { %6121 = vst [vmem:[#allocation52_spill] sm:$0xff] %v3623_v42  ;;  %6122 = vst [vmem:[#allocation53_spill] sm:$0xff] %v3625_v48  ;;  %v917_v13 = vmul.f32 %v3281_v40, %v3611_v8  ;;  %v2746_v38 = vpack.c.bf16 %v1270_v62, %v1268_v20  ;;  %v1865_v54 = vadd.f32 %v3331_v1, %v1813_v41 }
  0x99   :  { %v919_v61 = vmul.f32 %v3281_v40, %v3616_v5  ;;  %v1019_v49 = vmul.f32 %v3290_v44, %v3618_v27  ;;  %v1913_v26 = vmax.f32 %v1863_v39, 0.0  ;;  %v1021_v46 = vmul.f32 %v3290_v44, %v3620_v47 }
  0x9a   :  { %v967_v33 = vadd.f32 %v917_v13, %v865_v51  ;;  %v1121_v7 = vmul.f32 %v3293_v45, %v3623_v42  ;;  %2747 = vmatpush1.bf16.msra.mxu1 %v2746_v38  ;;  %v1915_v32 = vmax.f32 %v1865_v54, 0.0  ;;  %v1123_v41 = vmul.f32 %v3293_v45, %v3625_v48 }
  0x9b   :  { %v969_v63 = vadd.f32 %v919_v61, %v867_v59  ;;  %v1510_v62 = vmul.f32 %v3307_v53, %v3605_v60  ;;  %v1512_v39 = vmul.f32 %v3307_v53, %v3608_v50  ;;  %v1562_v51 = vmul.f32 %v3314_v56, %v3611_v8 }
  0x9c   :  { %v1069_v20 = vadd.f32 %v1019_v49, %v967_v33  ;;  %v1564_v13 = vmul.f32 %v3314_v56, %v3616_v5  ;;  %v2842_v21 = vpack.c.bf16 %v1915_v32, %v1913_v26  ;;  %v1664_v59 = vmul.f32 %v3317_v57, %v3618_v27 }
  0x9d   :  { %v1071_v38 = vadd.f32 %v1021_v46, %v969_v63  ;;  %v1666_v54 = vmul.f32 %v3317_v57, %v3620_v47  ;;  %v1612_v60 = vadd.f32 %v1562_v51, %v1510_v62  ;;  %v1766_v33 = vmul.f32 %v3328_v0, %v3623_v42 }
  0x9e   :  { %v1171_v61 = vadd.f32 %v1121_v7, %v1069_v20  ;;  %v1614_v49 = vadd.f32 %v1564_v13, %v1512_v39  ;;  %2843 = vmatpush1.bf16.msra.mxu0 %v2842_v21  ;;  %v1768_v8 = vmul.f32 %v3328_v0, %v3625_v48  ;;  %v3662_v32 = vunpack.c.l.bf16 %v3586_v43 }
  0x9f   :  { %v1173_v50 = vadd.f32 %v1123_v41, %v1071_v38  ;;  %v3665_v63 = vunpack.c.l.bf16 %v3588_v58  ;;  %v1714_v46 = vadd.f32 %v1664_v59, %v1612_v60  ;;  %v3669_v62 = vunpack.c.l.bf16 %v3590_v55 }
  0xa0   :  { %6123 = vst [vmem:[#allocation54_spill] sm:$0xff] %v3662_v32  ;;  %v1223_v26 = vadd.f32 %v3304_v52, %v1171_v61  ;;  %v1716_v7 = vadd.f32 %v1666_v54, %v1614_v49  ;;  %v3673_v21 = vunpack.c.l.bf16 %v3598_v35  ;;  %v3675_v41 = vunpack.c.l.bf16 %v241_v36 }
  0xa1   :  { %6124 = vst [vmem:[#allocation55_spill] sm:$0xff] %v3665_v63  ;;  %6125 = vst [vmem:[#allocation56_spill] sm:$0xff] %v3669_v62  ;;  %v1225_v20 = vadd.f32 %v3304_v52, %v1173_v50  ;;  %v3677_v39 = vunpack.c.l.bf16 %v242_v37  ;;  %v1816_v51 = vadd.f32 %v1766_v33, %v1714_v46  ;;  %v3680_v13 = vunpack.c.l.bf16 %v3602_v2 }
  0xa2   :  { %6126 = vst [vmem:[#allocation57_spill] sm:$0xff] %v3673_v21  ;;  %6127 = vst [vmem:[#allocation58_spill] sm:$0xff] %v3675_v41  ;;  %v1273_v43 = vmax.f32 %v1223_v26, 0.0  ;;  %v1818_v58 = vadd.f32 %v1768_v8, %v1716_v7  ;;  %v3682_v38 = vunpack.c.l.bf16 %v318_v14  ;;  %v864_v55 = vmul.f32 %v3266_v34, %v3662_v32 }
  0xa3   :  { %6128 = vst [vmem:[#allocation59_spill] sm:$0xff] %v3677_v39  ;;  %6129 = vst [vmem:[#allocation60_spill] sm:$0xff] %v3680_v13  ;;  %v1275_v60 = vmax.f32 %v1225_v20, 0.0  ;;  %v866_v50 = vmul.f32 %v3266_v34, %v3665_v63  ;;  %v1868_v36 = vadd.f32 %v3331_v1, %v1816_v51  ;;  %v916_v37 = vmul.f32 %v3281_v40, %v3669_v62 }
  0xa4   :  { %6130 = vst [vmem:[#allocation61_spill] sm:$0xff] %v3682_v38  ;;  %v1870_v35 = vadd.f32 %v3331_v1, %v1818_v58  ;;  %v918_v8 = vmul.f32 %v3281_v40, %v3673_v21  ;;  %v1018_v14 = vmul.f32 %v3290_v44, %v3675_v41  ;;  %v1020_v59 = vmul.f32 %v3290_v44, %v3677_v39 }
  0xa5   :  { %v2748_v2 = vpack.c.bf16 %v1275_v60, %v1273_v43  ;;  %v1120_v54 = vmul.f32 %v3293_v45, %v3680_v13  ;;  %v1918_v61 = vmax.f32 %v1868_v36, 0.0  ;;  %v966_v33 = vadd.f32 %v916_v37, %v864_v55  ;;  %v3712_v36 = vld [vmem:[#allocation2 + $0x48] sm:$0xff] }
  0xa6   :  { %v1920_v49 = vmax.f32 %v1870_v35, 0.0  ;;  %v968_v26 = vadd.f32 %v918_v8, %v866_v50  ;;  %v1122_v46 = vmul.f32 %v3293_v45, %v3682_v38  ;;  %v1509_v7 = vmul.f32 %v3307_v53, %v3662_v32  ;;  %v3710_v50 = vld [vmem:[#allocation2 + $0x40] sm:$0xff]  ;;  %v3714_v35 = vld [vmem:[#allocation2 + $0x108] sm:$0xff] }
  0xa7   :  { %2749 = vmatprep.subr.bf16.mxu1 %v2748_v2  ;;  %v1511_v20 = vmul.f32 %v3307_v53, %v3665_v63  ;;  %v1561_v43 = vmul.f32 %v3314_v56, %v3669_v62  ;;  %v1068_v58 = vadd.f32 %v1018_v14, %v966_v33  ;;  %v1563_v55 = vmul.f32 %v3314_v56, %v3673_v21  ;;  %v243_v21 = vld [vmem:[#allocation2 + $0x1d0] sm:$0xff] }
  0xa8   :  { %v2844_v51 = vpack.c.bf16 %v1920_v49, %v1918_v61  ;;  %v1070_v60 = vadd.f32 %v1020_v59, %v968_v26  ;;  %v1663_v8 = vmul.f32 %v3317_v57, %v3675_v41  ;;  %v1665_v2 = vmul.f32 %v3317_v57, %v3677_v39  ;;  %v3722_v59 = vld [vmem:[#allocation2 + $0x110] sm:$0xff] }
  0xa9   :  { %v1611_v37 = vadd.f32 %v1561_v43, %v1509_v7  ;;  %v1765_v14 = vmul.f32 %v3328_v0, %v3680_v13  ;;  %v1170_v61 = vadd.f32 %v1120_v54, %v1068_v58  ;;  %v1613_v33 = vadd.f32 %v1563_v55, %v1511_v20  ;;  %v244_v7 = vld [vmem:[#allocation2 + $0x1d8] sm:$0xff]  ;;  %v320_v54 = vld [vmem:[#allocation2 + $0x2a0] sm:$0xff] }
  0xaa   :  { %2845 = vmatprep.subr.bf16.mxu0 %v2844_v51  ;;  %v1172_v49 = vadd.f32 %v1122_v46, %v1070_v60  ;;  %v1767_v26 = vmul.f32 %v3328_v0, %v3682_v38  ;;  %v3726_v43 = vld [vmem:[#allocation2 + $0x298] sm:$0xff]  ;;  %v3729_v62 = vunpack.c.h.bf16 %v3710_v50  ;;  %v3732_v39 = vunpack.c.h.bf16 %v3712_v36 }
  0xab   :  { %v1713_v41 = vadd.f32 %v1663_v8, %v1611_v37  ;;  %v3735_v13 = vunpack.c.h.bf16 %v3714_v35  ;;  %v1222_v46 = vadd.f32 %v3304_v52, %v1170_v61  ;;  %v1715_v51 = vadd.f32 %v1665_v2, %v1613_v33 }
  0xac   :  { %6131 = vst [vmem:[#allocation62_spill] sm:$0xff] %v3729_v62  ;;  %6132 = vst [vmem:[#allocation63_spill] sm:$0xff] %v3732_v39  ;;  %v1224_v20 = vadd.f32 %v3304_v52, %v1172_v49  ;;  %v3740_v58 = vunpack.c.h.bf16 %v3722_v59  ;;  %v3742_v55 = vunpack.c.h.bf16 %v243_v21  ;;  %v3744_v37 = vunpack.c.h.bf16 %v244_v7 }
  0xad   :  { %6133 = vst [vmem:[#allocation64_spill] sm:$0xff] %v3735_v13  ;;  %v1815_v60 = vadd.f32 %v1765_v14, %v1713_v41  ;;  %v3747_v8 = vunpack.c.h.bf16 %v3726_v43  ;;  %v1272_v38 = vmax.f32 %v1222_v46, 0.0  ;;  %v1817_v32 = vadd.f32 %v1767_v26, %v1715_v51 }
  0xae   :  { %6134 = vst [vmem:[#allocation65_spill] sm:$0xff] %v3740_v58  ;;  %6135 = vst [vmem:[#allocation66_spill] sm:$0xff] %v3742_v55  ;;  %v1274_v63 = vmax.f32 %v1224_v20, 0.0  ;;  %v3749_v48 = vunpack.c.h.bf16 %v320_v54  ;;  %v869_v2 = vmul.f32 %v3266_v34, %v3729_v62  ;;  %v871_v41 = vmul.f32 %v3266_v34, %v3732_v39 }
  0xaf   :  { %6136 = vst [vmem:[#allocation67_spill] sm:$0xff] %v3744_v37  ;;  %6137 = vst [vmem:[#allocation68_spill] sm:$0xff] %v3747_v8  ;;  %v1867_v61 = vadd.f32 %v3331_v1, %v1815_v60  ;;  %v921_v14 = vmul.f32 %v3281_v40, %v3735_v13  ;;  %v1869_v33 = vadd.f32 %v3331_v1, %v1817_v32 }
  0xb0   :  { %6138 = vst [vmem:[#allocation69_spill] sm:$0xff] %v3749_v48  ;;  %v2750_v49 = vpack.c.bf16 %v1274_v63, %v1272_v38  ;;  %v923_v46 = vmul.f32 %v3281_v40, %v3740_v58  ;;  %v1023_v26 = vmul.f32 %v3290_v44, %v3742_v55  ;;  %v1025_v60 = vmul.f32 %v3290_v44, %v3744_v37 }
  0xb1   :  { %v1917_v20 = vmax.f32 %v1867_v61, 0.0  ;;  %v971_v51 = vadd.f32 %v921_v14, %v869_v2  ;;  %v1125_v42 = vmul.f32 %v3293_v45, %v3747_v8  ;;  %v1919_v47 = vmax.f32 %v1869_v33, 0.0 }
  0xb2   :  { %2751 = vmatpush1.bf16.msra.mxu1 %v2750_v49  ;;  %v973_v27 = vadd.f32 %v923_v46, %v871_v41  ;;  %v1127_v32 = vmul.f32 %v3293_v45, %v3749_v48  ;;  %v1514_v63 = vmul.f32 %v3307_v53, %v3729_v62  ;;  %v1516_v61 = vmul.f32 %v3307_v53, %v3732_v39 }
  0xb3   :  { %v1073_v38 = vadd.f32 %v1023_v26, %v971_v51  ;;  %v1566_v2 = vmul.f32 %v3314_v56, %v3735_v13  ;;  %v1568_v14 = vmul.f32 %v3314_v56, %v3740_v58  ;;  %v2846_v5 = vpack.c.bf16 %v1919_v47, %v1917_v20 }
  0xb4   :  { %v1075_v49 = vadd.f32 %v1025_v60, %v973_v27  ;;  %v1668_v41 = vmul.f32 %v3317_v57, %v3742_v55  ;;  %v1670_v33 = vmul.f32 %v3317_v57, %v3744_v37  ;;  %v1770_v51 = vmul.f32 %v3328_v0, %v3747_v8 }
  0xb5   :  { %v1175_v46 = vadd.f32 %v1125_v42, %v1073_v38  ;;  %v1616_v62 = vadd.f32 %v1566_v2, %v1514_v63  ;;  %v1618_v26 = vadd.f32 %v1568_v14, %v1516_v61  ;;  %2847 = vmatpush1.bf16.msra.mxu0 %v2846_v5  ;;  %v1772_v13 = vmul.f32 %v3328_v0, %v3749_v48 }
  0xb6   :  { %v1177_v39 = vadd.f32 %v1127_v32, %v1075_v49  ;;  %v3786_v47 = vunpack.c.l.bf16 %v3710_v50  ;;  %v3789_v27 = vunpack.c.l.bf16 %v3712_v36  ;;  %v3793_v63 = vunpack.c.l.bf16 %v3714_v35 }
  0xb7   :  { %v1227_v20 = vadd.f32 %v3304_v52, %v1175_v46  ;;  %v1718_v60 = vadd.f32 %v1668_v41, %v1616_v62  ;;  %v1720_v42 = vadd.f32 %v1670_v33, %v1618_v26  ;;  %v3797_v5 = vunpack.c.l.bf16 %v3722_v59 }
  0xb8   :  { %6139 = vst [vmem:[#allocation70_spill] sm:$0xff] %v3786_v47  ;;  %6140 = vst [vmem:[#allocation71_spill] sm:$0xff] %v3789_v27  ;;  %v1229_v38 = vadd.f32 %v3304_v52, %v1177_v39  ;;  %v3799_v32 = vunpack.c.l.bf16 %v243_v21  ;;  %v3801_v61 = vunpack.c.l.bf16 %v244_v7  ;;  %v3804_v14 = vunpack.c.l.bf16 %v3726_v43 }
  0xb9   :  { %6141 = vst [vmem:[#allocation72_spill] sm:$0xff] %v3793_v63  ;;  %6142 = vst [vmem:[#allocation73_spill] sm:$0xff] %v3797_v5  ;;  %v1277_v50 = vmax.f32 %v1227_v20, 0.0  ;;  %v1820_v2 = vadd.f32 %v1770_v51, %v1718_v60  ;;  %v1822_v36 = vadd.f32 %v1772_v13, %v1720_v42  ;;  %v3806_v49 = vunpack.c.l.bf16 %v320_v54 }
  0xba   :  { %6143 = vst [vmem:[#allocation74_spill] sm:$0xff] %v3799_v32  ;;  %6144 = vst [vmem:[#allocation75_spill] sm:$0xff] %v3801_v61  ;;  %v1279_v62 = vmax.f32 %v1229_v38, 0.0  ;;  %v868_v35 = vmul.f32 %v3266_v34, %v3786_v47  ;;  %v870_v39 = vmul.f32 %v3266_v34, %v3789_v27  ;;  %v920_v7 = vmul.f32 %v3281_v40, %v3793_v63 }
  0xbb   :  { %6145 = vst [vmem:[#allocation76_spill] sm:$0xff] %v3804_v14  ;;  %6146 = vst [vmem:[#allocation77_spill] sm:$0xff] %v3806_v49  ;;  %v1872_v21 = vadd.f32 %v3331_v1, %v1820_v2  ;;  %v1874_v59 = vadd.f32 %v3331_v1, %v1822_v36  ;;  %v922_v13 = vmul.f32 %v3281_v40, %v3797_v5 }
  0xbc   :  { %v2752_v43 = vpack.c.bf16 %v1279_v62, %v1277_v50  ;;  %v1022_v54 = vmul.f32 %v3290_v44, %v3799_v32  ;;  %v1024_v41 = vmul.f32 %v3290_v44, %v3801_v61  ;;  %v1124_v33 = vmul.f32 %v3293_v45, %v3804_v14 }
  0xbd   :  { %v1922_v46 = vmax.f32 %v1872_v21, 0.0  ;;  %v1924_v26 = vmax.f32 %v1874_v59, 0.0  ;;  %v970_v51 = vadd.f32 %v920_v7, %v868_v35  ;;  %v972_v20 = vadd.f32 %v922_v13, %v870_v39  ;;  %v3834_v39 = vld [vmem:[#allocation2 + $0x50] sm:$0xff]  ;;  %v3836_v21 = vld [vmem:[#allocation2 + $0x58] sm:$0xff] }
  0xbe   :  { %2753 = vmatprep.subr.bf16.mxu1 %v2752_v43  ;;  %v1126_v60 = vmul.f32 %v3293_v45, %v3806_v49  ;;  %v1513_v42 = vmul.f32 %v3307_v53, %v3786_v47  ;;  %v1515_v38 = vmul.f32 %v3307_v53, %v3789_v27  ;;  %v1565_v50 = vmul.f32 %v3314_v56, %v3793_v63  ;;  %v3838_v59 = vld [vmem:[#allocation2 + $0x118] sm:$0xff] }
  0xbf   :  { %v2848_v2 = vpack.c.bf16 %v1924_v26, %v1922_v46  ;;  %v1072_v36 = vadd.f32 %v1022_v54, %v970_v51  ;;  %v1074_v62 = vadd.f32 %v1024_v41, %v972_v20  ;;  %v1567_v35 = vmul.f32 %v3314_v56, %v3797_v5  ;;  %v3846_v41 = vld [vmem:[#allocation2 + $0x120] sm:$0xff] }
  0xc0   :  { %v1615_v7 = vadd.f32 %v1565_v50, %v1513_v42  ;;  %v1667_v13 = vmul.f32 %v3317_v57, %v3799_v32  ;;  %v1669_v43 = vmul.f32 %v3317_v57, %v3801_v61  ;;  %v1769_v54 = vmul.f32 %v3328_v0, %v3804_v14  ;;  %v245_v5 = vld [vmem:[#allocation2 + $0x1e0] sm:$0xff]  ;;  %v246_v42 = vld [vmem:[#allocation2 + $0x1e8] sm:$0xff] }
  0xc1   :  { %2849 = vmatprep.subr.bf16.mxu0 %v2848_v2  ;;  %v1174_v46 = vadd.f32 %v1124_v33, %v1072_v36  ;;  %v1176_v26 = vadd.f32 %v1126_v60, %v1074_v62  ;;  %v1617_v51 = vadd.f32 %v1567_v35, %v1515_v38  ;;  %v1771_v20 = vmul.f32 %v3328_v0, %v3806_v49  ;;  %v3850_v50 = vld [vmem:[#allocation2 + $0x2a8] sm:$0xff]  ;;  %v322_v33 = vld [vmem:[#allocation2 + $0x2b0] sm:$0xff] }
  0xc2   :  { %v1717_v32 = vadd.f32 %v1667_v13, %v1615_v7  ;;  %v3853_v63 = vunpack.c.h.bf16 %v3834_v39  ;;  %v3856_v61 = vunpack.c.h.bf16 %v3836_v21  ;;  %v3859_v14 = vunpack.c.h.bf16 %v3838_v59 }
  0xc3   :  { %v1226_v60 = vadd.f32 %v3304_v52, %v1174_v46  ;;  %v1228_v38 = vadd.f32 %v3304_v52, %v1176_v26  ;;  %v1719_v2 = vadd.f32 %v1669_v43, %v1617_v51  ;;  %v3864_v36 = vunpack.c.h.bf16 %v3846_v41 }
  0xc4   :  { %6147 = vst [vmem:[#allocation78_spill] sm:$0xff] %v3853_v63  ;;  %6148 = vst [vmem:[#allocation79_spill] sm:$0xff] %v3856_v61  ;;  %v1819_v62 = vadd.f32 %v1769_v54, %v1717_v32  ;;  %v3866_v35 = vunpack.c.h.bf16 %v245_v5  ;;  %v3868_v7 = vunpack.c.h.bf16 %v246_v42  ;;  %v3871_v13 = vunpack.c.h.bf16 %v3850_v50 }
  0xc5   :  { %6149 = vst [vmem:[#allocation80_spill] sm:$0xff] %v3859_v14  ;;  %6150 = vst [vmem:[#allocation81_spill] sm:$0xff] %v3864_v36  ;;  %v1276_v49 = vmax.f32 %v1226_v60, 0.0  ;;  %v1278_v27 = vmax.f32 %v1228_v38, 0.0  ;;  %v1821_v47 = vadd.f32 %v1771_v20, %v1719_v2  ;;  %v3873_v48 = vunpack.c.h.bf16 %v322_v33 }
  0xc6   :  { %6151 = vst [vmem:[#allocation82_spill] sm:$0xff] %v3866_v35  ;;  %6152 = vst [vmem:[#allocation83_spill] sm:$0xff] %v3868_v7  ;;  %v1871_v46 = vadd.f32 %v3331_v1, %v1819_v62  ;;  %v873_v43 = vmul.f32 %v3266_v34, %v3853_v63  ;;  %v875_v32 = vmul.f32 %v3266_v34, %v3856_v61 }
  0xc7   :  { %6153 = vst [vmem:[#allocation84_spill] sm:$0xff] %v3871_v13  ;;  %6154 = vst [vmem:[#allocation85_spill] sm:$0xff] %v3873_v48  ;;  %v925_v54 = vmul.f32 %v3281_v40, %v3859_v14  ;;  %v2754_v26 = vpack.c.bf16 %v1278_v27, %v1276_v49  ;;  %v1873_v51 = vadd.f32 %v3331_v1, %v1821_v47 }
  0xc8   :  { %v927_v60 = vmul.f32 %v3281_v40, %v3864_v36  ;;  %v1027_v20 = vmul.f32 %v3290_v44, %v3866_v35  ;;  %v1921_v38 = vmax.f32 %v1871_v46, 0.0  ;;  %v1029_v62 = vmul.f32 %v3290_v44, %v3868_v7 }
  0xc9   :  { %v975_v2 = vadd.f32 %v925_v54, %v873_v43  ;;  %v1129_v8 = vmul.f32 %v3293_v45, %v3871_v13  ;;  %2755 = vmatpush1.bf16.msra.mxu1 %v2754_v26  ;;  %v1923_v37 = vmax.f32 %v1873_v51, 0.0  ;;  %v1131_v47 = vmul.f32 %v3293_v45, %v3873_v48 }
  0xca   :  { %v977_v55 = vadd.f32 %v927_v60, %v875_v32  ;;  %v1518_v27 = vmul.f32 %v3307_v53, %v3853_v63  ;;  %v1520_v46 = vmul.f32 %v3307_v53, %v3856_v61  ;;  %v1570_v43 = vmul.f32 %v3314_v56, %v3859_v14 }
  0xcb   :  { %v1077_v49 = vadd.f32 %v1027_v20, %v975_v2  ;;  %v1572_v54 = vmul.f32 %v3314_v56, %v3864_v36  ;;  %v2850_v58 = vpack.c.bf16 %v1923_v37, %v1921_v38  ;;  %v1672_v32 = vmul.f32 %v3317_v57, %v3866_v35 }
  0xcc   :  { %v1079_v26 = vadd.f32 %v1029_v62, %v977_v55  ;;  %v1674_v51 = vmul.f32 %v3317_v57, %v3868_v7  ;;  %v1620_v63 = vadd.f32 %v1570_v43, %v1518_v27  ;;  %v1774_v2 = vmul.f32 %v3328_v0, %v3871_v13 }
  0xcd   :  { %v1179_v60 = vadd.f32 %v1129_v8, %v1077_v49  ;;  %v1622_v20 = vadd.f32 %v1572_v54, %v1520_v46  ;;  %2851 = vmatpush1.bf16.msra.mxu0 %v2850_v58  ;;  %v1776_v14 = vmul.f32 %v3328_v0, %v3873_v48  ;;  %v3910_v37 = vunpack.c.l.bf16 %v3834_v39 }
  0xce   :  { %v1181_v61 = vadd.f32 %v1131_v47, %v1079_v26  ;;  %v3913_v55 = vunpack.c.l.bf16 %v3836_v21  ;;  %v1722_v62 = vadd.f32 %v1672_v32, %v1620_v63  ;;  %v3917_v27 = vunpack.c.l.bf16 %v3838_v59 }
  0xcf   :  { %6155 = vst [vmem:[#allocation86_spill] sm:$0xff] %v3910_v37  ;;  %v1231_v38 = vadd.f32 %v3304_v52, %v1179_v60  ;;  %v1724_v8 = vadd.f32 %v1674_v51, %v1622_v20  ;;  %v3921_v58 = vunpack.c.l.bf16 %v3846_v41  ;;  %v3923_v47 = vunpack.c.l.bf16 %v245_v5 }
  0xd0   :  { %6156 = vst [vmem:[#allocation87_spill] sm:$0xff] %v3913_v55  ;;  %6157 = vst [vmem:[#allocation88_spill] sm:$0xff] %v3917_v27  ;;  %v1233_v49 = vadd.f32 %v3304_v52, %v1181_v61  ;;  %v3925_v46 = vunpack.c.l.bf16 %v246_v42  ;;  %v1824_v43 = vadd.f32 %v1774_v2, %v1722_v62  ;;  %v3928_v54 = vunpack.c.l.bf16 %v3850_v50 }
  0xd1   :  { %6158 = vst [vmem:[#allocation89_spill] sm:$0xff] %v3921_v58  ;;  %6159 = vst [vmem:[#allocation90_spill] sm:$0xff] %v3923_v47  ;;  %v1281_v39 = vmax.f32 %v1231_v38, 0.0  ;;  %v1826_v21 = vadd.f32 %v1776_v14, %v1724_v8  ;;  %v3930_v26 = vunpack.c.l.bf16 %v322_v33  ;;  %v872_v59 = vmul.f32 %v3266_v34, %v3910_v37 }
  0xd2   :  { %6160 = vst [vmem:[#allocation91_spill] sm:$0xff] %v3925_v46  ;;  %6161 = vst [vmem:[#allocation92_spill] sm:$0xff] %v3928_v54  ;;  %v1283_v63 = vmax.f32 %v1233_v49, 0.0  ;;  %v874_v61 = vmul.f32 %v3266_v34, %v3913_v55  ;;  %v1876_v5 = vadd.f32 %v3331_v1, %v1824_v43  ;;  %v924_v42 = vmul.f32 %v3281_v40, %v3917_v27 }
  0xd3   :  { %6162 = vst [vmem:[#allocation93_spill] sm:$0xff] %v3930_v26  ;;  %v1878_v41 = vadd.f32 %v3331_v1, %v1826_v21  ;;  %v926_v14 = vmul.f32 %v3281_v40, %v3921_v58  ;;  %v1026_v33 = vmul.f32 %v3290_v44, %v3923_v47  ;;  %v1028_v32 = vmul.f32 %v3290_v44, %v3925_v46 }
  0xd4   :  { %v2756_v50 = vpack.c.bf16 %v1283_v63, %v1281_v39  ;;  %v1128_v51 = vmul.f32 %v3293_v45, %v3928_v54  ;;  %v1926_v60 = vmax.f32 %v1876_v5, 0.0  ;;  %v974_v2 = vadd.f32 %v924_v42, %v872_v59  ;;  %v3960_v5 = vld [vmem:[#allocation2 + $0x68] sm:$0xff] }
  0xd5   :  { %v1928_v20 = vmax.f32 %v1878_v41, 0.0  ;;  %v976_v38 = vadd.f32 %v926_v14, %v874_v61  ;;  %v1130_v62 = vmul.f32 %v3293_v45, %v3930_v26  ;;  %v1517_v8 = vmul.f32 %v3307_v53, %v3910_v37  ;;  %v3958_v61 = vld [vmem:[#allocation2 + $0x60] sm:$0xff]  ;;  %v3962_v41 = vld [vmem:[#allocation2 + $0x128] sm:$0xff] }
  0xd6   :  { %2757 = vmatprep.subr.bf16.mxu1 %v2756_v50  ;;  %v1519_v49 = vmul.f32 %v3307_v53, %v3913_v55  ;;  %v1569_v39 = vmul.f32 %v3314_v56, %v3917_v27  ;;  %v1076_v21 = vadd.f32 %v1026_v33, %v974_v2  ;;  %v1571_v59 = vmul.f32 %v3314_v56, %v3921_v58  ;;  %v247_v58 = vld [vmem:[#allocation2 + $0x1f0] sm:$0xff] }
  0xd7   :  { %v2852_v43 = vpack.c.bf16 %v1928_v20, %v1926_v60  ;;  %v1078_v63 = vadd.f32 %v1028_v32, %v976_v38  ;;  %v1671_v14 = vmul.f32 %v3317_v57, %v3923_v47  ;;  %v1673_v50 = vmul.f32 %v3317_v57, %v3925_v46  ;;  %v3970_v32 = vld [vmem:[#allocation2 + $0x130] sm:$0xff] }
  0xd8   :  { %v1619_v42 = vadd.f32 %v1569_v39, %v1517_v8  ;;  %v1773_v33 = vmul.f32 %v3328_v0, %v3928_v54  ;;  %v1178_v60 = vadd.f32 %v1128_v51, %v1076_v21  ;;  %v1621_v2 = vadd.f32 %v1571_v59, %v1519_v49  ;;  %v248_v8 = vld [vmem:[#allocation2 + $0x1f8] sm:$0xff]  ;;  %v324_v51 = vld [vmem:[#allocation2 + $0x2c0] sm:$0xff] }
  0xd9   :  { %2853 = vmatprep.subr.bf16.mxu0 %v2852_v43  ;;  %v1180_v20 = vadd.f32 %v1130_v62, %v1078_v63  ;;  %v1775_v38 = vmul.f32 %v3328_v0, %v3930_v26  ;;  %v3974_v39 = vld [vmem:[#allocation2 + $0x2b8] sm:$0xff]  ;;  %v3977_v27 = vunpack.c.h.bf16 %v3958_v61  ;;  %v3980_v46 = vunpack.c.h.bf16 %v3960_v5 }
  0xda   :  { %v1721_v47 = vadd.f32 %v1671_v14, %v1619_v42  ;;  %v3983_v54 = vunpack.c.h.bf16 %v3962_v41  ;;  %v1230_v62 = vadd.f32 %v3304_v52, %v1178_v60  ;;  %v1723_v43 = vadd.f32 %v1673_v50, %v1621_v2 }
  0xdb   :  { %6163 = vst [vmem:[#allocation94_spill] sm:$0xff] %v3977_v27  ;;  %6164 = vst [vmem:[#allocation95_spill] sm:$0xff] %v3980_v46  ;;  %v1232_v49 = vadd.f32 %v3304_v52, %v1180_v20  ;;  %v3988_v21 = vunpack.c.h.bf16 %v3970_v32  ;;  %v3990_v59 = vunpack.c.h.bf16 %v247_v58  ;;  %v3992_v42 = vunpack.c.h.bf16 %v248_v8 }
  0xdc   :  { %6165 = vst [vmem:[#allocation96_spill] sm:$0xff] %v3983_v54  ;;  %v1823_v63 = vadd.f32 %v1773_v33, %v1721_v47  ;;  %v3995_v14 = vunpack.c.h.bf16 %v3974_v39  ;;  %v1280_v26 = vmax.f32 %v1230_v62, 0.0  ;;  %v1825_v37 = vadd.f32 %v1775_v38, %v1723_v43 }
  0xdd   :  { %6166 = vst [vmem:[#allocation97_spill] sm:$0xff] %v3988_v21  ;;  %6167 = vst [vmem:[#allocation98_spill] sm:$0xff] %v3990_v59  ;;  %v1282_v55 = vmax.f32 %v1232_v49, 0.0  ;;  %v3997_v48 = vunpack.c.h.bf16 %v324_v51  ;;  %v877_v50 = vmul.f32 %v3266_v34, %v3977_v27  ;;  %v879_v47 = vmul.f32 %v3266_v34, %v3980_v46 }
  0xde   :  { %6168 = vst [vmem:[#allocation99_spill] sm:$0xff] %v3992_v42  ;;  %6169 = vst [vmem:[#allocation100_spill] sm:$0xff] %v3995_v14  ;;  %v1875_v60 = vadd.f32 %v3331_v1, %v1823_v63  ;;  %v929_v33 = vmul.f32 %v3281_v40, %v3983_v54  ;;  %v1877_v2 = vadd.f32 %v3331_v1, %v1825_v37 }
  0xdf   :  { %6170 = vst [vmem:[#allocation101_spill] sm:$0xff] %v3997_v48  ;;  %v2758_v20 = vpack.c.bf16 %v1282_v55, %v1280_v26  ;;  %v931_v62 = vmul.f32 %v3281_v40, %v3988_v21  ;;  %v1031_v38 = vmul.f32 %v3290_v44, %v3990_v59  ;;  %v1033_v63 = vmul.f32 %v3290_v44, %v3992_v42 }
  0xe0   :  { %v1925_v49 = vmax.f32 %v1875_v60, 0.0  ;;  %v979_v43 = vadd.f32 %v929_v33, %v877_v50  ;;  %v1133_v13 = vmul.f32 %v3293_v45, %v3995_v14  ;;  %v1927_v7 = vmax.f32 %v1877_v2, 0.0 }
  0xe1   :  { %2759 = vmatpush1.bf16.msra.mxu1 %v2758_v20  ;;  %v981_v35 = vadd.f32 %v931_v62, %v879_v47  ;;  %v1135_v37 = vmul.f32 %v3293_v45, %v3997_v48  ;;  %v1522_v55 = vmul.f32 %v3307_v53, %v3977_v27  ;;  %v1524_v60 = vmul.f32 %v3307_v53, %v3980_v46 }
  0xe2   :  { %v1081_v26 = vadd.f32 %v1031_v38, %v979_v43  ;;  %v1574_v50 = vmul.f32 %v3314_v56, %v3983_v54  ;;  %v1576_v33 = vmul.f32 %v3314_v56, %v3988_v21  ;;  %v2854_v36 = vpack.c.bf16 %v1927_v7, %v1925_v49 }
  0xe3   :  { %v1083_v20 = vadd.f32 %v1033_v63, %v981_v35  ;;  %v1676_v47 = vmul.f32 %v3317_v57, %v3990_v59  ;;  %v1678_v2 = vmul.f32 %v3317_v57, %v3992_v42  ;;  %v1778_v43 = vmul.f32 %v3328_v0, %v3995_v14 }
  0xe4   :  { %v1183_v62 = vadd.f32 %v1133_v13, %v1081_v26  ;;  %v1624_v27 = vadd.f32 %v1574_v50, %v1522_v55  ;;  %v1626_v38 = vadd.f32 %v1576_v33, %v1524_v60  ;;  %2855 = vmatpush1.bf16.msra.mxu0 %v2854_v36  ;;  %v1780_v54 = vmul.f32 %v3328_v0, %v3997_v48 }
  0xe5   :  { %v1185_v46 = vadd.f32 %v1135_v37, %v1083_v20  ;;  %v4034_v7 = vunpack.c.l.bf16 %v3958_v61  ;;  %v4037_v35 = vunpack.c.l.bf16 %v3960_v5  ;;  %v4041_v55 = vunpack.c.l.bf16 %v3962_v41 }
  0xe6   :  { %v1235_v49 = vadd.f32 %v3304_v52, %v1183_v62  ;;  %v1726_v63 = vadd.f32 %v1676_v47, %v1624_v27  ;;  %v1728_v13 = vadd.f32 %v1678_v2, %v1626_v38  ;;  %v4045_v36 = vunpack.c.l.bf16 %v3970_v32 }
  0xe7   :  { %6171 = vst [vmem:[#allocation102_spill] sm:$0xff] %v4034_v7  ;;  %6172 = vst [vmem:[#allocation103_spill] sm:$0xff] %v4037_v35  ;;  %v1237_v26 = vadd.f32 %v3304_v52, %v1185_v46  ;;  %v4047_v37 = vunpack.c.l.bf16 %v247_v58  ;;  %v4049_v60 = vunpack.c.l.bf16 %v248_v8  ;;  %v4052_v33 = vunpack.c.l.bf16 %v3974_v39 }
  0xe8   :  { %6173 = vst [vmem:[#allocation104_spill] sm:$0xff] %v4041_v55  ;;  %6174 = vst [vmem:[#allocation105_spill] sm:$0xff] %v4045_v36  ;;  %v1285_v61 = vmax.f32 %v1235_v49, 0.0  ;;  %v1828_v50 = vadd.f32 %v1778_v43, %v1726_v63  ;;  %v1830_v5 = vadd.f32 %v1780_v54, %v1728_v13  ;;  %v4054_v20 = vunpack.c.l.bf16 %v324_v51 }
  0xe9   :  { %6175 = vst [vmem:[#allocation106_spill] sm:$0xff] %v4047_v37  ;;  %6176 = vst [vmem:[#allocation107_spill] sm:$0xff] %v4049_v60  ;;  %v1287_v27 = vmax.f32 %v1237_v26, 0.0  ;;  %v876_v41 = vmul.f32 %v3266_v34, %v4034_v7  ;;  %v878_v46 = vmul.f32 %v3266_v34, %v4037_v35  ;;  %v928_v8 = vmul.f32 %v3281_v40, %v4041_v55 }
  0xea   :  { %6177 = vst [vmem:[#allocation108_spill] sm:$0xff] %v4052_v33  ;;  %6178 = vst [vmem:[#allocation109_spill] sm:$0xff] %v4054_v20  ;;  %v1880_v58 = vadd.f32 %v3331_v1, %v1828_v50  ;;  %v1882_v32 = vadd.f32 %v3331_v1, %v1830_v5  ;;  %v930_v54 = vmul.f32 %v3281_v40, %v4045_v36 }
  0xeb   :  { %v2760_v39 = vpack.c.bf16 %v1287_v27, %v1285_v61  ;;  %v1030_v51 = vmul.f32 %v3290_v44, %v4047_v37  ;;  %v1032_v47 = vmul.f32 %v3290_v44, %v4049_v60  ;;  %v1132_v2 = vmul.f32 %v3293_v45, %v4052_v33 }
  0xec   :  { %v1930_v62 = vmax.f32 %v1880_v58, 0.0  ;;  %v1932_v38 = vmax.f32 %v1882_v32, 0.0  ;;  %v978_v43 = vadd.f32 %v928_v8, %v876_v41  ;;  %v980_v49 = vadd.f32 %v930_v54, %v878_v46  ;;  %v4082_v46 = vld [vmem:[#allocation2 + $0x70] sm:$0xff]  ;;  %v4084_v58 = vld [vmem:[#allocation2 + $0x78] sm:$0xff] }
  0xed   :  { %2761 = vmatprep.subr.bf16.mxu1 %v2760_v39  ;;  %v1134_v63 = vmul.f32 %v3293_v45, %v4054_v20  ;;  %v1521_v13 = vmul.f32 %v3307_v53, %v4034_v7  ;;  %v1523_v26 = vmul.f32 %v3307_v53, %v4037_v35  ;;  %v1573_v61 = vmul.f32 %v3314_v56, %v4041_v55  ;;  %v4086_v32 = vld [vmem:[#allocation2 + $0x138] sm:$0xff] }
  0xee   :  { %v2856_v50 = vpack.c.bf16 %v1932_v38, %v1930_v62  ;;  %v1080_v5 = vadd.f32 %v1030_v51, %v978_v43  ;;  %v1082_v27 = vadd.f32 %v1032_v47, %v980_v49  ;;  %v1575_v41 = vmul.f32 %v3314_v56, %v4045_v36  ;;  %v4094_v47 = vld [vmem:[#allocation2 + $0x140] sm:$0xff] }
  0xef   :  { %v1623_v8 = vadd.f32 %v1573_v61, %v1521_v13  ;;  %v1675_v54 = vmul.f32 %v3317_v57, %v4047_v37  ;;  %v1677_v39 = vmul.f32 %v3317_v57, %v4049_v60  ;;  %v1777_v51 = vmul.f32 %v3328_v0, %v4052_v33  ;;  %v249_v36 = vld [vmem:[#allocation2 + $0x200] sm:$0xff]  ;;  %v250_v13 = vld [vmem:[#allocation2 + $0x208] sm:$0xff] }
  0xf0   :  { %2857 = vmatprep.subr.bf16.mxu0 %v2856_v50  ;;  %v1182_v62 = vadd.f32 %v1132_v2, %v1080_v5  ;;  %v1184_v38 = vadd.f32 %v1134_v63, %v1082_v27  ;;  %v1625_v43 = vadd.f32 %v1575_v41, %v1523_v26  ;;  %v1779_v49 = vmul.f32 %v3328_v0, %v4054_v20  ;;  %v4098_v61 = vld [vmem:[#allocation2 + $0x2c8] sm:$0xff]  ;;  %v326_v2 = vld [vmem:[#allocation2 + $0x2d0] sm:$0xff] }
  0xf1   :  { %v1725_v37 = vadd.f32 %v1675_v54, %v1623_v8  ;;  %v4101_v55 = vunpack.c.h.bf16 %v4082_v46  ;;  %v4104_v60 = vunpack.c.h.bf16 %v4084_v58  ;;  %v4107_v33 = vunpack.c.h.bf16 %v4086_v32 }
  0xf2   :  { %v1234_v63 = vadd.f32 %v3304_v52, %v1182_v62  ;;  %v1236_v26 = vadd.f32 %v3304_v52, %v1184_v38  ;;  %v1727_v50 = vadd.f32 %v1677_v39, %v1625_v43  ;;  %v4112_v5 = vunpack.c.h.bf16 %v4094_v47 }
  0xf3   :  { %6179 = vst [vmem:[#allocation110_spill] sm:$0xff] %v4101_v55  ;;  %6180 = vst [vmem:[#allocation111_spill] sm:$0xff] %v4104_v60  ;;  %v1827_v27 = vadd.f32 %v1777_v51, %v1725_v37  ;;  %v4114_v41 = vunpack.c.h.bf16 %v249_v36  ;;  %v4116_v8 = vunpack.c.h.bf16 %v250_v13  ;;  %v4119_v54 = vunpack.c.h.bf16 %v4098_v61 }
  0xf4   :  { %6181 = vst [vmem:[#allocation112_spill] sm:$0xff] %v4107_v33  ;;  %6182 = vst [vmem:[#allocation113_spill] sm:$0xff] %v4112_v5  ;;  %v1284_v20 = vmax.f32 %v1234_v63, 0.0  ;;  %v1286_v35 = vmax.f32 %v1236_v26, 0.0  ;;  %v1829_v7 = vadd.f32 %v1779_v49, %v1727_v50  ;;  %v4121_v48 = vunpack.c.h.bf16 %v326_v2 }
  0xf5   :  { %6183 = vst [vmem:[#allocation114_spill] sm:$0xff] %v4114_v41  ;;  %6184 = vst [vmem:[#allocation115_spill] sm:$0xff] %v4116_v8  ;;  %v1879_v62 = vadd.f32 %v3331_v1, %v1827_v27  ;;  %v881_v39 = vmul.f32 %v3266_v34, %v4101_v55  ;;  %v883_v37 = vmul.f32 %v3266_v34, %v4104_v60 }
  0xf6   :  { %6185 = vst [vmem:[#allocation116_spill] sm:$0xff] %v4119_v54  ;;  %6186 = vst [vmem:[#allocation117_spill] sm:$0xff] %v4121_v48  ;;  %v933_v51 = vmul.f32 %v3281_v40, %v4107_v33  ;;  %v2762_v38 = vpack.c.bf16 %v1286_v35, %v1284_v20  ;;  %v1881_v43 = vadd.f32 %v3331_v1, %v1829_v7 }
  0xf7   :  { %v935_v63 = vmul.f32 %v3281_v40, %v4112_v5  ;;  %v1035_v49 = vmul.f32 %v3290_v44, %v4114_v41  ;;  %v1929_v26 = vmax.f32 %v1879_v62, 0.0  ;;  %v1037_v27 = vmul.f32 %v3290_v44, %v4116_v8 }
  0xf8   :  { %v983_v50 = vadd.f32 %v933_v51, %v881_v39  ;;  %v1137_v14 = vmul.f32 %v3293_v45, %v4119_v54  ;;  %2763 = vmatpush1.bf16.msra.mxu1 %v2762_v38  ;;  %v1931_v42 = vmax.f32 %v1881_v43, 0.0  ;;  %v1139_v7 = vmul.f32 %v3293_v45, %v4121_v48 }
  0xf9   :  { %v985_v59 = vadd.f32 %v935_v63, %v883_v37  ;;  %v1526_v35 = vmul.f32 %v3307_v53, %v4101_v55  ;;  %v1528_v62 = vmul.f32 %v3307_v53, %v4104_v60  ;;  %v1578_v39 = vmul.f32 %v3314_v56, %v4107_v33 }
  0xfa   :  { %v1085_v20 = vadd.f32 %v1035_v49, %v983_v50  ;;  %v1580_v51 = vmul.f32 %v3314_v56, %v4112_v5  ;;  %v2858_v21 = vpack.c.bf16 %v1931_v42, %v1929_v26  ;;  %v1680_v37 = vmul.f32 %v3317_v57, %v4114_v41 }
  0xfb   :  { %v1087_v38 = vadd.f32 %v1037_v27, %v985_v59  ;;  %v1682_v43 = vmul.f32 %v3317_v57, %v4116_v8  ;;  %v1628_v55 = vadd.f32 %v1578_v39, %v1526_v35  ;;  %v1782_v50 = vmul.f32 %v3328_v0, %v4119_v54 }
  0xfc   :  { %v1187_v63 = vadd.f32 %v1137_v14, %v1085_v20  ;;  %v1630_v49 = vadd.f32 %v1580_v51, %v1528_v62  ;;  %2859 = vmatpush1.bf16.msra.mxu0 %v2858_v21  ;;  %v1784_v33 = vmul.f32 %v3328_v0, %v4121_v48  ;;  %v4158_v42 = vunpack.c.l.bf16 %v4082_v46 }
  0xfd   :  { %v1189_v60 = vadd.f32 %v1139_v7, %v1087_v38  ;;  %v4161_v59 = vunpack.c.l.bf16 %v4084_v58  ;;  %v1730_v27 = vadd.f32 %v1680_v37, %v1628_v55  ;;  %v4165_v35 = vunpack.c.l.bf16 %v4086_v32 }
  0xfe   :  { %6187 = vst [vmem:[#allocation118_spill] sm:$0xff] %v4158_v42  ;;  %v1239_v26 = vadd.f32 %v3304_v52, %v1187_v63  ;;  %v1732_v14 = vadd.f32 %v1682_v43, %v1630_v49  ;;  %v4169_v21 = vunpack.c.l.bf16 %v4094_v47  ;;  %v4171_v7 = vunpack.c.l.bf16 %v249_v36 }
  0xff   :  { %6188 = vst [vmem:[#allocation119_spill] sm:$0xff] %v4161_v59  ;;  %6189 = vst [vmem:[#allocation120_spill] sm:$0xff] %v4165_v35  ;;  %v1241_v20 = vadd.f32 %v3304_v52, %v1189_v60  ;;  %v4173_v62 = vunpack.c.l.bf16 %v250_v13  ;;  %v1832_v39 = vadd.f32 %v1782_v50, %v1730_v27  ;;  %v4176_v51 = vunpack.c.l.bf16 %v4098_v61 }
 0x100   :  { %6190 = vst [vmem:[#allocation121_spill] sm:$0xff] %v4169_v21  ;;  %6191 = vst [vmem:[#allocation122_spill] sm:$0xff] %v4171_v7  ;;  %v1289_v46 = vmax.f32 %v1239_v26, 0.0  ;;  %v1834_v58 = vadd.f32 %v1784_v33, %v1732_v14  ;;  %v4178_v38 = vunpack.c.l.bf16 %v326_v2  ;;  %v880_v32 = vmul.f32 %v3266_v34, %v4158_v42 }
 0x101   :  { %6192 = vst [vmem:[#allocation123_spill] sm:$0xff] %v4173_v62  ;;  %6193 = vst [vmem:[#allocation124_spill] sm:$0xff] %v4176_v51  ;;  %v1291_v55 = vmax.f32 %v1241_v20, 0.0  ;;  %v882_v60 = vmul.f32 %v3266_v34, %v4161_v59  ;;  %v1884_v36 = vadd.f32 %v3331_v1, %v1832_v39  ;;  %v932_v13 = vmul.f32 %v3281_v40, %v4165_v35 }
 0x102   :  { %6194 = vst [vmem:[#allocation125_spill] sm:$0xff] %v4178_v38  ;;  %v1886_v47 = vadd.f32 %v3331_v1, %v1834_v58  ;;  %v934_v33 = vmul.f32 %v3281_v40, %v4169_v21  ;;  %v1034_v2 = vmul.f32 %v3290_v44, %v4171_v7  ;;  %v1036_v37 = vmul.f32 %v3290_v44, %v4173_v62 }
 0x103   :  { %v2764_v61 = vpack.c.bf16 %v1291_v55, %v1289_v46  ;;  %v1136_v43 = vmul.f32 %v3293_v45, %v4176_v51  ;;  %v1934_v63 = vmax.f32 %v1884_v36, 0.0  ;;  %v982_v50 = vadd.f32 %v932_v13, %v880_v32  ;;  %v4208_v36 = vld [vmem:[#allocation2 + $0x88] sm:$0xff] }
 0x104   :  { %v1936_v49 = vmax.f32 %v1886_v47, 0.0  ;;  %v984_v26 = vadd.f32 %v934_v33, %v882_v60  ;;  %v1138_v27 = vmul.f32 %v3293_v45, %v4178_v38  ;;  %v1525_v14 = vmul.f32 %v3307_v53, %v4158_v42  ;;  %v4206_v60 = vld [vmem:[#allocation2 + $0x80] sm:$0xff]  ;;  %v4210_v47 = vld [vmem:[#allocation2 + $0x148] sm:$0xff] }
 0x105   :  { %2765 = vmatprep.subr.bf16.mxu1 %v2764_v61  ;;  %v1527_v20 = vmul.f32 %v3307_v53, %v4161_v59  ;;  %v1577_v46 = vmul.f32 %v3314_v56, %v4165_v35  ;;  %v1084_v58 = vadd.f32 %v1034_v2, %v982_v50  ;;  %v1579_v32 = vmul.f32 %v3314_v56, %v4169_v21  ;;  %v251_v21 = vld [vmem:[#allocation2 + $0x210] sm:$0xff] }
 0x106   :  { %v2860_v39 = vpack.c.bf16 %v1936_v49, %v1934_v63  ;;  %v1086_v55 = vadd.f32 %v1036_v37, %v984_v26  ;;  %v1679_v33 = vmul.f32 %v3317_v57, %v4171_v7  ;;  %v1681_v61 = vmul.f32 %v3317_v57, %v4173_v62  ;;  %v4218_v37 = vld [vmem:[#allocation2 + $0x150] sm:$0xff] }
 0x107   :  { %v1627_v13 = vadd.f32 %v1577_v46, %v1525_v14  ;;  %v1781_v2 = vmul.f32 %v3328_v0, %v4176_v51  ;;  %v1186_v63 = vadd.f32 %v1136_v43, %v1084_v58  ;;  %v1629_v50 = vadd.f32 %v1579_v32, %v1527_v20  ;;  %v252_v14 = vld [vmem:[#allocation2 + $0x218] sm:$0xff]  ;;  %v328_v43 = vld [vmem:[#allocation2 + $0x2e0] sm:$0xff] }
 0x108   :  { %2861 = vmatprep.subr.bf16.mxu0 %v2860_v39  ;;  %v1188_v49 = vadd.f32 %v1138_v27, %v1086_v55  ;;  %v1783_v26 = vmul.f32 %v3328_v0, %v4178_v38  ;;  %v4222_v46 = vld [vmem:[#allocation2 + $0x2d8] sm:$0xff]  ;;  %v4225_v35 = vunpack.c.h.bf16 %v4206_v60  ;;  %v4228_v62 = vunpack.c.h.bf16 %v4208_v36 }
 0x109   :  { %v1729_v7 = vadd.f32 %v1679_v33, %v1627_v13  ;;  %v4231_v51 = vunpack.c.h.bf16 %v4210_v47  ;;  %v1238_v27 = vadd.f32 %v3304_v52, %v1186_v63  ;;  %v1731_v39 = vadd.f32 %v1681_v61, %v1629_v50 }
 0x10a   :  { %6195 = vst [vmem:[#allocation126_spill] sm:$0xff] %v4225_v35  ;;  %6196 = vst [vmem:[#allocation127_spill] sm:$0xff] %v4228_v62  ;;  %v1240_v20 = vadd.f32 %v3304_v52, %v1188_v49  ;;  %v4236_v58 = vunpack.c.h.bf16 %v4218_v37  ;;  %v4238_v32 = vunpack.c.h.bf16 %v251_v21  ;;  %v4240_v13 = vunpack.c.h.bf16 %v252_v14 }
 0x10b   :  { %6197 = vst [vmem:[#allocation128_spill] sm:$0xff] %v4231_v51  ;;  %v1831_v55 = vadd.f32 %v1781_v2, %v1729_v7  ;;  %v4243_v33 = vunpack.c.h.bf16 %v4222_v46  ;;  %v1288_v38 = vmax.f32 %v1238_v27, 0.0  ;;  %v1833_v42 = vadd.f32 %v1783_v26, %v1731_v39 }
 0x10c   :  { %6198 = vst [vmem:[#allocation129_spill] sm:$0xff] %v4236_v58  ;;  %6199 = vst [vmem:[#allocation130_spill] sm:$0xff] %v4238_v32  ;;  %v1290_v59 = vmax.f32 %v1240_v20, 0.0  ;;  %v4245_v48 = vunpack.c.h.bf16 %v328_v43  ;;  %v885_v61 = vmul.f32 %v3266_v34, %v4225_v35  ;;  %v887_v7 = vmul.f32 %v3266_v34, %v4228_v62 }
 0x10d   :  { %6200 = vst [vmem:[#allocation131_spill] sm:$0xff] %v4240_v13  ;;  %6201 = vst [vmem:[#allocation132_spill] sm:$0xff] %v4243_v33  ;;  %v1883_v63 = vadd.f32 %v3331_v1, %v1831_v55  ;;  %v937_v2 = vmul.f32 %v3281_v40, %v4231_v51  ;;  %v1885_v50 = vadd.f32 %v3331_v1, %v1833_v42 }
 0x10e   :  { %6202 = vst [vmem:[#allocation133_spill] sm:$0xff] %v4245_v48  ;;  %v2766_v49 = vpack.c.bf16 %v1290_v59, %v1288_v38  ;;  %v939_v27 = vmul.f32 %v3281_v40, %v4236_v58  ;;  %v1039_v26 = vmul.f32 %v3290_v44, %v4238_v32  ;;  %v1041_v55 = vmul.f32 %v3290_v44, %v4240_v13 }
 0x10f   :  { %v1933_v20 = vmax.f32 %v1883_v63, 0.0  ;;  %v987_v39 = vadd.f32 %v937_v2, %v885_v61  ;;  %v1141_v54 = vmul.f32 %v3293_v45, %v4243_v33  ;;  %v1935_v8 = vmax.f32 %v1885_v50, 0.0 }
 0x110   :  { %2767 = vmatpush1.bf16.msra.mxu1 %v2766_v49  ;;  %v989_v41 = vadd.f32 %v939_v27, %v887_v7  ;;  %v1143_v42 = vmul.f32 %v3293_v45, %v4245_v48  ;;  %v1530_v59 = vmul.f32 %v3307_v53, %v4225_v35  ;;  %v1532_v63 = vmul.f32 %v3307_v53, %v4228_v62 }
 0x111   :  { %v1089_v38 = vadd.f32 %v1039_v26, %v987_v39  ;;  %v1582_v61 = vmul.f32 %v3314_v56, %v4231_v51  ;;  %v1584_v2 = vmul.f32 %v3314_v56, %v4236_v58  ;;  %v2862_v5 = vpack.c.bf16 %v1935_v8, %v1933_v20 }
 0x112   :  { %v1091_v49 = vadd.f32 %v1041_v55, %v989_v41  ;;  %v1684_v7 = vmul.f32 %v3317_v57, %v4238_v32  ;;  %v1686_v50 = vmul.f32 %v3317_v57, %v4240_v13  ;;  %v1786_v39 = vmul.f32 %v3328_v0, %v4243_v33 }
 0x113   :  { %v1191_v27 = vadd.f32 %v1141_v54, %v1089_v38  ;;  %v1632_v35 = vadd.f32 %v1582_v61, %v1530_v59  ;;  %v1634_v26 = vadd.f32 %v1584_v2, %v1532_v63  ;;  %2863 = vmatpush1.bf16.msra.mxu0 %v2862_v5  ;;  %v1788_v51 = vmul.f32 %v3328_v0, %v4245_v48 }
 0x114   :  { %v1193_v62 = vadd.f32 %v1143_v42, %v1091_v49  ;;  %v4282_v8 = vunpack.c.l.bf16 %v4206_v60  ;;  %v4285_v41 = vunpack.c.l.bf16 %v4208_v36  ;;  %v4289_v59 = vunpack.c.l.bf16 %v4210_v47 }
 0x115   :  { %v1243_v20 = vadd.f32 %v3304_v52, %v1191_v27  ;;  %v1734_v55 = vadd.f32 %v1684_v7, %v1632_v35  ;;  %v1736_v54 = vadd.f32 %v1686_v50, %v1634_v26  ;;  %v4293_v5 = vunpack.c.l.bf16 %v4218_v37 }
 0x116   :  { %6203 = vst [vmem:[#allocation134_spill] sm:$0xff] %v4282_v8  ;;  %6204 = vst [vmem:[#allocation135_spill] sm:$0xff] %v4285_v41  ;;  %v1245_v38 = vadd.f32 %v3304_v52, %v1193_v62  ;;  %v4295_v42 = vunpack.c.l.bf16 %v251_v21  ;;  %v4297_v63 = vunpack.c.l.bf16 %v252_v14  ;;  %v4300_v2 = vunpack.c.l.bf16 %v4222_v46 }
 0x117   :  { %6205 = vst [vmem:[#allocation136_spill] sm:$0xff] %v4289_v59  ;;  %6206 = vst [vmem:[#allocation137_spill] sm:$0xff] %v4293_v5  ;;  %v1293_v60 = vmax.f32 %v1243_v20, 0.0  ;;  %v1836_v61 = vadd.f32 %v1786_v39, %v1734_v55  ;;  %v1838_v36 = vadd.f32 %v1788_v51, %v1736_v54  ;;  %v4302_v49 = vunpack.c.l.bf16 %v328_v43 }
 0x118   :  { %6207 = vst [vmem:[#allocation138_spill] sm:$0xff] %v4295_v42  ;;  %6208 = vst [vmem:[#allocation139_spill] sm:$0xff] %v4297_v63  ;;  %v1295_v35 = vmax.f32 %v1245_v38, 0.0  ;;  %v884_v47 = vmul.f32 %v3266_v34, %v4282_v8  ;;  %v886_v62 = vmul.f32 %v3266_v34, %v4285_v41  ;;  %v936_v14 = vmul.f32 %v3281_v40, %v4289_v59 }
 0x119   :  { %6209 = vst [vmem:[#allocation140_spill] sm:$0xff] %v4300_v2  ;;  %6210 = vst [vmem:[#allocation141_spill] sm:$0xff] %v4302_v49  ;;  %v1888_v21 = vadd.f32 %v3331_v1, %v1836_v61  ;;  %v1890_v37 = vadd.f32 %v3331_v1, %v1838_v36  ;;  %v938_v51 = vmul.f32 %v3281_v40, %v4293_v5 }
 0x11a   :  { %v2768_v46 = vpack.c.bf16 %v1295_v35, %v1293_v60  ;;  %v1038_v43 = vmul.f32 %v3290_v44, %v4295_v42  ;;  %v1040_v7 = vmul.f32 %v3290_v44, %v4297_v63  ;;  %v1140_v50 = vmul.f32 %v3293_v45, %v4300_v2 }
 0x11b   :  { %v1938_v27 = vmax.f32 %v1888_v21, 0.0  ;;  %v1940_v26 = vmax.f32 %v1890_v37, 0.0  ;;  %v986_v39 = vadd.f32 %v936_v14, %v884_v47  ;;  %v988_v20 = vadd.f32 %v938_v51, %v886_v62  ;;  %v4330_v62 = vld [vmem:[#allocation2 + $0x90] sm:$0xff]  ;;  %v4332_v21 = vld [vmem:[#allocation2 + $0x98] sm:$0xff] }
 0x11c   :  { %2769 = vmatprep.subr.bf16.mxu1 %v2768_v46  ;;  %v1142_v55 = vmul.f32 %v3293_v45, %v4302_v49  ;;  %v1529_v54 = vmul.f32 %v3307_v53, %v4282_v8  ;;  %v1531_v38 = vmul.f32 %v3307_v53, %v4285_v41  ;;  %v1581_v60 = vmul.f32 %v3314_v56, %v4289_v59  ;;  %v4334_v37 = vld [vmem:[#allocation2 + $0x158] sm:$0xff] }
 0x11d   :  { %v2864_v61 = vpack.c.bf16 %v1940_v26, %v1938_v27  ;;  %v1088_v36 = vadd.f32 %v1038_v43, %v986_v39  ;;  %v1090_v35 = vadd.f32 %v1040_v7, %v988_v20  ;;  %v1583_v47 = vmul.f32 %v3314_v56, %v4293_v5  ;;  %v4342_v7 = vld [vmem:[#allocation2 + $0x160] sm:$0xff] }
 0x11e   :  { %v1631_v14 = vadd.f32 %v1581_v60, %v1529_v54  ;;  %v1683_v51 = vmul.f32 %v3317_v57, %v4295_v42  ;;  %v1685_v46 = vmul.f32 %v3317_v57, %v4297_v63  ;;  %v1785_v43 = vmul.f32 %v3328_v0, %v4300_v2  ;;  %v253_v5 = vld [vmem:[#allocation2 + $0x220] sm:$0xff]  ;;  %v254_v54 = vld [vmem:[#allocation2 + $0x228] sm:$0xff] }
 0x11f   :  { %2865 = vmatprep.subr.bf16.mxu0 %v2864_v61  ;;  %v1190_v27 = vadd.f32 %v1140_v50, %v1088_v36  ;;  %v1192_v26 = vadd.f32 %v1142_v55, %v1090_v35  ;;  %v1633_v39 = vadd.f32 %v1583_v47, %v1531_v38  ;;  %v1787_v20 = vmul.f32 %v3328_v0, %v4302_v49  ;;  %v4346_v60 = vld [vmem:[#allocation2 + $0x2e8] sm:$0xff]  ;;  %v330_v50 = vld [vmem:[#allocation2 + $0x2f0] sm:$0xff] }
 0x120   :  { %v1733_v42 = vadd.f32 %v1683_v51, %v1631_v14  ;;  %v4349_v59 = vunpack.c.h.bf16 %v4330_v62  ;;  %v4352_v63 = vunpack.c.h.bf16 %v4332_v21  ;;  %v4355_v2 = vunpack.c.h.bf16 %v4334_v37 }
 0x121   :  { %v1242_v55 = vadd.f32 %v3304_v52, %v1190_v27  ;;  %v1244_v38 = vadd.f32 %v3304_v52, %v1192_v26  ;;  %v1735_v61 = vadd.f32 %v1685_v46, %v1633_v39  ;;  %v4360_v36 = vunpack.c.h.bf16 %v4342_v7 }
 0x122   :  { %6211 = vst [vmem:[#allocation142_spill] sm:$0xff] %v4349_v59  ;;  %6212 = vst [vmem:[#allocation143_spill] sm:$0xff] %v4352_v63  ;;  %v1835_v35 = vadd.f32 %v1785_v43, %v1733_v42  ;;  %v4362_v47 = vunpack.c.h.bf16 %v253_v5  ;;  %v4364_v14 = vunpack.c.h.bf16 %v254_v54  ;;  %v4367_v51 = vunpack.c.h.bf16 %v4346_v60 }
 0x123   :  { %6213 = vst [vmem:[#allocation144_spill] sm:$0xff] %v4355_v2  ;;  %6214 = vst [vmem:[#allocation145_spill] sm:$0xff] %v4360_v36  ;;  %v1292_v49 = vmax.f32 %v1242_v55, 0.0  ;;  %v1294_v41 = vmax.f32 %v1244_v38, 0.0  ;;  %v1837_v8 = vadd.f32 %v1787_v20, %v1735_v61  ;;  %v4369_v48 = vunpack.c.h.bf16 %v330_v50 }
 0x124   :  { %6215 = vst [vmem:[#allocation146_spill] sm:$0xff] %v4362_v47  ;;  %6216 = vst [vmem:[#allocation147_spill] sm:$0xff] %v4364_v14  ;;  %v1887_v27 = vadd.f32 %v3331_v1, %v1835_v35  ;;  %v889_v46 = vmul.f32 %v3266_v34, %v4349_v59  ;;  %v891_v42 = vmul.f32 %v3266_v34, %v4352_v63 }
 0x125   :  { %6217 = vst [vmem:[#allocation148_spill] sm:$0xff] %v4367_v51  ;;  %6218 = vst [vmem:[#allocation149_spill] sm:$0xff] %v4369_v48  ;;  %v941_v43 = vmul.f32 %v3281_v40, %v4355_v2  ;;  %v2770_v26 = vpack.c.bf16 %v1294_v41, %v1292_v49  ;;  %v1889_v39 = vadd.f32 %v3331_v1, %v1837_v8 }
 0x126   :  { %v943_v55 = vmul.f32 %v3281_v40, %v4360_v36  ;;  %v1043_v20 = vmul.f32 %v3290_v44, %v4362_v47  ;;  %v1937_v38 = vmax.f32 %v1887_v27, 0.0  ;;  %v1045_v35 = vmul.f32 %v3290_v44, %v4364_v14 }
 0x127   :  { %v991_v61 = vadd.f32 %v941_v43, %v889_v46  ;;  %v1145_v33 = vmul.f32 %v3293_v45, %v4367_v51  ;;  %2771 = vmatpush1.bf16.msra.mxu1 %v2770_v26  ;;  %v1939_v13 = vmax.f32 %v1889_v39, 0.0  ;;  %v1147_v8 = vmul.f32 %v3293_v45, %v4369_v48 }
 0x128   :  { %v993_v32 = vadd.f32 %v943_v55, %v891_v42  ;;  %v1534_v41 = vmul.f32 %v3307_v53, %v4349_v59  ;;  %v1536_v27 = vmul.f32 %v3307_v53, %v4352_v63  ;;  %v1586_v46 = vmul.f32 %v3314_v56, %v4355_v2 }
 0x129   :  { %v1093_v49 = vadd.f32 %v1043_v20, %v991_v61  ;;  %v1588_v43 = vmul.f32 %v3314_v56, %v4360_v36  ;;  %v2866_v58 = vpack.c.bf16 %v1939_v13, %v1937_v38  ;;  %v1688_v42 = vmul.f32 %v3317_v57, %v4362_v47 }
 0x12a   :  { %v1095_v26 = vadd.f32 %v1045_v35, %v993_v32  ;;  %v1690_v39 = vmul.f32 %v3317_v57, %v4364_v14  ;;  %v1636_v59 = vadd.f32 %v1586_v46, %v1534_v41  ;;  %v1790_v61 = vmul.f32 %v3328_v0, %v4367_v51 }
 0x12b   :  { %v1195_v55 = vadd.f32 %v1145_v33, %v1093_v49  ;;  %v1638_v20 = vadd.f32 %v1588_v43, %v1536_v27  ;;  %2867 = vmatpush1.bf16.msra.mxu0 %v2866_v58  ;;  %v1792_v2 = vmul.f32 %v3328_v0, %v4369_v48  ;;  %v4406_v13 = vunpack.c.l.bf16 %v4330_v62 }
 0x12c   :  { %v1197_v63 = vadd.f32 %v1147_v8, %v1095_v26  ;;  %v4409_v32 = vunpack.c.l.bf16 %v4332_v21  ;;  %v1738_v35 = vadd.f32 %v1688_v42, %v1636_v59  ;;  %v4413_v41 = vunpack.c.l.bf16 %v4334_v37 }
 0x12d   :  { %6219 = vst [vmem:[#allocation150_spill] sm:$0xff] %v4406_v13  ;;  %v1247_v38 = vadd.f32 %v3304_v52, %v1195_v55  ;;  %v1740_v33 = vadd.f32 %v1690_v39, %v1638_v20  ;;  %v4417_v58 = vunpack.c.l.bf16 %v4342_v7  ;;  %v4419_v8 = vunpack.c.l.bf16 %v253_v5 }
 0x12e   :  { %6220 = vst [vmem:[#allocation151_spill] sm:$0xff] %v4409_v32  ;;  %6221 = vst [vmem:[#allocation152_spill] sm:$0xff] %v4413_v41  ;;  %v1249_v49 = vadd.f32 %v3304_v52, %v1197_v63  ;;  %v4421_v27 = vunpack.c.l.bf16 %v254_v54  ;;  %v1840_v46 = vadd.f32 %v1790_v61, %v1738_v35  ;;  %v4424_v43 = vunpack.c.l.bf16 %v4346_v60 }
 0x12f   :  { %6222 = vst [vmem:[#allocation153_spill] sm:$0xff] %v4417_v58  ;;  %6223 = vst [vmem:[#allocation154_spill] sm:$0xff] %v4419_v8  ;;  %v1297_v62 = vmax.f32 %v1247_v38, 0.0  ;;  %v1842_v21 = vadd.f32 %v1792_v2, %v1740_v33  ;;  %v4426_v26 = vunpack.c.l.bf16 %v330_v50  ;;  %v888_v37 = vmul.f32 %v3266_v34, %v4406_v13 }
 0x130   :  { %6224 = vst [vmem:[#allocation155_spill] sm:$0xff] %v4421_v27  ;;  %6225 = vst [vmem:[#allocation156_spill] sm:$0xff] %v4424_v43  ;;  %v1299_v59 = vmax.f32 %v1249_v49, 0.0  ;;  %v890_v63 = vmul.f32 %v3266_v34, %v4409_v32  ;;  %v1892_v5 = vadd.f32 %v3331_v1, %v1840_v46  ;;  %v940_v54 = vmul.f32 %v3281_v40, %v4413_v41 }
 0x131   :  { %6226 = vst [vmem:[#allocation157_spill] sm:$0xff] %v4426_v26  ;;  %v1894_v7 = vadd.f32 %v3331_v1, %v1842_v21  ;;  %v942_v2 = vmul.f32 %v3281_v40, %v4417_v58  ;;  %v1042_v50 = vmul.f32 %v3290_v44, %v4419_v8  ;;  %v1044_v42 = vmul.f32 %v3290_v44, %v4421_v27 }
 0x132   :  { %v2772_v60 = vpack.c.bf16 %v1299_v59, %v1297_v62  ;;  %v1144_v39 = vmul.f32 %v3293_v45, %v4424_v43  ;;  %v1942_v55 = vmax.f32 %v1892_v5, 0.0  ;;  %v990_v61 = vadd.f32 %v940_v54, %v888_v37  ;;  %v4456_v5 = vld [vmem:[#allocation2 + $0xa8] sm:$0xff] }
 0x133   :  { %v1944_v20 = vmax.f32 %v1894_v7, 0.0  ;;  %v992_v38 = vadd.f32 %v942_v2, %v890_v63  ;;  %v1146_v35 = vmul.f32 %v3293_v45, %v4426_v26  ;;  %v1533_v33 = vmul.f32 %v3307_v53, %v4406_v13  ;;  %v4454_v63 = vld [vmem:[#allocation2 + $0xa0] sm:$0xff]  ;;  %v4458_v7 = vld [vmem:[#allocation2 + $0x168] sm:$0xff] }
 0x134   :  { %2773 = vmatprep.subr.bf16.mxu1 %v2772_v60  ;;  %v1535_v49 = vmul.f32 %v3307_v53, %v4409_v32  ;;  %v1585_v62 = vmul.f32 %v3314_v56, %v4413_v41  ;;  %v1092_v21 = vadd.f32 %v1042_v50, %v990_v61  ;;  %v1587_v37 = vmul.f32 %v3314_v56, %v4417_v58  ;;  %v255_v58 = vld [vmem:[#allocation2 + $0x230] sm:$0xff] }
 0x135   :  { %v2868_v46 = vpack.c.bf16 %v1944_v20, %v1942_v55  ;;  %v1094_v59 = vadd.f32 %v1044_v42, %v992_v38  ;;  %v1687_v2 = vmul.f32 %v3317_v57, %v4419_v8  ;;  %v1689_v60 = vmul.f32 %v3317_v57, %v4421_v27  ;;  %v4466_v42 = vld [vmem:[#allocation2 + $0x170] sm:$0xff] }
 0x136   :  { %v1635_v54 = vadd.f32 %v1585_v62, %v1533_v33  ;;  %v1789_v50 = vmul.f32 %v3328_v0, %v4424_v43  ;;  %v1194_v55 = vadd.f32 %v1144_v39, %v1092_v21  ;;  %v1637_v61 = vadd.f32 %v1587_v37, %v1535_v49  ;;  %v256_v33 = vld [vmem:[#allocation2 + $0x238] sm:$0xff]  ;;  %v332_v39 = vld [vmem:[#allocation2 + $0x300] sm:$0xff] }
 0x137   :  { %2869 = vmatprep.subr.bf16.mxu0 %v2868_v46  ;;  %v1196_v20 = vadd.f32 %v1146_v35, %v1094_v59  ;;  %v1791_v38 = vmul.f32 %v3328_v0, %v4426_v26  ;;  %v4470_v62 = vld [vmem:[#allocation2 + $0x2f8] sm:$0xff]  ;;  %v4473_v41 = vunpack.c.h.bf16 %v4454_v63  ;;  %v4476_v27 = vunpack.c.h.bf16 %v4456_v5 }
 0x138   :  { %v1737_v8 = vadd.f32 %v1687_v2, %v1635_v54  ;;  %v4479_v43 = vunpack.c.h.bf16 %v4458_v7  ;;  %v1246_v35 = vadd.f32 %v3304_v52, %v1194_v55  ;;  %v1739_v46 = vadd.f32 %v1689_v60, %v1637_v61 }
 0x139   :  { %6227 = vst [vmem:[#allocation158_spill] sm:$0xff] %v4473_v41  ;;  %6228 = vst [vmem:[#allocation159_spill] sm:$0xff] %v4476_v27  ;;  %v1248_v49 = vadd.f32 %v3304_v52, %v1196_v20  ;;  %v4484_v21 = vunpack.c.h.bf16 %v4466_v42  ;;  %v4486_v37 = vunpack.c.h.bf16 %v255_v58  ;;  %v4488_v54 = vunpack.c.h.bf16 %v256_v33 }
 0x13a   :  { %6229 = vst [vmem:[#allocation160_spill] sm:$0xff] %v4479_v43  ;;  %v1839_v59 = vadd.f32 %v1789_v50, %v1737_v8  ;;  %v4491_v2 = vunpack.c.h.bf16 %v4470_v62  ;;  %v1296_v26 = vmax.f32 %v1246_v35, 0.0  ;;  %v1841_v13 = vadd.f32 %v1791_v38, %v1739_v46 }
 0x13b   :  { %6230 = vst [vmem:[#allocation161_spill] sm:$0xff] %v4484_v21  ;;  %6231 = vst [vmem:[#allocation162_spill] sm:$0xff] %v4486_v37  ;;  %v1298_v32 = vmax.f32 %v1248_v49, 0.0  ;;  %v4493_v48 = vunpack.c.h.bf16 %v332_v39  ;;  %v893_v60 = vmul.f32 %v3266_v34, %v4473_v41  ;;  %v895_v8 = vmul.f32 %v3266_v34, %v4476_v27 }
 0x13c   :  { %6232 = vst [vmem:[#allocation163_spill] sm:$0xff] %v4488_v54  ;;  %6233 = vst [vmem:[#allocation164_spill] sm:$0xff] %v4491_v2  ;;  %v1891_v55 = vadd.f32 %v3331_v1, %v1839_v59  ;;  %v945_v50 = vmul.f32 %v3281_v40, %v4479_v43  ;;  %v1893_v61 = vadd.f32 %v3331_v1, %v1841_v13 }
 0x13d   :  { %6234 = vst [vmem:[#allocation165_spill] sm:$0xff] %v4493_v48  ;;  %v2774_v20 = vpack.c.bf16 %v1298_v32, %v1296_v26  ;;  %v947_v35 = vmul.f32 %v3281_v40, %v4484_v21  ;;  %v1047_v38 = vmul.f32 %v3290_v44, %v4486_v37  ;;  %v1049_v59 = vmul.f32 %v3290_v44, %v4488_v54 }
 0x13e   :  { %v1941_v49 = vmax.f32 %v1891_v55, 0.0  ;;  %v995_v46 = vadd.f32 %v945_v50, %v893_v60  ;;  %v1149_v51 = vmul.f32 %v3293_v45, %v4491_v2  ;;  %v1943_v14 = vmax.f32 %v1893_v61, 0.0 }
 0x13f   :  { %2775 = vmatpush1.bf16.msra.mxu1 %v2774_v20  ;;  %v997_v47 = vadd.f32 %v947_v35, %v895_v8  ;;  %v1151_v13 = vmul.f32 %v3293_v45, %v4493_v48  ;;  %v1538_v32 = vmul.f32 %v3307_v53, %v4473_v41  ;;  %v1540_v55 = vmul.f32 %v3307_v53, %v4476_v27 }
 0x140   :  { %v1097_v26 = vadd.f32 %v1047_v38, %v995_v46  ;;  %v1590_v60 = vmul.f32 %v3314_v56, %v4479_v43  ;;  %v1592_v50 = vmul.f32 %v3314_v56, %v4484_v21  ;;  %v2870_v36 = vpack.c.bf16 %v1943_v14, %v1941_v49 }
 0x141   :  { %v1099_v20 = vadd.f32 %v1049_v59, %v997_v47  ;;  %v1692_v8 = vmul.f32 %v3317_v57, %v4486_v37  ;;  %v1694_v61 = vmul.f32 %v3317_v57, %v4488_v54  ;;  %v1794_v46 = vmul.f32 %v3328_v0, %v4491_v2 }
 0x142   :  { %v1199_v35 = vadd.f32 %v1149_v51, %v1097_v26  ;;  %v1640_v41 = vadd.f32 %v1590_v60, %v1538_v32  ;;  %v1642_v38 = vadd.f32 %v1592_v50, %v1540_v55  ;;  %2871 = vmatpush1.bf16.msra.mxu0 %v2870_v36  ;;  %v1796_v43 = vmul.f32 %v3328_v0, %v4493_v48 }
 0x143   :  { %v1201_v27 = vadd.f32 %v1151_v13, %v1099_v20  ;;  %v4530_v14 = vunpack.c.l.bf16 %v4454_v63  ;;  %v4533_v47 = vunpack.c.l.bf16 %v4456_v5  ;;  %v4537_v32 = vunpack.c.l.bf16 %v4458_v7 }
 0x144   :  { %v1251_v49 = vadd.f32 %v3304_v52, %v1199_v35  ;;  %v1742_v59 = vadd.f32 %v1692_v8, %v1640_v41  ;;  %v1744_v51 = vadd.f32 %v1694_v61, %v1642_v38  ;;  %v4541_v36 = vunpack.c.l.bf16 %v4466_v42 }
 0x145   :  { %6235 = vst [vmem:[#allocation166_spill] sm:$0xff] %v4530_v14  ;;  %6236 = vst [vmem:[#allocation167_spill] sm:$0xff] %v4533_v47  ;;  %v1253_v26 = vadd.f32 %v3304_v52, %v1201_v27  ;;  %v4543_v13 = vunpack.c.l.bf16 %v255_v58  ;;  %v4545_v55 = vunpack.c.l.bf16 %v256_v33  ;;  %v4548_v50 = vunpack.c.l.bf16 %v4470_v62 }
 0x146   :  { %6237 = vst [vmem:[#allocation168_spill] sm:$0xff] %v4537_v32  ;;  %6238 = vst [vmem:[#allocation169_spill] sm:$0xff] %v4541_v36  ;;  %v1301_v63 = vmax.f32 %v1251_v49, 0.0  ;;  %v1844_v60 = vadd.f32 %v1794_v46, %v1742_v59  ;;  %v1846_v5 = vadd.f32 %v1796_v43, %v1744_v51  ;;  %v4550_v20 = vunpack.c.l.bf16 %v332_v39 }
 0x147   :  { %6239 = vst [vmem:[#allocation170_spill] sm:$0xff] %v4543_v13  ;;  %6240 = vst [vmem:[#allocation171_spill] sm:$0xff] %v4545_v55  ;;  %v1303_v41 = vmax.f32 %v1253_v26, 0.0  ;;  %v892_v7 = vmul.f32 %v3266_v34, %v4530_v14  ;;  %v894_v27 = vmul.f32 %v3266_v34, %v4533_v47  ;;  %v944_v33 = vmul.f32 %v3281_v40, %v4537_v32 }
 0x148   :  { %6241 = vst [vmem:[#allocation172_spill] sm:$0xff] %v4548_v50  ;;  %6242 = vst [vmem:[#allocation173_spill] sm:$0xff] %v4550_v20  ;;  %v1896_v58 = vadd.f32 %v3331_v1, %v1844_v60  ;;  %v1898_v42 = vadd.f32 %v3331_v1, %v1846_v5  ;;  %v946_v43 = vmul.f32 %v3281_v40, %v4541_v36 }
 0x149   :  { %v2776_v62 = vpack.c.bf16 %v1303_v41, %v1301_v63  ;;  %v1046_v39 = vmul.f32 %v3290_v44, %v4543_v13  ;;  %v1048_v8 = vmul.f32 %v3290_v44, %v4545_v55  ;;  %v1148_v61 = vmul.f32 %v3293_v45, %v4548_v50 }
 0x14a   :  { %v1946_v35 = vmax.f32 %v1896_v58, 0.0  ;;  %v1948_v38 = vmax.f32 %v1898_v42, 0.0  ;;  %v994_v46 = vadd.f32 %v944_v33, %v892_v7  ;;  %v996_v49 = vadd.f32 %v946_v43, %v894_v27  ;;  %v4578_v27 = vld [vmem:[#allocation2 + $0xb0] sm:$0xff]  ;;  %v4580_v58 = vld [vmem:[#allocation2 + $0xb8] sm:$0xff] }
 0x14b   :  { %2777 = vmatprep.subr.bf16.mxu1 %v2776_v62  ;;  %v1150_v59 = vmul.f32 %v3293_v45, %v4550_v20  ;;  %v1537_v51 = vmul.f32 %v3307_v53, %v4530_v14  ;;  %v1539_v26 = vmul.f32 %v3307_v53, %v4533_v47  ;;  %v1589_v63 = vmul.f32 %v3314_v56, %v4537_v32  ;;  %v4582_v42 = vld [vmem:[#allocation2 + $0x178] sm:$0xff] }
 0x14c   :  { %v2872_v60 = vpack.c.bf16 %v1948_v38, %v1946_v35  ;;  %v1096_v5 = vadd.f32 %v1046_v39, %v994_v46  ;;  %v1098_v41 = vadd.f32 %v1048_v8, %v996_v49  ;;  %v1591_v7 = vmul.f32 %v3314_v56, %v4541_v36  ;;  %v4590_v8 = vld [vmem:[#allocation2 + $0x180] sm:$0xff] }
 0x14d   :  { %v1639_v33 = vadd.f32 %v1589_v63, %v1537_v51  ;;  %v1691_v43 = vmul.f32 %v3317_v57, %v4543_v13  ;;  %v1693_v62 = vmul.f32 %v3317_v57, %v4545_v55  ;;  %v1793_v39 = vmul.f32 %v3328_v0, %v4548_v50  ;;  %v257_v36 = vld [vmem:[#allocation2 + $0x240] sm:$0xff]  ;;  %v258_v51 = vld [vmem:[#allocation2 + $0x248] sm:$0xff] }
 0x14e   :  { %2873 = vmatprep.subr.bf16.mxu0 %v2872_v60  ;;  %v1198_v35 = vadd.f32 %v1148_v61, %v1096_v5  ;;  %v1200_v38 = vadd.f32 %v1150_v59, %v1098_v41  ;;  %v1641_v46 = vadd.f32 %v1591_v7, %v1539_v26  ;;  %v1795_v49 = vmul.f32 %v3328_v0, %v4550_v20  ;;  %v4594_v63 = vld [vmem:[#allocation2 + $0x308] sm:$0xff]  ;;  %v334_v61 = vld [vmem:[#allocation2 + $0x310] sm:$0xff] }
 0x14f   :  { %v1741_v13 = vadd.f32 %v1691_v43, %v1639_v33  ;;  %v4597_v32 = vunpack.c.h.bf16 %v4578_v27  ;;  %v4600_v55 = vunpack.c.h.bf16 %v4580_v58  ;;  %v4603_v50 = vunpack.c.h.bf16 %v4582_v42 }
 0x150   :  { %v1250_v59 = vadd.f32 %v3304_v52, %v1198_v35  ;;  %v1252_v26 = vadd.f32 %v3304_v52, %v1200_v38  ;;  %v1743_v60 = vadd.f32 %v1693_v62, %v1641_v46  ;;  %v4608_v5 = vunpack.c.h.bf16 %v4590_v8 }
 0x151   :  { %6243 = vst [vmem:[#allocation174_spill] sm:$0xff] %v4597_v32  ;;  %6244 = vst [vmem:[#allocation175_spill] sm:$0xff] %v4600_v55  ;;  %v1843_v41 = vadd.f32 %v1793_v39, %v1741_v13  ;;  %v4610_v7 = vunpack.c.h.bf16 %v257_v36  ;;  %v4612_v33 = vunpack.c.h.bf16 %v258_v51  ;;  %v4615_v43 = vunpack.c.h.bf16 %v4594_v63 }
 0x152   :  { %6245 = vst [vmem:[#allocation176_spill] sm:$0xff] %v4603_v50  ;;  %v1300_v20 = vmax.f32 %v1250_v59, 0.0  ;;  %v1302_v47 = vmax.f32 %v1252_v26, 0.0  ;;  %v1845_v14 = vadd.f32 %v1795_v49, %v1743_v60  ;;  %v4617_v48 = vunpack.c.h.bf16 %v334_v61 }
 0x153   :  { %v1895_v35 = vadd.f32 %v3331_v1, %v1843_v41  ;;  %v897_v62 = vmul.f32 %v3266_v34, %v4597_v32  ;;  %v899_v13 = vmul.f32 %v3266_v34, %v4600_v55  ;;  %v949_v39 = vmul.f32 %v3281_v40, %v4603_v50 }
 0x154   :  { %v2778_v38 = vpack.c.bf16 %v1302_v47, %v1300_v20  ;;  %v1897_v46 = vadd.f32 %v3331_v1, %v1845_v14  ;;  %v951_v59 = vmul.f32 %v3281_v40, %v4608_v5  ;;  %v1051_v49 = vmul.f32 %v3290_v44, %v4610_v7 }
 0x155   :  { %v1945_v26 = vmax.f32 %v1895_v35, 0.0  ;;  %v999_v60 = vadd.f32 %v949_v39, %v897_v62  ;;  %v1053_v41 = vmul.f32 %v3290_v44, %v4612_v33  ;;  %v1153_v2 = vmul.f32 %v3293_v45, %v4615_v43 }
 0x156   :  { %2779 = vmatpush1.bf16.msra.mxu1 %v2778_v38  ;;  %v1947_v54 = vmax.f32 %v1897_v46, 0.0  ;;  %v1001_v37 = vadd.f32 %v951_v59, %v899_v13  ;;  %v1155_v14 = vmul.f32 %v3293_v45, %v4617_v48  ;;  %v1542_v47 = vmul.f32 %v3307_v53, %v4597_v32 }
 0x157   :  { %v1101_v20 = vadd.f32 %v1051_v49, %v999_v60  ;;  %v1544_v35 = vmul.f32 %v3307_v53, %v4600_v55  ;;  %v1594_v62 = vmul.f32 %v3314_v56, %v4603_v50  ;;  %v1596_v39 = vmul.f32 %v3314_v56, %v4608_v5 }
 0x158   :  { %v2874_v21 = vpack.c.bf16 %v1947_v54, %v1945_v26  ;;  %v1103_v38 = vadd.f32 %v1053_v41, %v1001_v37  ;;  %v1696_v13 = vmul.f32 %v3317_v57, %v4610_v7  ;;  %v1698_v46 = vmul.f32 %v3317_v57, %v4612_v33 }
 0x159   :  { %v1203_v59 = vadd.f32 %v1153_v2, %v1101_v20  ;;  %v1644_v32 = vadd.f32 %v1594_v62, %v1542_v47  ;;  %v1646_v49 = vadd.f32 %v1596_v39, %v1544_v35  ;;  %v1798_v60 = vmul.f32 %v3328_v0, %v4615_v43 }
 0x15a   :  { %2875 = vmatpush1.bf16.msra.mxu0 %v2874_v21  ;;  %v1205_v55 = vadd.f32 %v1155_v14, %v1103_v38  ;;  %v1800_v50 = vmul.f32 %v3328_v0, %v4617_v48  ;;  %v4654_v54 = vunpack.c.l.bf16 %v4578_v27  ;;  %v4657_v37 = vunpack.c.l.bf16 %v4580_v58 }
 0x15b   :  { %v1255_v26 = vadd.f32 %v3304_v52, %v1203_v59  ;;  %v1746_v41 = vadd.f32 %v1696_v13, %v1644_v32  ;;  %v1748_v2 = vadd.f32 %v1698_v46, %v1646_v49  ;;  %v4661_v47 = vunpack.c.l.bf16 %v4582_v42 }
 0x15c   :  { %6246 = vst [vmem:[#allocation177_spill] sm:$0xff] %v4657_v37  ;;  %v1257_v20 = vadd.f32 %v3304_v52, %v1205_v55  ;;  %v4665_v21 = vunpack.c.l.bf16 %v4590_v8  ;;  %v4667_v14 = vunpack.c.l.bf16 %v257_v36  ;;  %v4669_v35 = vunpack.c.l.bf16 %v258_v51 }
 0x15d   :  { %6247 = vst [vmem:[#allocation178_spill] sm:$0xff] %v4661_v47  ;;  %v1305_v27 = vmax.f32 %v1255_v26, 0.0  ;;  %v1848_v62 = vadd.f32 %v1798_v60, %v1746_v41  ;;  %v1850_v58 = vadd.f32 %v1800_v50, %v1748_v2  ;;  %v4672_v39 = vunpack.c.l.bf16 %v4594_v63 }
 0x15e   :  { %6248 = vst [vmem:[#allocation179_spill] sm:$0xff] %v4665_v21  ;;  %6249 = vst [vmem:[#allocation180_spill] sm:$0xff] %v4667_v14  ;;  %v1307_v32 = vmax.f32 %v1257_v20, 0.0  ;;  %v4674_v38 = vunpack.c.l.bf16 %v334_v61  ;;  %v896_v42 = vmul.f32 %v3266_v34, %v4654_v54  ;;  %v898_v55 = vmul.f32 %v3266_v34, %v4657_v37 }
 0x15f   :  { %6250 = vst [vmem:[#allocation181_spill] sm:$0xff] %v4669_v35  ;;  %6251 = vst [vmem:[#allocation182_spill] sm:$0xff] %v4672_v39  ;;  %v1900_v36 = vadd.f32 %v3331_v1, %v1848_v62  ;;  %v1902_v8 = vadd.f32 %v3331_v1, %v1850_v58  ;;  %v948_v51 = vmul.f32 %v3281_v40, %v4661_v47 }
 0x160   :  { %v950_v50 = vmul.f32 %v3281_v40, %v4665_v21  ;;  %v2780_v63 = vpack.c.bf16 %v1307_v32, %v1305_v27  ;;  %v1050_v61 = vmul.f32 %v3290_v44, %v4667_v14  ;;  %v1052_v13 = vmul.f32 %v3290_v44, %v4669_v35 }
 0x161   :  { %v1152_v46 = vmul.f32 %v3293_v45, %v4672_v39  ;;  %v1950_v59 = vmax.f32 %v1900_v36, 0.0  ;;  %v1952_v49 = vmax.f32 %v1902_v8, 0.0  ;;  %v998_v60 = vadd.f32 %v948_v51, %v896_v42  ;;  %v183_v36 = vld [vmem:[#allocation2 + $0x188] sm:$0x33]  ;;  %v259_v8 = vld [vmem:[#allocation2 + $0x250] sm:$0x33] }
 0x162   :  { %v1000_v26 = vadd.f32 %v950_v50, %v898_v55  ;;  %2781 = vmatprep.subr.bf16.mxu1 %v2780_v63  ;;  %v1154_v41 = vmul.f32 %v3293_v45, %v4674_v38  ;;  %v1541_v2 = vmul.f32 %v3307_v53, %v4654_v54  ;;  %v1543_v20 = vmul.f32 %v3307_v53, %v4657_v37  ;;  %v107_v55 = vld [vmem:[#allocation2 + $0xc0] sm:$0x33] }
 0x163   :  { %v1593_v27 = vmul.f32 %v3314_v56, %v4661_v47  ;;  %v2876_v62 = vpack.c.bf16 %v1952_v49, %v1950_v59  ;;  %v1100_v58 = vadd.f32 %v1050_v61, %v998_v60  ;;  %v1595_v42 = vmul.f32 %v3314_v56, %v4665_v21  ;;  %v335_v47 = vld [vmem:[#allocation2 + $0x318] sm:$0x33] }
 0x164   :  { %v1102_v32 = vadd.f32 %v1052_v13, %v1000_v26  ;;  %v1695_v50 = vmul.f32 %v3317_v57, %v4667_v14  ;;  %v1697_v63 = vmul.f32 %v3317_v57, %v4669_v35  ;;  %v1797_v37 = vmul.f32 %v3328_v0, %v4672_v39 }
 0x165   :  { %v1643_v51 = vadd.f32 %v1593_v27, %v1541_v2  ;;  %2877 = vmatprep.subr.bf16.mxu0 %v2876_v62  ;;  %v1202_v61 = vadd.f32 %v1152_v46, %v1100_v58  ;;  %v1645_v59 = vadd.f32 %v1595_v42, %v1543_v20  ;;  %v1799_v49 = vmul.f32 %v3328_v0, %v4674_v38 }
 0x166   :  { %v1204_v13 = vadd.f32 %v1154_v41, %v1102_v32  ;;  %v4710_v26 = vunpack.c.h.bf16 %v107_v55  ;;  %v4712_v2 = vunpack.c.h.bf16 %v183_v36  ;;  %v4714_v27 = vunpack.c.h.bf16 %v259_v8 }
 0x167   :  { %v1745_v60 = vadd.f32 %v1695_v50, %v1643_v51  ;;  %v1254_v35 = vadd.f32 %v3304_v52, %v1202_v61  ;;  %v1747_v39 = vadd.f32 %v1697_v63, %v1645_v59  ;;  %v4718_v21 = vunpack.c.h.bf16 %v335_v47 }
 0x168   :  { %v1256_v14 = vadd.f32 %v3304_v52, %v1204_v13  ;;  %v901_v41 = vmul.f32 %v3266_v34, %v4710_v26  ;;  %v953_v20 = vmul.f32 %v3281_v40, %v4712_v2  ;;  %v1055_v62 = vmul.f32 %v3290_v44, %v4714_v27 }
 0x169   :  { %v1847_v46 = vadd.f32 %v1797_v37, %v1745_v60  ;;  %v1304_v58 = vmax.f32 %v1254_v35, 0.0  ;;  %v1849_v42 = vadd.f32 %v1799_v49, %v1747_v39  ;;  %v1157_v51 = vmul.f32 %v3293_v45, %v4718_v21 }
 0x16a   :  { %v1306_v32 = vmax.f32 %v1256_v14, 0.0  ;;  %v1003_v63 = vadd.f32 %v953_v20, %v901_v41  ;;  %v1546_v37 = vmul.f32 %v3307_v53, %v4710_v26  ;;  %v1598_v14 = vmul.f32 %v3314_v56, %v4712_v2 }
 0x16b   :  { %v1899_v50 = vadd.f32 %v3331_v1, %v1847_v46  ;;  %v1901_v13 = vadd.f32 %v3331_v1, %v1849_v42  ;;  %v1700_v35 = vmul.f32 %v3317_v57, %v4714_v27  ;;  %v1802_v49 = vmul.f32 %v3328_v0, %v4718_v21 }
 0x16c   :  { %v2782_v61 = vpack.c.bf16 %v1306_v32, %v1304_v58  ;;  %v1105_v59 = vadd.f32 %v1055_v62, %v1003_v63  ;;  %v4742_v60 = vunpack.c.l.bf16 %v107_v55  ;;  %v1648_v41 = vadd.f32 %v1598_v14, %v1546_v37 }
 0x16d   :  { %v1949_v39 = vmax.f32 %v1899_v50, 0.0  ;;  %v1951_v46 = vmax.f32 %v1901_v13, 0.0  ;;  %v4746_v20 = vunpack.c.l.bf16 %v183_v36  ;;  %v4748_v58 = vunpack.c.l.bf16 %v259_v8  ;;  %v1312_v8 = vld [vmem:[#allocation9 + $0x28] sm:$0xff] }
 0x16e   :  { %2783 = vmatpush1.bf16.msra.mxu1 %v2782_v61  ;;  %v1207_v32 = vadd.f32 %v1157_v51, %v1105_v59  ;;  %v4750_v42 = vunpack.c.l.bf16 %v335_v47  ;;  %v900_v62 = vmul.f32 %v3266_v34, %v4742_v60  ;;  %v1545_v50 = vmul.f32 %v3307_v53, %v4742_v60  ;;  %v1957_v47 = vld [vmem:[#allocation9 + $0x48] sm:$0xff]  ;;  %2712 = vmatprep.mubr.msk.f32.mxu1 %vm1315_vm1, %v1312_v8 }
 0x16f   :  { %v2878_v55 = vpack.c.bf16 %v1951_v46, %v1949_v39  ;;  %v1750_v63 = vadd.f32 %v1700_v35, %v1648_v41  ;;  %v952_v37 = vmul.f32 %v3281_v40, %v4746_v20  ;;  %v1054_v36 = vmul.f32 %v3290_v44, %v4748_v58  ;;  %2725 = vmatprep.mubr.msk.f32.mxu0 %vm1315_vm1, %v1957_v47 }
 0x170   :  { %v1259_v34 = vadd.f32 %v3304_v52, %v1207_v32  ;;  %v1156_v53 = vmul.f32 %v3293_v45, %v4750_v42  ;;  %v1597_v51 = vmul.f32 %v3314_v56, %v4746_v20  ;;  %v1699_v40 = vmul.f32 %v3317_v57, %v4748_v58 }
 0x171   :  { %2879 = vmatpush1.bf16.msra.mxu0 %v2878_v55  ;;  %v1852_v44 = vadd.f32 %v1802_v49, %v1750_v63  ;;  %v1002_v61 = vadd.f32 %v952_v37, %v900_v62  ;;  %v1801_v13 = vmul.f32 %v3328_v0, %v4750_v42  ;;  %v4779_v45 = vstv %s4731_s10 }
 0x172   :  { %v1309_v14 = vmax.f32 %v1259_v34, 0.0  ;;  %v1647_v35 = vadd.f32 %v1597_v51, %v1545_v50  ;;  %v4782_v56 = vstv %s4733_s11  ;;  %v389_v0 = vmul.f32 %v4779_v45, %v3194_v3 }
 0x173   :  { %v1904_v57 = vadd.f32 %v3331_v1, %v1852_v44  ;;  %v1104_v39 = vadd.f32 %v1054_v36, %v1002_v61  ;;  %v391_v59 = vmul.f32 %v4779_v45, %v3196_v4  ;;  %v441_v46 = vmul.f32 %v4782_v56, %v3198_v6 }
 0x174   :  { %2710 = vmatprep.subr.msk.mxu1 %vm1322_vm0, %v1309_v14  ;;  %v1749_v49 = vadd.f32 %v1699_v40, %v1647_v35  ;;  %v443_v41 = vmul.f32 %v4782_v56, %v3204_v10  ;;  %v4802_v32 = vstv %s4744_s12  ;;  %v4809_v47 = vstv %s4756_s13 }
 0x175   :  { %v1954_v62 = vmax.f32 %v1904_v57, 0.0  ;;  %v1206_v50 = vadd.f32 %v1156_v53, %v1104_v39  ;;  %v543_v55 = vmul.f32 %v4802_v32, %v3206_v11  ;;  %v545_v63 = vmul.f32 %v4802_v32, %v3208_v12 }
 0x176   :  { %v1851_v37 = vadd.f32 %v1801_v13, %v1749_v49  ;;  %v491_v36 = vadd.f32 %v441_v46, %v389_v0  ;;  %v493_v8 = vadd.f32 %v443_v41, %v391_v59  ;;  %v645_v51 = vmul.f32 %v4809_v47, %v3216_v16  ;;  %v1311_v46 = vld [vmem:[#allocation9 + $0x20] sm:$0xff] }
 0x177   :  { %2723 = vmatprep.subr.msk.mxu0 %vm1322_vm0, %v1954_v62  ;;  %v1258_v34 = vadd.f32 %v3304_v52, %v1206_v50  ;;  %v647_v53 = vmul.f32 %v4809_v47, %v3218_v17  ;;  %v4818_v40 = vstv %s4762_s14  ;;  %v4822_v14 = vstv %s4771_s15 }
 0x178   :  { %v1903_v44 = vadd.f32 %v3331_v1, %v1851_v37  ;;  %v593_v61 = vadd.f32 %v543_v55, %v491_v36  ;;  %v595_v13 = vadd.f32 %v545_v63, %v493_v8  ;;  %v2056_v52 = vmul.f32 %v4822_v14, %v3194_v3 }
 0x179   :  { %v1308_v35 = vmax.f32 %v1258_v34, 0.0  ;;  %v2058_v57 = vmul.f32 %v4822_v14, %v3196_v4  ;;  %v4829_v39 = vstv %s4775_s1  ;;  %v4837_v62 = vstv %s4785_s16  ;;  %v1956_v4 = vld [vmem:[#allocation9 + $0x40] sm:$0xff] }
 0x17a   :  { %v1953_v0 = vmax.f32 %v1903_v44, 0.0  ;;  %v695_v59 = vadd.f32 %v645_v51, %v593_v61  ;;  %v697_v49 = vadd.f32 %v647_v53, %v595_v13  ;;  %v2108_v1 = vmul.f32 %v4829_v39, %v3198_v6 }
 0x17b   :  { %2711 = vmatpush1.msk.msra.mxu1 %vm1322_vm0, %v1308_v35  ;;  %v2110_v41 = vmul.f32 %v4829_v39, %v3204_v10  ;;  %v4840_v3 = vstv %s4792_s18  ;;  %v4843_v50 = vstv %s4794_s19  ;;  %v2210_v37 = vmul.f32 %v4837_v62, %v3206_v11 }
 0x17c   :  { %2724 = vmatpush1.msk.msra.mxu0 %vm1322_vm0, %v1953_v0  ;;  %v747_v55 = vadd.f32 %v4818_v40, %v695_v59  ;;  %v749_v63 = vadd.f32 %v4818_v40, %v697_v49  ;;  %v2158_v6 = vadd.f32 %v2108_v1, %v2056_v52  ;;  %v2212_v10 = vmul.f32 %v4837_v62, %v3208_v12 }
 0x17d   :  { %v2160_v36 = vadd.f32 %v2110_v41, %v2058_v57  ;;  %v2312_v8 = vmul.f32 %v4840_v3, %v3216_v16  ;;  %v2314_v34 = vmul.f32 %v4840_v3, %v3218_v17  ;;  %1394 = vmatmul.mubr.f32.vlgmr.msra.gmra.mrb[0].mxu1 %v1311_v46  ;;  %v388_v61 = vmul.f32 %v4779_v45, %v3202_v9 }
 0x17e   :  { %v797_v51 = vmax.f32 %v747_v55, 0.0  ;;  %v799_v53 = vmax.f32 %v749_v63, 0.0  ;;  %v2260_v44 = vadd.f32 %v2210_v37, %v2158_v6  ;;  %2037 = vmatmul.mubr.f32.vlgmr.msra.gmra.mrb[0].mxu0 %v1956_v4  ;;  %v390_v11 = vmul.f32 %v4779_v45, %v3214_v15 }
 0x17f   :  { %v2262_v13 = vadd.f32 %v2212_v10, %v2160_v36  ;;  %v440_v12 = vmul.f32 %v4782_v56, %v3224_v18  ;;  %v442_v16 = vmul.f32 %v4782_v56, %v3226_v19  ;;  %v542_v52 = vmul.f32 %v4802_v32, %v3234_v22 }
 0x180   :  { %v2784_v35 = vpack.c.bf16 %v799_v53, %v797_v51  ;;  %v2362_v17 = vadd.f32 %v2312_v8, %v2260_v44  ;;  %v544_v57 = vmul.f32 %v4802_v32, %v3236_v23  ;;  %v644_v1 = vmul.f32 %v4809_v47, %v3238_v24 }
 0x181   :  { %v2364_v0 = vadd.f32 %v2314_v34, %v2262_v13  ;;  %v490_v59 = vadd.f32 %v440_v12, %v388_v61  ;;  %v492_v49 = vadd.f32 %v442_v16, %v390_v11  ;;  %v646_v41 = vmul.f32 %v4809_v47, %v3240_v25 }
 0x182   :  { %2785 = vmatprep.subr.bf16.mxu1 %v2784_v35  ;;  %v2414_v46 = vadd.f32 %v4843_v50, %v2362_v17  ;;  %v2055_v4 = vmul.f32 %v4822_v14, %v3202_v9  ;;  %v2057_v55 = vmul.f32 %v4822_v14, %v3214_v15  ;;  %v2107_v36 = vmul.f32 %v4829_v39, %v3224_v18 }
 0x183   :  { %v2416_v63 = vadd.f32 %v4843_v50, %v2364_v0  ;;  %v592_v6 = vadd.f32 %v542_v52, %v490_v59  ;;  %v594_v37 = vadd.f32 %v544_v57, %v492_v49  ;;  %v2109_v8 = vmul.f32 %v4829_v39, %v3226_v19  ;;  %v6252_v0 = vld [vmem:[#allocation18_spill] sm:$0xff] }
 0x184   :  { %v2464_v10 = vmax.f32 %v2414_v46, 0.0  ;;  %v2209_v34 = vmul.f32 %v4837_v62, %v3234_v22  ;;  %v2211_v9 = vmul.f32 %v4837_v62, %v3236_v23  ;;  %v2157_v44 = vadd.f32 %v2107_v36, %v2055_v4  ;;  %v6255_v36 = vld [vmem:[#allocation22_spill] sm:$0xff] }
 0x185   :  { %v2466_v51 = vmax.f32 %v2416_v63, 0.0  ;;  %v694_v53 = vadd.f32 %v644_v1, %v592_v6  ;;  %v696_v15 = vadd.f32 %v646_v41, %v594_v37  ;;  %v2159_v61 = vadd.f32 %v2109_v8, %v2057_v55  ;;  %v6253_v41 = vld [vmem:[#allocation19_spill] sm:$0xff]  ;;  %v6254_v6 = vld [vmem:[#allocation21_spill] sm:$0xff] }
 0x186   :  { %v2311_v13 = vmul.f32 %v4840_v3, %v3238_v24  ;;  %v2313_v18 = vmul.f32 %v4840_v3, %v3240_v25  ;;  %v393_v19 = vmul.f32 %v4779_v45, %v3250_v28  ;;  %v2259_v23 = vadd.f32 %v2209_v34, %v2157_v44 }
 0x187   :  { %v2880_v11 = vpack.c.bf16 %v2466_v51, %v2464_v10  ;;  %v746_v22 = vadd.f32 %v4818_v40, %v694_v53  ;;  %v748_v12 = vadd.f32 %v4818_v40, %v696_v15  ;;  %v2261_v16 = vadd.f32 %v2211_v9, %v2159_v61 }
 0x188   :  { %v395_v35 = vmul.f32 %v4779_v45, %v3253_v29  ;;  %v445_v17 = vmul.f32 %v4782_v56, %v3256_v30  ;;  %v447_v24 = vmul.f32 %v4782_v56, %v3259_v31  ;;  %v2361_v57 = vadd.f32 %v2311_v13, %v2259_v23 }
 0x189   :  { %2881 = vmatprep.subr.bf16.mxu0 %v2880_v11  ;;  %v796_v25 = vmax.f32 %v746_v22, 0.0  ;;  %v798_v52 = vmax.f32 %v748_v12, 0.0  ;;  %v547_v59 = vmul.f32 %v4802_v32, %v6252_v0  ;;  %v2363_v49 = vadd.f32 %v2313_v18, %v2261_v16 }
 0x18a   :  { %v495_v1 = vadd.f32 %v445_v17, %v393_v19  ;;  %v497_v46 = vadd.f32 %v447_v24, %v395_v35  ;;  %v549_v4 = vmul.f32 %v4802_v32, %v6253_v41  ;;  %v2413_v63 = vadd.f32 %v4843_v50, %v2361_v57  ;;  %v6256_v24 = vld [vmem:[#allocation20_spill] sm:$0xff] }
 0x18b   :  { %v2786_v55 = vpack.c.bf16 %v798_v52, %v796_v25  ;;  %v649_v37 = vmul.f32 %v4809_v47, %v6254_v6  ;;  %v651_v10 = vmul.f32 %v4809_v47, %v6255_v36  ;;  %v2415_v8 = vadd.f32 %v4843_v50, %v2363_v49  ;;  %v6257_v52 = vld [vmem:[#allocation23_spill] sm:$0xff]  ;;  %v6258_v49 = vld [vmem:[#allocation24_spill] sm:$0xff] }
 0x18c   :  { %v597_v34 = vadd.f32 %v547_v59, %v495_v1  ;;  %v599_v9 = vadd.f32 %v549_v4, %v497_v46  ;;  %v2060_v51 = vmul.f32 %v4822_v14, %v3250_v28  ;;  %v2463_v53 = vmax.f32 %v2413_v63, 0.0  ;;  %v6259_v46 = vld [vmem:[#allocation25_spill] sm:$0xff]  ;;  %v6260_v63 = vld [vmem:[#allocation26_spill] sm:$0xff] }
 0x18d   :  { %2787 = vmatpush1.bf16.msra.mxu1 %v2786_v55  ;;  %v2062_v15 = vmul.f32 %v4822_v14, %v3253_v29  ;;  %v2112_v44 = vmul.f32 %v4829_v39, %v3256_v30  ;;  %v2114_v61 = vmul.f32 %v4829_v39, %v3259_v31  ;;  %v2465_v13 = vmax.f32 %v2415_v8, 0.0 }
 0x18e   :  { %v699_v18 = vadd.f32 %v649_v37, %v597_v34  ;;  %v701_v19 = vadd.f32 %v651_v10, %v599_v9  ;;  %v2214_v11 = vmul.f32 %v4837_v62, %v6252_v0  ;;  %v2216_v28 = vmul.f32 %v4837_v62, %v6253_v41  ;;  %v6261_v37 = vld [vmem:[#allocation27_spill] sm:$0xff]  ;;  %v6262_v9 = vld [vmem:[#allocation28_spill] sm:$0xff] }
 0x18f   :  { %v2162_v22 = vadd.f32 %v2112_v44, %v2060_v51  ;;  %v2164_v12 = vadd.f32 %v2114_v61, %v2062_v15  ;;  %v2316_v29 = vmul.f32 %v4840_v3, %v6254_v6  ;;  %v2882_v23 = vpack.c.bf16 %v2465_v13, %v2463_v53  ;;  %v6263_v44 = vld [vmem:[#allocation29_spill] sm:$0xff] }
 0x190   :  { %v751_v30 = vadd.f32 %v4818_v40, %v699_v18  ;;  %v753_v16 = vadd.f32 %v4818_v40, %v701_v19  ;;  %v2318_v31 = vmul.f32 %v4840_v3, %v6255_v36  ;;  %v392_v25 = vmul.f32 %v4779_v45, %v6256_v24 }
 0x191   :  { %v2264_v35 = vadd.f32 %v2214_v11, %v2162_v22  ;;  %v2266_v17 = vadd.f32 %v2216_v28, %v2164_v12  ;;  %v394_v57 = vmul.f32 %v4779_v45, %v6257_v52  ;;  %2883 = vmatpush1.bf16.msra.mxu0 %v2882_v23  ;;  %v444_v1 = vmul.f32 %v4782_v56, %v6258_v49 }
 0x192   :  { %v801_v0 = vmax.f32 %v751_v30, 0.0  ;;  %v803_v59 = vmax.f32 %v753_v16, 0.0  ;;  %v446_v41 = vmul.f32 %v4782_v56, %v6259_v46  ;;  %v546_v6 = vmul.f32 %v4802_v32, %v6260_v63 }
 0x193   :  { %v2366_v4 = vadd.f32 %v2316_v29, %v2264_v35  ;;  %v2368_v55 = vadd.f32 %v2318_v31, %v2266_v17  ;;  %v548_v36 = vmul.f32 %v4802_v32, %v6261_v37  ;;  %v494_v8 = vadd.f32 %v444_v1, %v392_v25 }
 0x194   :  { %v2788_v10 = vpack.c.bf16 %v803_v59, %v801_v0  ;;  %v496_v34 = vadd.f32 %v446_v41, %v394_v57  ;;  %v648_v51 = vmul.f32 %v4809_v47, %v6262_v9  ;;  %v650_v61 = vmul.f32 %v4809_v47, %v6263_v44  ;;  %v6265_v41 = vld [vmem:[#allocation31_spill] sm:$0xff] }
 0x195   :  { %v2418_v53 = vadd.f32 %v4843_v50, %v2366_v4  ;;  %v2420_v15 = vadd.f32 %v4843_v50, %v2368_v55  ;;  %v2059_v13 = vmul.f32 %v4822_v14, %v6256_v24  ;;  %v596_v18 = vadd.f32 %v546_v6, %v494_v8  ;;  %v6266_v55 = vld [vmem:[#allocation32_spill] sm:$0xff]  ;;  %v6267_v6 = vld [vmem:[#allocation33_spill] sm:$0xff] }
 0x196   :  { %2789 = vmatprep.subr.bf16.mxu1 %v2788_v10  ;;  %v598_v19 = vadd.f32 %v548_v36, %v496_v34  ;;  %v2061_v11 = vmul.f32 %v4822_v14, %v6257_v52  ;;  %v2111_v22 = vmul.f32 %v4829_v39, %v6258_v49  ;;  %v2113_v29 = vmul.f32 %v4829_v39, %v6259_v46  ;;  %v6264_v49 = vld [vmem:[#allocation30_spill] sm:$0xff] }
 0x197   :  { %v2468_v12 = vmax.f32 %v2418_v53, 0.0  ;;  %v2470_v28 = vmax.f32 %v2420_v15, 0.0  ;;  %v2213_v23 = vmul.f32 %v4837_v62, %v6260_v63  ;;  %v698_v30 = vadd.f32 %v648_v51, %v596_v18  ;;  %v6268_v34 = vld [vmem:[#allocation34_spill] sm:$0xff] }
 0x198   :  { %v700_v16 = vadd.f32 %v650_v61, %v598_v19  ;;  %v2161_v31 = vadd.f32 %v2111_v22, %v2059_v13  ;;  %v2215_v35 = vmul.f32 %v4837_v62, %v6261_v37  ;;  %v2163_v24 = vadd.f32 %v2113_v29, %v2061_v11  ;;  %v6270_v19 = vld [vmem:[#allocation36_spill] sm:$0xff]  ;;  %v6271_v22 = vld [vmem:[#allocation37_spill] sm:$0xff] }
 0x199   :  { %v2884_v17 = vpack.c.bf16 %v2470_v28, %v2468_v12  ;;  %v2315_v25 = vmul.f32 %v4840_v3, %v6262_v9  ;;  %v2317_v52 = vmul.f32 %v4840_v3, %v6263_v44  ;;  %v750_v57 = vadd.f32 %v4818_v40, %v698_v30  ;;  %v6269_v44 = vld [vmem:[#allocation35_spill] sm:$0xff] }
 0x19a   :  { %v752_v0 = vadd.f32 %v4818_v40, %v700_v16  ;;  %v2263_v59 = vadd.f32 %v2213_v23, %v2161_v31  ;;  %v397_v1 = vmul.f32 %v4779_v45, %v6264_v49  ;;  %v2265_v46 = vadd.f32 %v2215_v35, %v2163_v24 }
 0x19b   :  { %2885 = vmatprep.subr.bf16.mxu0 %v2884_v17  ;;  %v399_v4 = vmul.f32 %v4779_v45, %v6265_v41  ;;  %v449_v63 = vmul.f32 %v4782_v56, %v6266_v55  ;;  %v451_v37 = vmul.f32 %v4782_v56, %v6267_v6  ;;  %v800_v36 = vmax.f32 %v750_v57, 0.0 }
 0x19c   :  { %v802_v10 = vmax.f32 %v752_v0, 0.0  ;;  %v2365_v8 = vadd.f32 %v2315_v25, %v2263_v59  ;;  %v551_v9 = vmul.f32 %v4802_v32, %v6268_v34  ;;  %v2367_v51 = vadd.f32 %v2317_v52, %v2265_v46 }
 0x19d   :  { %v499_v53 = vadd.f32 %v449_v63, %v397_v1  ;;  %v501_v15 = vadd.f32 %v451_v37, %v399_v4  ;;  %v553_v61 = vmul.f32 %v4802_v32, %v6269_v44  ;;  %v653_v11 = vmul.f32 %v4809_v47, %v6270_v19  ;;  %v6272_v37 = vld [vmem:[#allocation38_spill] sm:$0xff] }
 0x19e   :  { %v2790_v13 = vpack.c.bf16 %v802_v10, %v800_v36  ;;  %v2417_v18 = vadd.f32 %v4843_v50, %v2365_v8  ;;  %v655_v12 = vmul.f32 %v4809_v47, %v6271_v22  ;;  %v2419_v28 = vadd.f32 %v4843_v50, %v2367_v51  ;;  %v6273_v10 = vld [vmem:[#allocation39_spill] sm:$0xff]  ;;  %v6274_v51 = vld [vmem:[#allocation40_spill] sm:$0xff] }
 0x19f   :  { %v601_v29 = vadd.f32 %v551_v9, %v499_v53  ;;  %v603_v23 = vadd.f32 %v553_v61, %v501_v15  ;;  %v2064_v30 = vmul.f32 %v4822_v14, %v6264_v49  ;;  %v2066_v31 = vmul.f32 %v4822_v14, %v6265_v41  ;;  %v6275_v15 = vld [vmem:[#allocation41_spill] sm:$0xff] }
 0x1a0   :  { %2791 = vmatpush1.bf16.msra.mxu1 %v2790_v13  ;;  %v2467_v16 = vmax.f32 %v2417_v18, 0.0  ;;  %v2116_v35 = vmul.f32 %v4829_v39, %v6266_v55  ;;  %v2118_v17 = vmul.f32 %v4829_v39, %v6267_v6  ;;  %v2469_v24 = vmax.f32 %v2419_v28, 0.0  ;;  %v6276_v18 = vld [vmem:[#allocation42_spill] sm:$0xff] }
 0x1a1   :  { %v703_v25 = vadd.f32 %v653_v11, %v601_v29  ;;  %v705_v52 = vadd.f32 %v655_v12, %v603_v23  ;;  %v2218_v57 = vmul.f32 %v4837_v62, %v6268_v34  ;;  %v2220_v49 = vmul.f32 %v4837_v62, %v6269_v44  ;;  %v6277_v11 = vld [vmem:[#allocation43_spill] sm:$0xff]  ;;  %v6278_v23 = vld [vmem:[#allocation44_spill] sm:$0xff] }
 0x1a2   :  { %v2166_v0 = vadd.f32 %v2116_v35, %v2064_v30  ;;  %v2168_v59 = vadd.f32 %v2118_v17, %v2066_v31  ;;  %v2320_v1 = vmul.f32 %v4840_v3, %v6270_v19  ;;  %v2886_v46 = vpack.c.bf16 %v2469_v24, %v2467_v16  ;;  %v6279_v35 = vld [vmem:[#allocation45_spill] sm:$0xff] }
 0x1a3   :  { %v755_v41 = vadd.f32 %v4818_v40, %v703_v25  ;;  %v757_v4 = vadd.f32 %v4818_v40, %v705_v52  ;;  %v2322_v55 = vmul.f32 %v4840_v3, %v6271_v22  ;;  %v396_v36 = vmul.f32 %v4779_v45, %v6272_v37 }
 0x1a4   :  { %v2268_v63 = vadd.f32 %v2218_v57, %v2166_v0  ;;  %v2270_v6 = vadd.f32 %v2220_v49, %v2168_v59  ;;  %v398_v8 = vmul.f32 %v4779_v45, %v6273_v10  ;;  %2887 = vmatpush1.bf16.msra.mxu0 %v2886_v46  ;;  %v448_v53 = vmul.f32 %v4782_v56, %v6274_v51 }
 0x1a5   :  { %v805_v34 = vmax.f32 %v755_v41, 0.0  ;;  %v807_v9 = vmax.f32 %v757_v4, 0.0  ;;  %v450_v44 = vmul.f32 %v4782_v56, %v6275_v15  ;;  %v550_v19 = vmul.f32 %v4802_v32, %v6276_v18 }
 0x1a6   :  { %v2370_v61 = vadd.f32 %v2320_v1, %v2268_v63  ;;  %v2372_v13 = vadd.f32 %v2322_v55, %v2270_v6  ;;  %v552_v22 = vmul.f32 %v4802_v32, %v6277_v11  ;;  %v498_v28 = vadd.f32 %v448_v53, %v396_v36 }
 0x1a7   :  { %v2792_v12 = vpack.c.bf16 %v807_v9, %v805_v34  ;;  %v500_v29 = vadd.f32 %v450_v44, %v398_v8  ;;  %v652_v30 = vmul.f32 %v4809_v47, %v6278_v23  ;;  %v654_v17 = vmul.f32 %v4809_v47, %v6279_v35  ;;  %v6281_v44 = vld [vmem:[#allocation47_spill] sm:$0xff] }
 0x1a8   :  { %v2422_v16 = vadd.f32 %v4843_v50, %v2370_v61  ;;  %v2424_v31 = vadd.f32 %v4843_v50, %v2372_v13  ;;  %v2063_v24 = vmul.f32 %v4822_v14, %v6272_v37  ;;  %v600_v25 = vadd.f32 %v550_v19, %v498_v28  ;;  %v6282_v13 = vld [vmem:[#allocation48_spill] sm:$0xff]  ;;  %v6283_v19 = vld [vmem:[#allocation49_spill] sm:$0xff] }
 0x1a9   :  { %2793 = vmatprep.subr.bf16.mxu1 %v2792_v12  ;;  %v602_v52 = vadd.f32 %v552_v22, %v500_v29  ;;  %v2065_v57 = vmul.f32 %v4822_v14, %v6273_v10  ;;  %v2115_v0 = vmul.f32 %v4829_v39, %v6274_v51  ;;  %v2117_v1 = vmul.f32 %v4829_v39, %v6275_v15  ;;  %v6280_v51 = vld [vmem:[#allocation46_spill] sm:$0xff] }
 0x1aa   :  { %v2472_v59 = vmax.f32 %v2422_v16, 0.0  ;;  %v2474_v49 = vmax.f32 %v2424_v31, 0.0  ;;  %v2217_v46 = vmul.f32 %v4837_v62, %v6276_v18  ;;  %v702_v41 = vadd.f32 %v652_v30, %v600_v25  ;;  %v6284_v29 = vld [vmem:[#allocation50_spill] sm:$0xff] }
 0x1ab   :  { %v704_v4 = vadd.f32 %v654_v17, %v602_v52  ;;  %v2165_v55 = vadd.f32 %v2115_v0, %v2063_v24  ;;  %v2219_v63 = vmul.f32 %v4837_v62, %v6277_v11  ;;  %v2167_v37 = vadd.f32 %v2117_v1, %v2065_v57  ;;  %v6286_v52 = vld [vmem:[#allocation52_spill] sm:$0xff]  ;;  %v6287_v0 = vld [vmem:[#allocation53_spill] sm:$0xff] }
 0x1ac   :  { %v2888_v6 = vpack.c.bf16 %v2474_v49, %v2472_v59  ;;  %v2319_v36 = vmul.f32 %v4840_v3, %v6278_v23  ;;  %v2321_v10 = vmul.f32 %v4840_v3, %v6279_v35  ;;  %v754_v8 = vadd.f32 %v4818_v40, %v702_v41  ;;  %v6285_v35 = vld [vmem:[#allocation51_spill] sm:$0xff] }
 0x1ad   :  { %v756_v34 = vadd.f32 %v4818_v40, %v704_v4  ;;  %v2267_v9 = vadd.f32 %v2217_v46, %v2165_v55  ;;  %v401_v53 = vmul.f32 %v4779_v45, %v6280_v51  ;;  %v2269_v15 = vadd.f32 %v2219_v63, %v2167_v37 }
 0x1ae   :  { %2889 = vmatprep.subr.bf16.mxu0 %v2888_v6  ;;  %v403_v61 = vmul.f32 %v4779_v45, %v6281_v44  ;;  %v453_v18 = vmul.f32 %v4782_v56, %v6282_v13  ;;  %v455_v11 = vmul.f32 %v4782_v56, %v6283_v19  ;;  %v804_v22 = vmax.f32 %v754_v8, 0.0 }
 0x1af   :  { %v806_v12 = vmax.f32 %v756_v34, 0.0  ;;  %v2369_v28 = vadd.f32 %v2319_v36, %v2267_v9  ;;  %v555_v23 = vmul.f32 %v4802_v32, %v6284_v29  ;;  %v2371_v30 = vadd.f32 %v2321_v10, %v2269_v15 }
 0x1b0   :  { %v503_v16 = vadd.f32 %v453_v18, %v401_v53  ;;  %v505_v31 = vadd.f32 %v455_v11, %v403_v61  ;;  %v557_v17 = vmul.f32 %v4802_v32, %v6285_v35  ;;  %v657_v57 = vmul.f32 %v4809_v47, %v6286_v52  ;;  %v6288_v11 = vld [vmem:[#allocation54_spill] sm:$0xff] }
 0x1b1   :  { %v2794_v24 = vpack.c.bf16 %v806_v12, %v804_v22  ;;  %v2421_v25 = vadd.f32 %v4843_v50, %v2369_v28  ;;  %v659_v59 = vmul.f32 %v4809_v47, %v6287_v0  ;;  %v2423_v49 = vadd.f32 %v4843_v50, %v2371_v30  ;;  %v6289_v12 = vld [vmem:[#allocation55_spill] sm:$0xff]  ;;  %v6290_v30 = vld [vmem:[#allocation56_spill] sm:$0xff] }
 0x1b2   :  { %v605_v1 = vadd.f32 %v555_v23, %v503_v16  ;;  %v607_v46 = vadd.f32 %v557_v17, %v505_v31  ;;  %v2068_v41 = vmul.f32 %v4822_v14, %v6280_v51  ;;  %v2070_v55 = vmul.f32 %v4822_v14, %v6281_v44  ;;  %v6291_v31 = vld [vmem:[#allocation57_spill] sm:$0xff] }
 0x1b3   :  { %2795 = vmatpush1.bf16.msra.mxu1 %v2794_v24  ;;  %v2471_v4 = vmax.f32 %v2421_v25, 0.0  ;;  %v2120_v63 = vmul.f32 %v4829_v39, %v6282_v13  ;;  %v2122_v6 = vmul.f32 %v4829_v39, %v6283_v19  ;;  %v2473_v37 = vmax.f32 %v2423_v49, 0.0  ;;  %v6292_v25 = vld [vmem:[#allocation58_spill] sm:$0xff] }
 0x1b4   :  { %v707_v36 = vadd.f32 %v657_v57, %v605_v1  ;;  %v709_v10 = vadd.f32 %v659_v59, %v607_v46  ;;  %v2222_v8 = vmul.f32 %v4837_v62, %v6284_v29  ;;  %v2224_v51 = vmul.f32 %v4837_v62, %v6285_v35  ;;  %v6293_v57 = vld [vmem:[#allocation59_spill] sm:$0xff]  ;;  %v6294_v46 = vld [vmem:[#allocation60_spill] sm:$0xff] }
 0x1b5   :  { %v2170_v34 = vadd.f32 %v2120_v63, %v2068_v41  ;;  %v2172_v9 = vadd.f32 %v2122_v6, %v2070_v55  ;;  %v2324_v53 = vmul.f32 %v4840_v3, %v6286_v52  ;;  %v2890_v15 = vpack.c.bf16 %v2473_v37, %v2471_v4  ;;  %v6295_v63 = vld [vmem:[#allocation61_spill] sm:$0xff] }
 0x1b6   :  { %v759_v44 = vadd.f32 %v4818_v40, %v707_v36  ;;  %v761_v61 = vadd.f32 %v4818_v40, %v709_v10  ;;  %v2326_v13 = vmul.f32 %v4840_v3, %v6287_v0  ;;  %v400_v22 = vmul.f32 %v4779_v45, %v6288_v11 }
 0x1b7   :  { %v2272_v18 = vadd.f32 %v2222_v8, %v2170_v34  ;;  %v2274_v19 = vadd.f32 %v2224_v51, %v2172_v9  ;;  %v402_v28 = vmul.f32 %v4779_v45, %v6289_v12  ;;  %2891 = vmatpush1.bf16.msra.mxu0 %v2890_v15  ;;  %v452_v16 = vmul.f32 %v4782_v56, %v6290_v30 }
 0x1b8   :  { %v809_v29 = vmax.f32 %v759_v44, 0.0  ;;  %v811_v23 = vmax.f32 %v761_v61, 0.0  ;;  %v454_v35 = vmul.f32 %v4782_v56, %v6291_v31  ;;  %v554_v52 = vmul.f32 %v4802_v32, %v6292_v25 }
 0x1b9   :  { %v2374_v17 = vadd.f32 %v2324_v53, %v2272_v18  ;;  %v2376_v24 = vadd.f32 %v2326_v13, %v2274_v19  ;;  %v556_v0 = vmul.f32 %v4802_v32, %v6293_v57  ;;  %v502_v49 = vadd.f32 %v452_v16, %v400_v22 }
 0x1ba   :  { %v2796_v59 = vpack.c.bf16 %v811_v23, %v809_v29  ;;  %v504_v1 = vadd.f32 %v454_v35, %v402_v28  ;;  %v656_v41 = vmul.f32 %v4809_v47, %v6294_v46  ;;  %v658_v6 = vmul.f32 %v4809_v47, %v6295_v63  ;;  %v6297_v35 = vld [vmem:[#allocation63_spill] sm:$0xff] }
 0x1bb   :  { %v2426_v4 = vadd.f32 %v4843_v50, %v2374_v17  ;;  %v2428_v55 = vadd.f32 %v4843_v50, %v2376_v24  ;;  %v2067_v37 = vmul.f32 %v4822_v14, %v6288_v11  ;;  %v604_v36 = vadd.f32 %v554_v52, %v502_v49  ;;  %v6298_v24 = vld [vmem:[#allocation64_spill] sm:$0xff]  ;;  %v6299_v52 = vld [vmem:[#allocation65_spill] sm:$0xff] }
 0x1bc   :  { %2797 = vmatprep.subr.bf16.mxu1 %v2796_v59  ;;  %v606_v10 = vadd.f32 %v556_v0, %v504_v1  ;;  %v2069_v8 = vmul.f32 %v4822_v14, %v6289_v12  ;;  %v2119_v34 = vmul.f32 %v4829_v39, %v6290_v30  ;;  %v2121_v53 = vmul.f32 %v4829_v39, %v6291_v31  ;;  %v6296_v30 = vld [vmem:[#allocation62_spill] sm:$0xff] }
 0x1bd   :  { %v2476_v9 = vmax.f32 %v2426_v4, 0.0  ;;  %v2478_v51 = vmax.f32 %v2428_v55, 0.0  ;;  %v2221_v15 = vmul.f32 %v4837_v62, %v6292_v25  ;;  %v706_v44 = vadd.f32 %v656_v41, %v604_v36  ;;  %v6300_v1 = vld [vmem:[#allocation66_spill] sm:$0xff] }
 0x1be   :  { %v708_v61 = vadd.f32 %v658_v6, %v606_v10  ;;  %v2169_v13 = vadd.f32 %v2119_v34, %v2067_v37  ;;  %v2223_v18 = vmul.f32 %v4837_v62, %v6293_v57  ;;  %v2171_v11 = vadd.f32 %v2121_v53, %v2069_v8  ;;  %v6302_v10 = vld [vmem:[#allocation68_spill] sm:$0xff]  ;;  %v6303_v34 = vld [vmem:[#allocation69_spill] sm:$0xff] }
 0x1bf   :  { %v2892_v19 = vpack.c.bf16 %v2478_v51, %v2476_v9  ;;  %v2323_v22 = vmul.f32 %v4840_v3, %v6294_v46  ;;  %v2325_v12 = vmul.f32 %v4840_v3, %v6295_v63  ;;  %v758_v28 = vadd.f32 %v4818_v40, %v706_v44  ;;  %v6301_v63 = vld [vmem:[#allocation67_spill] sm:$0xff] }
 0x1c0   :  { %v760_v29 = vadd.f32 %v4818_v40, %v708_v61  ;;  %v2271_v23 = vadd.f32 %v2221_v15, %v2169_v13  ;;  %v405_v16 = vmul.f32 %v4779_v45, %v6296_v30  ;;  %v2273_v31 = vadd.f32 %v2223_v18, %v2171_v11 }
 0x1c1   :  { %2893 = vmatprep.subr.bf16.mxu0 %v2892_v19  ;;  %v407_v17 = vmul.f32 %v4779_v45, %v6297_v35  ;;  %v457_v25 = vmul.f32 %v4782_v56, %v6298_v24  ;;  %v459_v57 = vmul.f32 %v4782_v56, %v6299_v52  ;;  %v808_v0 = vmax.f32 %v758_v28, 0.0 }
 0x1c2   :  { %v810_v59 = vmax.f32 %v760_v29, 0.0  ;;  %v2373_v49 = vadd.f32 %v2323_v22, %v2271_v23  ;;  %v559_v46 = vmul.f32 %v4802_v32, %v6300_v1  ;;  %v2375_v41 = vadd.f32 %v2325_v12, %v2273_v31 }
 0x1c3   :  { %v507_v4 = vadd.f32 %v457_v25, %v405_v16  ;;  %v509_v55 = vadd.f32 %v459_v57, %v407_v17  ;;  %v561_v6 = vmul.f32 %v4802_v32, %v6301_v63  ;;  %v661_v8 = vmul.f32 %v4809_v47, %v6302_v10  ;;  %v6304_v57 = vld [vmem:[#allocation70_spill] sm:$0xff] }
 0x1c4   :  { %v2798_v37 = vpack.c.bf16 %v810_v59, %v808_v0  ;;  %v2425_v36 = vadd.f32 %v4843_v50, %v2373_v49  ;;  %v663_v9 = vmul.f32 %v4809_v47, %v6303_v34  ;;  %v2427_v51 = vadd.f32 %v4843_v50, %v2375_v41  ;;  %v6305_v59 = vld [vmem:[#allocation71_spill] sm:$0xff]  ;;  %v6306_v41 = vld [vmem:[#allocation72_spill] sm:$0xff] }
 0x1c5   :  { %v609_v53 = vadd.f32 %v559_v46, %v507_v4  ;;  %v611_v15 = vadd.f32 %v561_v6, %v509_v55  ;;  %v2072_v44 = vmul.f32 %v4822_v14, %v6296_v30  ;;  %v2074_v13 = vmul.f32 %v4822_v14, %v6297_v35  ;;  %v6307_v55 = vld [vmem:[#allocation73_spill] sm:$0xff] }
 0x1c6   :  { %2799 = vmatpush1.bf16.msra.mxu1 %v2798_v37  ;;  %v2475_v61 = vmax.f32 %v2425_v36, 0.0  ;;  %v2124_v18 = vmul.f32 %v4829_v39, %v6298_v24  ;;  %v2126_v19 = vmul.f32 %v4829_v39, %v6299_v52  ;;  %v2477_v11 = vmax.f32 %v2427_v51, 0.0  ;;  %v6308_v36 = vld [vmem:[#allocation74_spill] sm:$0xff] }
 0x1c7   :  { %v711_v22 = vadd.f32 %v661_v8, %v609_v53  ;;  %v713_v12 = vadd.f32 %v663_v9, %v611_v15  ;;  %v2226_v28 = vmul.f32 %v4837_v62, %v6300_v1  ;;  %v2228_v30 = vmul.f32 %v4837_v62, %v6301_v63  ;;  %v6309_v8 = vld [vmem:[#allocation75_spill] sm:$0xff]  ;;  %v6310_v15 = vld [vmem:[#allocation76_spill] sm:$0xff] }
 0x1c8   :  { %v2174_v29 = vadd.f32 %v2124_v18, %v2072_v44  ;;  %v2176_v23 = vadd.f32 %v2126_v19, %v2074_v13  ;;  %v2328_v16 = vmul.f32 %v4840_v3, %v6302_v10  ;;  %v2894_v31 = vpack.c.bf16 %v2477_v11, %v2475_v61  ;;  %v6311_v18 = vld [vmem:[#allocation77_spill] sm:$0xff] }
 0x1c9   :  { %v763_v35 = vadd.f32 %v4818_v40, %v711_v22  ;;  %v765_v17 = vadd.f32 %v4818_v40, %v713_v12  ;;  %v2330_v24 = vmul.f32 %v4840_v3, %v6303_v34  ;;  %v404_v0 = vmul.f32 %v4779_v45, %v6304_v57 }
 0x1ca   :  { %v2276_v25 = vadd.f32 %v2226_v28, %v2174_v29  ;;  %v2278_v52 = vadd.f32 %v2228_v30, %v2176_v23  ;;  %v406_v49 = vmul.f32 %v4779_v45, %v6305_v59  ;;  %2895 = vmatpush1.bf16.msra.mxu0 %v2894_v31  ;;  %v456_v4 = vmul.f32 %v4782_v56, %v6306_v41 }
 0x1cb   :  { %v813_v1 = vmax.f32 %v763_v35, 0.0  ;;  %v815_v46 = vmax.f32 %v765_v17, 0.0  ;;  %v458_v63 = vmul.f32 %v4782_v56, %v6307_v55  ;;  %v558_v10 = vmul.f32 %v4802_v32, %v6308_v36 }
 0x1cc   :  { %v2378_v6 = vadd.f32 %v2328_v16, %v2276_v25  ;;  %v2380_v37 = vadd.f32 %v2330_v24, %v2278_v52  ;;  %v560_v34 = vmul.f32 %v4802_v32, %v6309_v8  ;;  %v506_v51 = vadd.f32 %v456_v4, %v404_v0 }
 0x1cd   :  { %v2800_v9 = vpack.c.bf16 %v815_v46, %v813_v1  ;;  %v508_v53 = vadd.f32 %v458_v63, %v406_v49  ;;  %v660_v44 = vmul.f32 %v4809_v47, %v6310_v15  ;;  %v662_v19 = vmul.f32 %v4809_v47, %v6311_v18  ;;  %v6313_v63 = vld [vmem:[#allocation79_spill] sm:$0xff] }
 0x1ce   :  { %v2430_v61 = vadd.f32 %v4843_v50, %v2378_v6  ;;  %v2432_v13 = vadd.f32 %v4843_v50, %v2380_v37  ;;  %v2071_v11 = vmul.f32 %v4822_v14, %v6304_v57  ;;  %v608_v22 = vadd.f32 %v558_v10, %v506_v51  ;;  %v6314_v37 = vld [vmem:[#allocation80_spill] sm:$0xff]  ;;  %v6315_v10 = vld [vmem:[#allocation81_spill] sm:$0xff] }
 0x1cf   :  { %2801 = vmatprep.subr.bf16.mxu1 %v2800_v9  ;;  %v610_v12 = vadd.f32 %v560_v34, %v508_v53  ;;  %v2073_v28 = vmul.f32 %v4822_v14, %v6305_v59  ;;  %v2123_v29 = vmul.f32 %v4829_v39, %v6306_v41  ;;  %v2125_v16 = vmul.f32 %v4829_v39, %v6307_v55  ;;  %v6312_v41 = vld [vmem:[#allocation78_spill] sm:$0xff] }
 0x1d0   :  { %v2480_v23 = vmax.f32 %v2430_v61, 0.0  ;;  %v2482_v30 = vmax.f32 %v2432_v13, 0.0  ;;  %v2225_v31 = vmul.f32 %v4837_v62, %v6308_v36  ;;  %v710_v35 = vadd.f32 %v660_v44, %v608_v22  ;;  %v6316_v53 = vld [vmem:[#allocation82_spill] sm:$0xff] }
 0x1d1   :  { %v712_v17 = vadd.f32 %v662_v19, %v610_v12  ;;  %v2173_v24 = vadd.f32 %v2123_v29, %v2071_v11  ;;  %v2227_v25 = vmul.f32 %v4837_v62, %v6309_v8  ;;  %v2175_v57 = vadd.f32 %v2125_v16, %v2073_v28  ;;  %v6318_v12 = vld [vmem:[#allocation84_spill] sm:$0xff]  ;;  %v6319_v29 = vld [vmem:[#allocation85_spill] sm:$0xff] }
 0x1d2   :  { %v2896_v52 = vpack.c.bf16 %v2482_v30, %v2480_v23  ;;  %v2327_v0 = vmul.f32 %v4840_v3, %v6310_v15  ;;  %v2329_v59 = vmul.f32 %v4840_v3, %v6311_v18  ;;  %v762_v49 = vadd.f32 %v4818_v40, %v710_v35  ;;  %v6317_v18 = vld [vmem:[#allocation83_spill] sm:$0xff] }
 0x1d3   :  { %v764_v1 = vadd.f32 %v4818_v40, %v712_v17  ;;  %v2275_v46 = vadd.f32 %v2225_v31, %v2173_v24  ;;  %v409_v4 = vmul.f32 %v4779_v45, %v6312_v41  ;;  %v2277_v55 = vadd.f32 %v2227_v25, %v2175_v57  ;;  %v1314_v57 = vld [vmem:[#allocation9 + $0x38] sm:$0x3] }
 0x1d4   :  { %2897 = vmatprep.subr.bf16.mxu0 %v2896_v52  ;;  %v411_v6 = vmul.f32 %v4779_v45, %v6313_v63  ;;  %v461_v36 = vmul.f32 %v4782_v56, %v6314_v37  ;;  %v463_v8 = vmul.f32 %v4782_v56, %v6315_v10  ;;  %v812_v34 = vmax.f32 %v762_v49, 0.0  ;;  %2713 = vmatprep.mubr.msk.f32.mxu1 %vm1315_vm1, %v1314_v57  ;;  %v6327_v57 = vld [vmem:[#allocation93_spill] sm:$0xff] }
 0x1d5   :  { %v814_v9 = vmax.f32 %v764_v1, 0.0  ;;  %v2377_v51 = vadd.f32 %v2327_v0, %v2275_v46  ;;  %v563_v15 = vmul.f32 %v4802_v32, %v6316_v53  ;;  %v2379_v44 = vadd.f32 %v2329_v59, %v2277_v55 }
 0x1d6   :  { %v511_v61 = vadd.f32 %v461_v36, %v409_v4  ;;  %v513_v13 = vadd.f32 %v463_v8, %v411_v6  ;;  %v565_v19 = vmul.f32 %v4802_v32, %v6317_v18  ;;  %v665_v28 = vmul.f32 %v4809_v47, %v6318_v12 }
 0x1d7   :  { %v2802_v11 = vpack.c.bf16 %v814_v9, %v812_v34  ;;  %v2429_v22 = vadd.f32 %v4843_v50, %v2377_v51  ;;  %v667_v23 = vmul.f32 %v4809_v47, %v6319_v29  ;;  %v2431_v30 = vadd.f32 %v4843_v50, %v2379_v44  ;;  %v6320_v34 = vld [vmem:[#allocation86_spill] sm:$0xff]  ;;  %v6321_v51 = vld [vmem:[#allocation87_spill] sm:$0xff] }
 0x1d8   :  { %v613_v16 = vadd.f32 %v563_v15, %v511_v61  ;;  %v615_v31 = vadd.f32 %v565_v19, %v513_v13  ;;  %v2076_v35 = vmul.f32 %v4822_v14, %v6312_v41  ;;  %v2078_v24 = vmul.f32 %v4822_v14, %v6313_v63  ;;  %v1959_v15 = vld [vmem:[#allocation9 + $0x58] sm:$0x3]  ;;  %v6322_v13 = vld [vmem:[#allocation88_spill] sm:$0xff]  ;;  %v6323_v19 = vld [vmem:[#allocation89_spill] sm:$0xff] }
 0x1d9   :  { %2803 = vmatpush1.bf16.msra.mxu1 %v2802_v11  ;;  %v2479_v17 = vmax.f32 %v2429_v22, 0.0  ;;  %v2128_v25 = vmul.f32 %v4829_v39, %v6314_v37  ;;  %v2130_v52 = vmul.f32 %v4829_v39, %v6315_v10  ;;  %v2481_v0 = vmax.f32 %v2431_v30, 0.0  ;;  %2726 = vmatprep.mubr.msk.f32.mxu0 %vm1315_vm1, %v1959_v15 }
 0x1da   :  { %v715_v59 = vadd.f32 %v665_v28, %v613_v16  ;;  %v717_v49 = vadd.f32 %v667_v23, %v615_v31  ;;  %v2230_v1 = vmul.f32 %v4837_v62, %v6316_v53  ;;  %v2232_v4 = vmul.f32 %v4837_v62, %v6317_v18  ;;  %v6324_v28 = vld [vmem:[#allocation90_spill] sm:$0xff]  ;;  %v6325_v23 = vld [vmem:[#allocation91_spill] sm:$0xff] }
 0x1db   :  { %v2178_v46 = vadd.f32 %v2128_v25, %v2076_v35  ;;  %v2180_v41 = vadd.f32 %v2130_v52, %v2078_v24  ;;  %v2332_v55 = vmul.f32 %v4840_v3, %v6318_v12  ;;  %v2898_v63 = vpack.c.bf16 %v2481_v0, %v2479_v17  ;;  %v6326_v17 = vld [vmem:[#allocation92_spill] sm:$0xff] }
 0x1dc   :  { %v767_v6 = vadd.f32 %v4818_v40, %v715_v59  ;;  %v769_v37 = vadd.f32 %v4818_v40, %v717_v49  ;;  %v2334_v36 = vmul.f32 %v4840_v3, %v6319_v29  ;;  %v408_v9 = vmul.f32 %v4779_v45, %v6320_v34 }
 0x1dd   :  { %v2280_v10 = vadd.f32 %v2230_v1, %v2178_v46  ;;  %v2282_v8 = vadd.f32 %v2232_v4, %v2180_v41  ;;  %v410_v53 = vmul.f32 %v4779_v45, %v6321_v51  ;;  %2899 = vmatpush1.bf16.msra.mxu0 %v2898_v63  ;;  %v460_v18 = vmul.f32 %v4782_v56, %v6322_v13 }
 0x1de   :  { %v817_v44 = vmax.f32 %v767_v6, 0.0  ;;  %v819_v61 = vmax.f32 %v769_v37, 0.0  ;;  %v462_v11 = vmul.f32 %v4782_v56, %v6323_v19  ;;  %v562_v29 = vmul.f32 %v4802_v32, %v6324_v28  ;;  %v1313_v37 = vld [vmem:[#allocation9 + $0x30] sm:$0x3] }
 0x1df   :  { %v2382_v22 = vadd.f32 %v2332_v55, %v2280_v10  ;;  %v2384_v12 = vadd.f32 %v2334_v36, %v2282_v8  ;;  %v564_v30 = vmul.f32 %v4802_v32, %v6325_v23  ;;  %v510_v31 = vadd.f32 %v460_v18, %v408_v9  ;;  %v1958_v36 = vld [vmem:[#allocation9 + $0x50] sm:$0x3]  ;;  %1400 = vmatmul.mubr.f32.gmra.mrb[2].mxu1 %v1313_v37 }
 0x1e0   :  { %v2804_v16 = vpack.c.bf16 %v819_v61, %v817_v44  ;;  %v512_v35 = vadd.f32 %v462_v11, %v410_v53  ;;  %v664_v24 = vmul.f32 %v4809_v47, %v6326_v17  ;;  %v666_v0 = vmul.f32 %v4809_v47, %v6327_v57  ;;  %2043 = vmatmul.mubr.f32.gmra.mrb[2].mxu0 %v1958_v36 }
 0x1e1   :  { %v2434_v25 = vadd.f32 %v4843_v50, %v2382_v22  ;;  %v2436_v52 = vadd.f32 %v4843_v50, %v2384_v12  ;;  %v2075_v59 = vmul.f32 %v4822_v14, %v6320_v34  ;;  %v612_v49 = vadd.f32 %v562_v29, %v510_v31  ;;  %v6329_v12 = vld [vmem:[#allocation95_spill] sm:$0xff]  ;;  %v6330_v29 = vld [vmem:[#allocation96_spill] sm:$0xff] }
 0x1e2   :  { %2805 = vmatprep.subr.bf16.mxu1 %v2804_v16  ;;  %v614_v1 = vadd.f32 %v564_v30, %v512_v35  ;;  %v2077_v46 = vmul.f32 %v4822_v14, %v6321_v51  ;;  %v2127_v41 = vmul.f32 %v4829_v39, %v6322_v13  ;;  %v2129_v63 = vmul.f32 %v4829_v39, %v6323_v19  ;;  %v6328_v19 = vld [vmem:[#allocation94_spill] sm:$0xff]  ;;  %v6331_v30 = vld [vmem:[#allocation97_spill] sm:$0xff] }
 0x1e3   :  { %v2484_v4 = vmax.f32 %v2434_v25, 0.0  ;;  %v2486_v55 = vmax.f32 %v2436_v52, 0.0  ;;  %v2229_v6 = vmul.f32 %v4837_v62, %v6324_v28  ;;  %v714_v10 = vadd.f32 %v664_v24, %v612_v49  ;;  %v6332_v24 = vld [vmem:[#allocation98_spill] sm:$0xff]  ;;  %v847_v52 = vld [vmem:[#allocation9 + $0x8] sm:$0xff]  ;;  %v6333_v49 = vld [vmem:[#allocation99_spill] sm:$0xff] }
 0x1e4   :  { %v716_v8 = vadd.f32 %v666_v0, %v614_v1  ;;  %v2177_v34 = vadd.f32 %v2127_v41, %v2075_v59  ;;  %v2231_v9 = vmul.f32 %v4837_v62, %v6325_v23  ;;  %v2179_v53 = vadd.f32 %v2129_v63, %v2077_v46  ;;  %2716 = vmatprep.mubr.msk.f32.mxu1 %vm1315_vm1, %v847_v52  ;;  %v6335_v63 = vld [vmem:[#allocation101_spill] sm:$0xff] }
 0x1e5   :  { %v2900_v51 = vpack.c.bf16 %v2486_v55, %v2484_v4  ;;  %v2331_v15 = vmul.f32 %v4840_v3, %v6326_v17  ;;  %v2333_v44 = vmul.f32 %v4840_v3, %v6327_v57  ;;  %v766_v61 = vadd.f32 %v4818_v40, %v714_v10  ;;  %v6334_v4 = vld [vmem:[#allocation100_spill] sm:$0xff] }
 0x1e6   :  { %v768_v13 = vadd.f32 %v4818_v40, %v716_v8  ;;  %v2279_v18 = vadd.f32 %v2229_v6, %v2177_v34  ;;  %v413_v11 = vmul.f32 %v4779_v45, %v6328_v19  ;;  %v2281_v22 = vadd.f32 %v2231_v9, %v2179_v53  ;;  %v2515_v34 = vld [vmem:[#allocation9 + $0x68] sm:$0xff] }
 0x1e7   :  { %2901 = vmatprep.subr.bf16.mxu0 %v2900_v51  ;;  %v415_v28 = vmul.f32 %v4779_v45, %v6329_v12  ;;  %v465_v23 = vmul.f32 %v4782_v56, %v6330_v29  ;;  %v467_v16 = vmul.f32 %v4782_v56, %v6331_v30  ;;  %v816_v31 = vmax.f32 %v766_v61, 0.0  ;;  %2734 = vmatprep.mubr.msk.f32.mxu0 %vm1315_vm1, %v2515_v34 }
 0x1e8   :  { %v818_v35 = vmax.f32 %v768_v13, 0.0  ;;  %v2381_v17 = vadd.f32 %v2331_v15, %v2279_v18  ;;  %v567_v25 = vmul.f32 %v4802_v32, %v6332_v24  ;;  %v2383_v57 = vadd.f32 %v2333_v44, %v2281_v22 }
 0x1e9   :  { %v515_v0 = vadd.f32 %v465_v23, %v413_v11  ;;  %v517_v59 = vadd.f32 %v467_v16, %v415_v28  ;;  %v569_v1 = vmul.f32 %v4802_v32, %v6333_v49  ;;  %v669_v55 = vmul.f32 %v4809_v47, %v6334_v4 }
 0x1ea   :  { %v2806_v46 = vpack.c.bf16 %v818_v35, %v816_v31  ;;  %v2433_v41 = vadd.f32 %v4843_v50, %v2381_v17  ;;  %v671_v6 = vmul.f32 %v4809_v47, %v6335_v63  ;;  %v2435_v37 = vadd.f32 %v4843_v50, %v2383_v57  ;;  %v6336_v35 = vld [vmem:[#allocation102_spill] sm:$0xff] }
 0x1eb   :  { %v617_v36 = vadd.f32 %v567_v25, %v515_v0  ;;  %v619_v10 = vadd.f32 %v569_v1, %v517_v59  ;;  %v2080_v8 = vmul.f32 %v4822_v14, %v6328_v19  ;;  %v2082_v51 = vmul.f32 %v4822_v14, %v6329_v12  ;;  %v6338_v0 = vld [vmem:[#allocation104_spill] sm:$0xff] }
 0x1ec   :  { %2807 = vmatpush1.bf16.msra.mxu1 %v2806_v46  ;;  %v2483_v9 = vmax.f32 %v2433_v41, 0.0  ;;  %v2132_v53 = vmul.f32 %v4829_v39, %v6330_v29  ;;  %v2134_v15 = vmul.f32 %v4829_v39, %v6331_v30  ;;  %v2485_v44 = vmax.f32 %v2435_v37, 0.0 }
 0x1ed   :  { %v719_v61 = vadd.f32 %v669_v55, %v617_v36  ;;  %v721_v13 = vadd.f32 %v671_v6, %v619_v10  ;;  %v2234_v18 = vmul.f32 %v4837_v62, %v6332_v24  ;;  %v2236_v22 = vmul.f32 %v4837_v62, %v6333_v49  ;;  %v6337_v24 = vld [vmem:[#allocation103_spill] sm:$0xff]  ;;  %v6339_v49 = vld [vmem:[#allocation105_spill] sm:$0xff] }
 0x1ee   :  { %v2182_v19 = vadd.f32 %v2132_v53, %v2080_v8  ;;  %v2184_v11 = vadd.f32 %v2134_v15, %v2082_v51  ;;  %v2336_v12 = vmul.f32 %v4840_v3, %v6334_v4  ;;  %v2902_v28 = vpack.c.bf16 %v2485_v44, %v2483_v9  ;;  %v6340_v4 = vld [vmem:[#allocation106_spill] sm:$0xff]  ;;  %v6342_v8 = vld [vmem:[#allocation108_spill] sm:$0xff]  ;;  %v6343_v53 = vld [vmem:[#allocation109_spill] sm:$0xff] }
 0x1ef   :  { %v771_v29 = vadd.f32 %v4818_v40, %v719_v61  ;;  %v773_v23 = vadd.f32 %v4818_v40, %v721_v13  ;;  %v2338_v30 = vmul.f32 %v4840_v3, %v6335_v63  ;;  %v412_v17 = vmul.f32 %v4779_v45, %v6336_v35  ;;  %v6341_v63 = vld [vmem:[#allocation107_spill] sm:$0xff] }
 0x1f0   :  { %v2284_v16 = vadd.f32 %v2234_v18, %v2182_v19  ;;  %v2286_v31 = vadd.f32 %v2236_v22, %v2184_v11  ;;  %v414_v25 = vmul.f32 %v4779_v45, %v6337_v24  ;;  %2903 = vmatpush1.bf16.msra.mxu0 %v2902_v28  ;;  %v464_v59 = vmul.f32 %v4782_v56, %v6338_v0 }
 0x1f1   :  { %v821_v52 = vmax.f32 %v771_v29, 0.0  ;;  %v823_v57 = vmax.f32 %v773_v23, 0.0  ;;  %v466_v1 = vmul.f32 %v4782_v56, %v6339_v49  ;;  %v566_v55 = vmul.f32 %v4802_v32, %v6340_v4 }
 0x1f2   :  { %v2386_v46 = vadd.f32 %v2336_v12, %v2284_v16  ;;  %v2388_v41 = vadd.f32 %v2338_v30, %v2286_v31  ;;  %v568_v6 = vmul.f32 %v4802_v32, %v6341_v63  ;;  %v514_v36 = vadd.f32 %v464_v59, %v412_v17 }
 0x1f3   :  { %v2808_v37 = vpack.c.bf16 %v823_v57, %v821_v52  ;;  %v516_v10 = vadd.f32 %v466_v1, %v414_v25  ;;  %v668_v34 = vmul.f32 %v4809_v47, %v6342_v8  ;;  %v670_v15 = vmul.f32 %v4809_v47, %v6343_v53  ;;  %v6345_v1 = vld [vmem:[#allocation111_spill] sm:$0xff] }
 0x1f4   :  { %v2438_v9 = vadd.f32 %v4843_v50, %v2386_v46  ;;  %v2440_v51 = vadd.f32 %v4843_v50, %v2388_v41  ;;  %v2079_v44 = vmul.f32 %v4822_v14, %v6336_v35  ;;  %v616_v61 = vadd.f32 %v566_v55, %v514_v36  ;;  %v6346_v41 = vld [vmem:[#allocation112_spill] sm:$0xff]  ;;  %v6347_v55 = vld [vmem:[#allocation113_spill] sm:$0xff] }
 0x1f5   :  { %2809 = vmatprep.subr.bf16.mxu1 %v2808_v37  ;;  %v618_v13 = vadd.f32 %v568_v6, %v516_v10  ;;  %v2081_v18 = vmul.f32 %v4822_v14, %v6337_v24  ;;  %v2131_v19 = vmul.f32 %v4829_v39, %v6338_v0  ;;  %v2133_v12 = vmul.f32 %v4829_v39, %v6339_v49  ;;  %v6344_v0 = vld [vmem:[#allocation110_spill] sm:$0xff] }
 0x1f6   :  { %v2488_v11 = vmax.f32 %v2438_v9, 0.0  ;;  %v2490_v22 = vmax.f32 %v2440_v51, 0.0  ;;  %v2233_v28 = vmul.f32 %v4837_v62, %v6340_v4  ;;  %v718_v29 = vadd.f32 %v668_v34, %v616_v61  ;;  %v6348_v10 = vld [vmem:[#allocation114_spill] sm:$0xff] }
 0x1f7   :  { %v720_v23 = vadd.f32 %v670_v15, %v618_v13  ;;  %v2181_v30 = vadd.f32 %v2131_v19, %v2079_v44  ;;  %v2235_v16 = vmul.f32 %v4837_v62, %v6341_v63  ;;  %v2183_v35 = vadd.f32 %v2133_v12, %v2081_v18  ;;  %v6350_v13 = vld [vmem:[#allocation116_spill] sm:$0xff]  ;;  %v6351_v19 = vld [vmem:[#allocation117_spill] sm:$0xff] }
 0x1f8   :  { %v2904_v31 = vpack.c.bf16 %v2490_v22, %v2488_v11  ;;  %v2335_v17 = vmul.f32 %v4840_v3, %v6342_v8  ;;  %v2337_v24 = vmul.f32 %v4840_v3, %v6343_v53  ;;  %v770_v25 = vadd.f32 %v4818_v40, %v718_v29  ;;  %v6349_v53 = vld [vmem:[#allocation115_spill] sm:$0xff] }
 0x1f9   :  { %v772_v52 = vadd.f32 %v4818_v40, %v720_v23  ;;  %v2283_v57 = vadd.f32 %v2233_v28, %v2181_v30  ;;  %v417_v59 = vmul.f32 %v4779_v45, %v6344_v0  ;;  %v2285_v49 = vadd.f32 %v2235_v16, %v2183_v35 }
 0x1fa   :  { %2905 = vmatprep.subr.bf16.mxu0 %v2904_v31  ;;  %v419_v46 = vmul.f32 %v4779_v45, %v6345_v1  ;;  %v469_v4 = vmul.f32 %v4782_v56, %v6346_v41  ;;  %v471_v63 = vmul.f32 %v4782_v56, %v6347_v55  ;;  %v820_v6 = vmax.f32 %v770_v25, 0.0 }
 0x1fb   :  { %v822_v37 = vmax.f32 %v772_v52, 0.0  ;;  %v2385_v36 = vadd.f32 %v2335_v17, %v2283_v57  ;;  %v571_v8 = vmul.f32 %v4802_v32, %v6348_v10  ;;  %v2387_v34 = vadd.f32 %v2337_v24, %v2285_v49 }
 0x1fc   :  { %v519_v9 = vadd.f32 %v469_v4, %v417_v59  ;;  %v521_v51 = vadd.f32 %v471_v63, %v419_v46  ;;  %v573_v15 = vmul.f32 %v4802_v32, %v6349_v53  ;;  %v673_v18 = vmul.f32 %v4809_v47, %v6350_v13  ;;  %v6352_v63 = vld [vmem:[#allocation118_spill] sm:$0xff] }
 0x1fd   :  { %v2810_v44 = vpack.c.bf16 %v822_v37, %v820_v6  ;;  %v2437_v61 = vadd.f32 %v4843_v50, %v2385_v36  ;;  %v675_v11 = vmul.f32 %v4809_v47, %v6351_v19  ;;  %v2439_v22 = vadd.f32 %v4843_v50, %v2387_v34  ;;  %v6353_v37 = vld [vmem:[#allocation119_spill] sm:$0xff]  ;;  %v6354_v34 = vld [vmem:[#allocation120_spill] sm:$0xff] }
 0x1fe   :  { %v621_v12 = vadd.f32 %v571_v8, %v519_v9  ;;  %v623_v28 = vadd.f32 %v573_v15, %v521_v51  ;;  %v2084_v29 = vmul.f32 %v4822_v14, %v6344_v0  ;;  %v2086_v30 = vmul.f32 %v4822_v14, %v6345_v1  ;;  %v6355_v51 = vld [vmem:[#allocation121_spill] sm:$0xff] }
 0x1ff   :  { %2811 = vmatpush1.bf16.msra.mxu1 %v2810_v44  ;;  %v2487_v23 = vmax.f32 %v2437_v61, 0.0  ;;  %v2136_v16 = vmul.f32 %v4829_v39, %v6346_v41  ;;  %v2138_v31 = vmul.f32 %v4829_v39, %v6347_v55  ;;  %v2489_v35 = vmax.f32 %v2439_v22, 0.0  ;;  %v6356_v61 = vld [vmem:[#allocation122_spill] sm:$0xff] }
 0x200   :  { %v723_v17 = vadd.f32 %v673_v18, %v621_v12  ;;  %v725_v24 = vadd.f32 %v675_v11, %v623_v28  ;;  %v2238_v25 = vmul.f32 %v4837_v62, %v6348_v10  ;;  %v2240_v0 = vmul.f32 %v4837_v62, %v6349_v53  ;;  %v6357_v18 = vld [vmem:[#allocation123_spill] sm:$0xff]  ;;  %v6358_v28 = vld [vmem:[#allocation124_spill] sm:$0xff] }
 0x201   :  { %v2186_v52 = vadd.f32 %v2136_v16, %v2084_v29  ;;  %v2188_v57 = vadd.f32 %v2138_v31, %v2086_v30  ;;  %v2340_v59 = vmul.f32 %v4840_v3, %v6350_v13  ;;  %v2906_v49 = vpack.c.bf16 %v2489_v35, %v2487_v23  ;;  %v6359_v16 = vld [vmem:[#allocation125_spill] sm:$0xff] }
 0x202   :  { %v775_v1 = vadd.f32 %v4818_v40, %v723_v17  ;;  %v777_v46 = vadd.f32 %v4818_v40, %v725_v24  ;;  %v2342_v41 = vmul.f32 %v4840_v3, %v6351_v19  ;;  %v416_v6 = vmul.f32 %v4779_v45, %v6352_v63 }
 0x203   :  { %v2288_v4 = vadd.f32 %v2238_v25, %v2186_v52  ;;  %v2290_v55 = vadd.f32 %v2240_v0, %v2188_v57  ;;  %v418_v36 = vmul.f32 %v4779_v45, %v6353_v37  ;;  %2907 = vmatpush1.bf16.msra.mxu0 %v2906_v49  ;;  %v468_v9 = vmul.f32 %v4782_v56, %v6354_v34 }
 0x204   :  { %v825_v10 = vmax.f32 %v775_v1, 0.0  ;;  %v827_v8 = vmax.f32 %v777_v46, 0.0  ;;  %v470_v53 = vmul.f32 %v4782_v56, %v6355_v51  ;;  %v570_v13 = vmul.f32 %v4802_v32, %v6356_v61 }
 0x205   :  { %v2390_v15 = vadd.f32 %v2340_v59, %v2288_v4  ;;  %v2392_v44 = vadd.f32 %v2342_v41, %v2290_v55  ;;  %v572_v19 = vmul.f32 %v4802_v32, %v6357_v18  ;;  %v518_v22 = vadd.f32 %v468_v9, %v416_v6 }
 0x206   :  { %v2812_v11 = vpack.c.bf16 %v827_v8, %v825_v10  ;;  %v520_v12 = vadd.f32 %v470_v53, %v418_v36  ;;  %v672_v29 = vmul.f32 %v4809_v47, %v6358_v28  ;;  %v674_v31 = vmul.f32 %v4809_v47, %v6359_v16  ;;  %v6361_v53 = vld [vmem:[#allocation127_spill] sm:$0xff] }
 0x207   :  { %v2442_v23 = vadd.f32 %v4843_v50, %v2390_v15  ;;  %v2444_v30 = vadd.f32 %v4843_v50, %v2392_v44  ;;  %v2083_v35 = vmul.f32 %v4822_v14, %v6352_v63  ;;  %v620_v17 = vadd.f32 %v570_v13, %v518_v22  ;;  %v6362_v44 = vld [vmem:[#allocation128_spill] sm:$0xff]  ;;  %v6363_v13 = vld [vmem:[#allocation129_spill] sm:$0xff] }
 0x208   :  { %2813 = vmatprep.subr.bf16.mxu1 %v2812_v11  ;;  %v622_v24 = vadd.f32 %v572_v19, %v520_v12  ;;  %v2085_v25 = vmul.f32 %v4822_v14, %v6353_v37  ;;  %v2135_v52 = vmul.f32 %v4829_v39, %v6354_v34  ;;  %v2137_v59 = vmul.f32 %v4829_v39, %v6355_v51  ;;  %v6360_v34 = vld [vmem:[#allocation126_spill] sm:$0xff] }
 0x209   :  { %v2492_v57 = vmax.f32 %v2442_v23, 0.0  ;;  %v2494_v0 = vmax.f32 %v2444_v30, 0.0  ;;  %v2237_v49 = vmul.f32 %v4837_v62, %v6356_v61  ;;  %v722_v1 = vadd.f32 %v672_v29, %v620_v17  ;;  %v6364_v12 = vld [vmem:[#allocation130_spill] sm:$0xff] }
 0x20a   :  { %v724_v46 = vadd.f32 %v674_v31, %v622_v24  ;;  %v2185_v41 = vadd.f32 %v2135_v52, %v2083_v35  ;;  %v2239_v4 = vmul.f32 %v4837_v62, %v6357_v18  ;;  %v2187_v63 = vadd.f32 %v2137_v59, %v2085_v25  ;;  %v6366_v24 = vld [vmem:[#allocation132_spill] sm:$0xff]  ;;  %v6367_v52 = vld [vmem:[#allocation133_spill] sm:$0xff] }
 0x20b   :  { %v2908_v55 = vpack.c.bf16 %v2494_v0, %v2492_v57  ;;  %v2339_v6 = vmul.f32 %v4840_v3, %v6358_v28  ;;  %v2341_v37 = vmul.f32 %v4840_v3, %v6359_v16  ;;  %v774_v36 = vadd.f32 %v4818_v40, %v722_v1  ;;  %v6365_v16 = vld [vmem:[#allocation131_spill] sm:$0xff] }
 0x20c   :  { %v776_v10 = vadd.f32 %v4818_v40, %v724_v46  ;;  %v2287_v8 = vadd.f32 %v2237_v49, %v2185_v41  ;;  %v421_v9 = vmul.f32 %v4779_v45, %v6360_v34  ;;  %v2289_v51 = vadd.f32 %v2239_v4, %v2187_v63 }
 0x20d   :  { %2909 = vmatprep.subr.bf16.mxu0 %v2908_v55  ;;  %v423_v15 = vmul.f32 %v4779_v45, %v6361_v53  ;;  %v473_v61 = vmul.f32 %v4782_v56, %v6362_v44  ;;  %v475_v18 = vmul.f32 %v4782_v56, %v6363_v13  ;;  %v824_v19 = vmax.f32 %v774_v36, 0.0 }
 0x20e   :  { %v826_v11 = vmax.f32 %v776_v10, 0.0  ;;  %v2389_v22 = vadd.f32 %v2339_v6, %v2287_v8  ;;  %v575_v28 = vmul.f32 %v4802_v32, %v6364_v12  ;;  %v2391_v29 = vadd.f32 %v2341_v37, %v2289_v51 }
 0x20f   :  { %v523_v23 = vadd.f32 %v473_v61, %v421_v9  ;;  %v525_v30 = vadd.f32 %v475_v18, %v423_v15  ;;  %v577_v31 = vmul.f32 %v4802_v32, %v6365_v16  ;;  %v677_v25 = vmul.f32 %v4809_v47, %v6366_v24  ;;  %v6368_v18 = vld [vmem:[#allocation134_spill] sm:$0xff] }
 0x210   :  { %v2814_v35 = vpack.c.bf16 %v826_v11, %v824_v19  ;;  %v2441_v17 = vadd.f32 %v4843_v50, %v2389_v22  ;;  %v679_v57 = vmul.f32 %v4809_v47, %v6367_v52  ;;  %v2443_v0 = vadd.f32 %v4843_v50, %v2391_v29  ;;  %v6369_v11 = vld [vmem:[#allocation135_spill] sm:$0xff]  ;;  %v6370_v29 = vld [vmem:[#allocation136_spill] sm:$0xff] }
 0x211   :  { %v625_v59 = vadd.f32 %v575_v28, %v523_v23  ;;  %v627_v49 = vadd.f32 %v577_v31, %v525_v30  ;;  %v2088_v1 = vmul.f32 %v4822_v14, %v6360_v34  ;;  %v2090_v41 = vmul.f32 %v4822_v14, %v6361_v53  ;;  %v6371_v30 = vld [vmem:[#allocation137_spill] sm:$0xff] }
 0x212   :  { %2815 = vmatpush1.bf16.msra.mxu1 %v2814_v35  ;;  %v2491_v46 = vmax.f32 %v2441_v17, 0.0  ;;  %v2140_v4 = vmul.f32 %v4829_v39, %v6362_v44  ;;  %v2142_v55 = vmul.f32 %v4829_v39, %v6363_v13  ;;  %v2493_v63 = vmax.f32 %v2443_v0, 0.0  ;;  %v6372_v17 = vld [vmem:[#allocation138_spill] sm:$0xff] }
 0x213   :  { %v727_v6 = vadd.f32 %v677_v25, %v625_v59  ;;  %v729_v37 = vadd.f32 %v679_v57, %v627_v49  ;;  %v2242_v36 = vmul.f32 %v4837_v62, %v6364_v12  ;;  %v2244_v34 = vmul.f32 %v4837_v62, %v6365_v16  ;;  %v6373_v25 = vld [vmem:[#allocation139_spill] sm:$0xff]  ;;  %v6374_v49 = vld [vmem:[#allocation140_spill] sm:$0xff] }
 0x214   :  { %v2190_v10 = vadd.f32 %v2140_v4, %v2088_v1  ;;  %v2192_v8 = vadd.f32 %v2142_v55, %v2090_v41  ;;  %v2344_v9 = vmul.f32 %v4840_v3, %v6366_v24  ;;  %v2910_v51 = vpack.c.bf16 %v2493_v63, %v2491_v46  ;;  %v6375_v4 = vld [vmem:[#allocation141_spill] sm:$0xff] }
 0x215   :  { %v779_v53 = vadd.f32 %v4818_v40, %v727_v6  ;;  %v781_v15 = vadd.f32 %v4818_v40, %v729_v37  ;;  %v2346_v44 = vmul.f32 %v4840_v3, %v6367_v52  ;;  %v420_v19 = vmul.f32 %v4779_v45, %v6368_v18 }
 0x216   :  { %v2292_v61 = vadd.f32 %v2242_v36, %v2190_v10  ;;  %v2294_v13 = vadd.f32 %v2244_v34, %v2192_v8  ;;  %v422_v22 = vmul.f32 %v4779_v45, %v6369_v11  ;;  %2911 = vmatpush1.bf16.msra.mxu0 %v2910_v51  ;;  %v472_v23 = vmul.f32 %v4782_v56, %v6370_v29 }
 0x217   :  { %v829_v12 = vmax.f32 %v779_v53, 0.0  ;;  %v831_v28 = vmax.f32 %v781_v15, 0.0  ;;  %v474_v16 = vmul.f32 %v4782_v56, %v6371_v30  ;;  %v574_v24 = vmul.f32 %v4802_v32, %v6372_v17 }
 0x218   :  { %v2394_v31 = vadd.f32 %v2344_v9, %v2292_v61  ;;  %v2396_v35 = vadd.f32 %v2346_v44, %v2294_v13  ;;  %v576_v52 = vmul.f32 %v4802_v32, %v6373_v25  ;;  %v522_v0 = vadd.f32 %v472_v23, %v420_v19 }
 0x219   :  { %v2816_v57 = vpack.c.bf16 %v831_v28, %v829_v12  ;;  %v524_v59 = vadd.f32 %v474_v16, %v422_v22  ;;  %v676_v1 = vmul.f32 %v4809_v47, %v6374_v49  ;;  %v678_v55 = vmul.f32 %v4809_v47, %v6375_v4  ;;  %v6377_v16 = vld [vmem:[#allocation143_spill] sm:$0xff] }
 0x21a   :  { %v2446_v46 = vadd.f32 %v4843_v50, %v2394_v31  ;;  %v2448_v41 = vadd.f32 %v4843_v50, %v2396_v35  ;;  %v2087_v63 = vmul.f32 %v4822_v14, %v6368_v18  ;;  %v624_v6 = vadd.f32 %v574_v24, %v522_v0  ;;  %v6378_v35 = vld [vmem:[#allocation144_spill] sm:$0xff]  ;;  %v6379_v24 = vld [vmem:[#allocation145_spill] sm:$0xff] }
 0x21b   :  { %2817 = vmatprep.subr.bf16.mxu1 %v2816_v57  ;;  %v626_v37 = vadd.f32 %v576_v52, %v524_v59  ;;  %v2089_v36 = vmul.f32 %v4822_v14, %v6369_v11  ;;  %v2139_v10 = vmul.f32 %v4829_v39, %v6370_v29  ;;  %v2141_v9 = vmul.f32 %v4829_v39, %v6371_v30  ;;  %v6376_v29 = vld [vmem:[#allocation142_spill] sm:$0xff] }
 0x21c   :  { %v2496_v8 = vmax.f32 %v2446_v46, 0.0  ;;  %v2498_v34 = vmax.f32 %v2448_v41, 0.0  ;;  %v2241_v51 = vmul.f32 %v4837_v62, %v6372_v17  ;;  %v726_v53 = vadd.f32 %v676_v1, %v624_v6  ;;  %v6380_v59 = vld [vmem:[#allocation146_spill] sm:$0xff] }
 0x21d   :  { %v728_v15 = vadd.f32 %v678_v55, %v626_v37  ;;  %v2189_v44 = vadd.f32 %v2139_v10, %v2087_v63  ;;  %v2243_v61 = vmul.f32 %v4837_v62, %v6373_v25  ;;  %v2191_v18 = vadd.f32 %v2141_v9, %v2089_v36  ;;  %v6382_v37 = vld [vmem:[#allocation148_spill] sm:$0xff]  ;;  %v6383_v10 = vld [vmem:[#allocation149_spill] sm:$0xff] }
 0x21e   :  { %v2912_v13 = vpack.c.bf16 %v2498_v34, %v2496_v8  ;;  %v2343_v19 = vmul.f32 %v4840_v3, %v6374_v49  ;;  %v2345_v11 = vmul.f32 %v4840_v3, %v6375_v4  ;;  %v778_v22 = vadd.f32 %v4818_v40, %v726_v53  ;;  %v6381_v4 = vld [vmem:[#allocation147_spill] sm:$0xff] }
 0x21f   :  { %v780_v12 = vadd.f32 %v4818_v40, %v728_v15  ;;  %v2291_v28 = vadd.f32 %v2241_v51, %v2189_v44  ;;  %v425_v23 = vmul.f32 %v4779_v45, %v6376_v29  ;;  %v2293_v30 = vadd.f32 %v2243_v61, %v2191_v18 }
 0x220   :  { %2913 = vmatprep.subr.bf16.mxu0 %v2912_v13  ;;  %v427_v31 = vmul.f32 %v4779_v45, %v6377_v16  ;;  %v477_v17 = vmul.f32 %v4782_v56, %v6378_v35  ;;  %v479_v25 = vmul.f32 %v4782_v56, %v6379_v24  ;;  %v828_v52 = vmax.f32 %v778_v22, 0.0 }
 0x221   :  { %v830_v57 = vmax.f32 %v780_v12, 0.0  ;;  %v2393_v0 = vadd.f32 %v2343_v19, %v2291_v28  ;;  %v579_v49 = vmul.f32 %v4802_v32, %v6380_v59  ;;  %v2395_v1 = vadd.f32 %v2345_v11, %v2293_v30 }
 0x222   :  { %v527_v46 = vadd.f32 %v477_v17, %v425_v23  ;;  %v529_v41 = vadd.f32 %v479_v25, %v427_v31  ;;  %v581_v55 = vmul.f32 %v4802_v32, %v6381_v4  ;;  %v681_v36 = vmul.f32 %v4809_v47, %v6382_v37  ;;  %v6384_v25 = vld [vmem:[#allocation150_spill] sm:$0xff] }
 0x223   :  { %v2818_v63 = vpack.c.bf16 %v830_v57, %v828_v52  ;;  %v2445_v6 = vadd.f32 %v4843_v50, %v2393_v0  ;;  %v683_v8 = vmul.f32 %v4809_v47, %v6383_v10  ;;  %v2447_v34 = vadd.f32 %v4843_v50, %v2395_v1  ;;  %v6385_v57 = vld [vmem:[#allocation151_spill] sm:$0xff]  ;;  %v6386_v1 = vld [vmem:[#allocation152_spill] sm:$0xff] }
 0x224   :  { %v629_v9 = vadd.f32 %v579_v49, %v527_v46  ;;  %v631_v51 = vadd.f32 %v581_v55, %v529_v41  ;;  %v2092_v53 = vmul.f32 %v4822_v14, %v6376_v29  ;;  %v2094_v44 = vmul.f32 %v4822_v14, %v6377_v16  ;;  %v6387_v41 = vld [vmem:[#allocation153_spill] sm:$0xff] }
 0x225   :  { %2819 = vmatpush1.bf16.msra.mxu1 %v2818_v63  ;;  %v2495_v15 = vmax.f32 %v2445_v6, 0.0  ;;  %v2144_v61 = vmul.f32 %v4829_v39, %v6378_v35  ;;  %v2146_v13 = vmul.f32 %v4829_v39, %v6379_v24  ;;  %v2497_v18 = vmax.f32 %v2447_v34, 0.0  ;;  %v6388_v6 = vld [vmem:[#allocation154_spill] sm:$0xff] }
 0x226   :  { %v731_v19 = vadd.f32 %v681_v36, %v629_v9  ;;  %v733_v11 = vadd.f32 %v683_v8, %v631_v51  ;;  %v2246_v22 = vmul.f32 %v4837_v62, %v6380_v59  ;;  %v2248_v29 = vmul.f32 %v4837_v62, %v6381_v4  ;;  %v6389_v36 = vld [vmem:[#allocation155_spill] sm:$0xff]  ;;  %v6390_v51 = vld [vmem:[#allocation156_spill] sm:$0xff] }
 0x227   :  { %v2194_v12 = vadd.f32 %v2144_v61, %v2092_v53  ;;  %v2196_v28 = vadd.f32 %v2146_v13, %v2094_v44  ;;  %v2348_v23 = vmul.f32 %v4840_v3, %v6382_v37  ;;  %v2914_v30 = vpack.c.bf16 %v2497_v18, %v2495_v15  ;;  %v6391_v61 = vld [vmem:[#allocation157_spill] sm:$0xff] }
 0x228   :  { %v783_v16 = vadd.f32 %v4818_v40, %v731_v19  ;;  %v785_v31 = vadd.f32 %v4818_v40, %v733_v11  ;;  %v2350_v35 = vmul.f32 %v4840_v3, %v6383_v10  ;;  %v424_v52 = vmul.f32 %v4779_v45, %v6384_v25 }
 0x229   :  { %v2296_v17 = vadd.f32 %v2246_v22, %v2194_v12  ;;  %v2298_v24 = vadd.f32 %v2248_v29, %v2196_v28  ;;  %v426_v0 = vmul.f32 %v4779_v45, %v6385_v57  ;;  %2915 = vmatpush1.bf16.msra.mxu0 %v2914_v30  ;;  %v476_v46 = vmul.f32 %v4782_v56, %v6386_v1 }
 0x22a   :  { %v833_v59 = vmax.f32 %v783_v16, 0.0  ;;  %v835_v49 = vmax.f32 %v785_v31, 0.0  ;;  %v478_v4 = vmul.f32 %v4782_v56, %v6387_v41  ;;  %v578_v37 = vmul.f32 %v4802_v32, %v6388_v6 }
 0x22b   :  { %v2398_v55 = vadd.f32 %v2348_v23, %v2296_v17  ;;  %v2400_v63 = vadd.f32 %v2350_v35, %v2298_v24  ;;  %v580_v10 = vmul.f32 %v4802_v32, %v6389_v36  ;;  %v526_v34 = vadd.f32 %v476_v46, %v424_v52 }
 0x22c   :  { %v2820_v8 = vpack.c.bf16 %v835_v49, %v833_v59  ;;  %v528_v9 = vadd.f32 %v478_v4, %v426_v0  ;;  %v680_v53 = vmul.f32 %v4809_v47, %v6390_v51  ;;  %v682_v13 = vmul.f32 %v4809_v47, %v6391_v61  ;;  %v6393_v4 = vld [vmem:[#allocation159_spill] sm:$0xff] }
 0x22d   :  { %v2450_v15 = vadd.f32 %v4843_v50, %v2398_v55  ;;  %v2452_v44 = vadd.f32 %v4843_v50, %v2400_v63  ;;  %v2091_v18 = vmul.f32 %v4822_v14, %v6384_v25  ;;  %v628_v19 = vadd.f32 %v578_v37, %v526_v34  ;;  %v6394_v63 = vld [vmem:[#allocation160_spill] sm:$0xff]  ;;  %v6395_v37 = vld [vmem:[#allocation161_spill] sm:$0xff] }
 0x22e   :  { %2821 = vmatprep.subr.bf16.mxu1 %v2820_v8  ;;  %v630_v11 = vadd.f32 %v580_v10, %v528_v9  ;;  %v2093_v22 = vmul.f32 %v4822_v14, %v6385_v57  ;;  %v2143_v12 = vmul.f32 %v4829_v39, %v6386_v1  ;;  %v2145_v23 = vmul.f32 %v4829_v39, %v6387_v41  ;;  %v6392_v1 = vld [vmem:[#allocation158_spill] sm:$0xff] }
 0x22f   :  { %v2500_v28 = vmax.f32 %v2450_v15, 0.0  ;;  %v2502_v29 = vmax.f32 %v2452_v44, 0.0  ;;  %v2245_v30 = vmul.f32 %v4837_v62, %v6388_v6  ;;  %v730_v16 = vadd.f32 %v680_v53, %v628_v19  ;;  %v6396_v9 = vld [vmem:[#allocation162_spill] sm:$0xff] }
 0x230   :  { %v732_v31 = vadd.f32 %v682_v13, %v630_v11  ;;  %v2193_v35 = vadd.f32 %v2143_v12, %v2091_v18  ;;  %v2247_v17 = vmul.f32 %v4837_v62, %v6389_v36  ;;  %v2195_v25 = vadd.f32 %v2145_v23, %v2093_v22  ;;  %v6398_v11 = vld [vmem:[#allocation164_spill] sm:$0xff]  ;;  %v6399_v12 = vld [vmem:[#allocation165_spill] sm:$0xff] }
 0x231   :  { %v2916_v24 = vpack.c.bf16 %v2502_v29, %v2500_v28  ;;  %v2347_v52 = vmul.f32 %v4840_v3, %v6390_v51  ;;  %v2349_v57 = vmul.f32 %v4840_v3, %v6391_v61  ;;  %v782_v0 = vadd.f32 %v4818_v40, %v730_v16  ;;  %v6397_v61 = vld [vmem:[#allocation163_spill] sm:$0xff] }
 0x232   :  { %v784_v59 = vadd.f32 %v4818_v40, %v732_v31  ;;  %v2295_v49 = vadd.f32 %v2245_v30, %v2193_v35  ;;  %v429_v46 = vmul.f32 %v4779_v45, %v6392_v1  ;;  %v2297_v41 = vadd.f32 %v2247_v17, %v2195_v25 }
 0x233   :  { %2917 = vmatprep.subr.bf16.mxu0 %v2916_v24  ;;  %v431_v55 = vmul.f32 %v4779_v45, %v6393_v4  ;;  %v481_v6 = vmul.f32 %v4782_v56, %v6394_v63  ;;  %v483_v36 = vmul.f32 %v4782_v56, %v6395_v37  ;;  %v832_v10 = vmax.f32 %v782_v0, 0.0 }
 0x234   :  { %v834_v8 = vmax.f32 %v784_v59, 0.0  ;;  %v2397_v34 = vadd.f32 %v2347_v52, %v2295_v49  ;;  %v583_v51 = vmul.f32 %v4802_v32, %v6396_v9  ;;  %v2399_v53 = vadd.f32 %v2349_v57, %v2297_v41 }
 0x235   :  { %v531_v15 = vadd.f32 %v481_v6, %v429_v46  ;;  %v533_v44 = vadd.f32 %v483_v36, %v431_v55  ;;  %v585_v13 = vmul.f32 %v4802_v32, %v6397_v61  ;;  %v685_v22 = vmul.f32 %v4809_v47, %v6398_v11  ;;  %v6400_v36 = vld [vmem:[#allocation166_spill] sm:$0xff] }
 0x236   :  { %v2822_v18 = vpack.c.bf16 %v834_v8, %v832_v10  ;;  %v2449_v19 = vadd.f32 %v4843_v50, %v2397_v34  ;;  %v687_v28 = vmul.f32 %v4809_v47, %v6399_v12  ;;  %v2451_v29 = vadd.f32 %v4843_v50, %v2399_v53  ;;  %v6401_v8 = vld [vmem:[#allocation167_spill] sm:$0xff]  ;;  %v6402_v53 = vld [vmem:[#allocation168_spill] sm:$0xff] }
 0x237   :  { %v633_v23 = vadd.f32 %v583_v51, %v531_v15  ;;  %v635_v30 = vadd.f32 %v585_v13, %v533_v44  ;;  %v2096_v16 = vmul.f32 %v4822_v14, %v6392_v1  ;;  %v2098_v35 = vmul.f32 %v4822_v14, %v6393_v4  ;;  %v6403_v44 = vld [vmem:[#allocation169_spill] sm:$0xff] }
 0x238   :  { %2823 = vmatpush1.bf16.msra.mxu1 %v2822_v18  ;;  %v2499_v31 = vmax.f32 %v2449_v19, 0.0  ;;  %v2148_v17 = vmul.f32 %v4829_v39, %v6394_v63  ;;  %v2150_v24 = vmul.f32 %v4829_v39, %v6395_v37  ;;  %v2501_v25 = vmax.f32 %v2451_v29, 0.0  ;;  %v6404_v19 = vld [vmem:[#allocation170_spill] sm:$0xff] }
 0x239   :  { %v735_v52 = vadd.f32 %v685_v22, %v633_v23  ;;  %v737_v57 = vadd.f32 %v687_v28, %v635_v30  ;;  %v2250_v0 = vmul.f32 %v4837_v62, %v6396_v9  ;;  %v2252_v1 = vmul.f32 %v4837_v62, %v6397_v61  ;;  %v6405_v22 = vld [vmem:[#allocation171_spill] sm:$0xff]  ;;  %v6406_v30 = vld [vmem:[#allocation172_spill] sm:$0xff] }
 0x23a   :  { %v2198_v59 = vadd.f32 %v2148_v17, %v2096_v16  ;;  %v2200_v49 = vadd.f32 %v2150_v24, %v2098_v35  ;;  %v2352_v46 = vmul.f32 %v4840_v3, %v6398_v11  ;;  %v2918_v41 = vpack.c.bf16 %v2501_v25, %v2499_v31  ;;  %v6407_v17 = vld [vmem:[#allocation173_spill] sm:$0xff] }
 0x23b   :  { %v787_v4 = vadd.f32 %v4818_v40, %v735_v52  ;;  %v789_v55 = vadd.f32 %v4818_v40, %v737_v57  ;;  %v2354_v63 = vmul.f32 %v4840_v3, %v6399_v12  ;;  %v428_v10 = vmul.f32 %v4779_v45, %v6400_v36 }
 0x23c   :  { %v2300_v6 = vadd.f32 %v2250_v0, %v2198_v59  ;;  %v2302_v37 = vadd.f32 %v2252_v1, %v2200_v49  ;;  %v430_v34 = vmul.f32 %v4779_v45, %v6401_v8  ;;  %2919 = vmatpush1.bf16.msra.mxu0 %v2918_v41  ;;  %v480_v15 = vmul.f32 %v4782_v56, %v6402_v53 }
 0x23d   :  { %v837_v9 = vmax.f32 %v787_v4, 0.0  ;;  %v839_v51 = vmax.f32 %v789_v55, 0.0  ;;  %v482_v61 = vmul.f32 %v4782_v56, %v6403_v44  ;;  %v582_v11 = vmul.f32 %v4802_v32, %v6404_v19 }
 0x23e   :  { %v2402_v13 = vadd.f32 %v2352_v46, %v2300_v6  ;;  %v2404_v18 = vadd.f32 %v2354_v63, %v2302_v37  ;;  %v584_v12 = vmul.f32 %v4802_v32, %v6405_v22  ;;  %v530_v29 = vadd.f32 %v480_v15, %v428_v10 }
 0x23f   :  { %v2824_v28 = vpack.c.bf16 %v839_v51, %v837_v9  ;;  %v532_v23 = vadd.f32 %v482_v61, %v430_v34  ;;  %v684_v16 = vmul.f32 %v4809_v47, %v6406_v30  ;;  %v686_v24 = vmul.f32 %v4809_v47, %v6407_v17  ;;  %v6409_v61 = vld [vmem:[#allocation175_spill] sm:$0xff] }
 0x240   :  { %v2454_v31 = vadd.f32 %v4843_v50, %v2402_v13  ;;  %v2456_v35 = vadd.f32 %v4843_v50, %v2404_v18  ;;  %v2095_v25 = vmul.f32 %v4822_v14, %v6400_v36  ;;  %v632_v52 = vadd.f32 %v582_v11, %v530_v29  ;;  %v6410_v18 = vld [vmem:[#allocation176_spill] sm:$0xff] }
 0x241   :  { %2825 = vmatprep.subr.bf16.mxu1 %v2824_v28  ;;  %v634_v57 = vadd.f32 %v584_v12, %v532_v23  ;;  %v2097_v0 = vmul.f32 %v4822_v14, %v6401_v8  ;;  %v2147_v59 = vmul.f32 %v4829_v39, %v6402_v53  ;;  %v2149_v46 = vmul.f32 %v4829_v39, %v6403_v44  ;;  %v6408_v53 = vld [vmem:[#allocation174_spill] sm:$0xff] }
 0x242   :  { %v2504_v49 = vmax.f32 %v2454_v31, 0.0  ;;  %v2506_v1 = vmax.f32 %v2456_v35, 0.0  ;;  %v2249_v41 = vmul.f32 %v4837_v62, %v6404_v19  ;;  %v734_v4 = vadd.f32 %v684_v16, %v632_v52 }
 0x243   :  { %v736_v55 = vadd.f32 %v686_v24, %v634_v57  ;;  %v2197_v63 = vadd.f32 %v2147_v59, %v2095_v25  ;;  %v2251_v6 = vmul.f32 %v4837_v62, %v6405_v22  ;;  %v2199_v36 = vadd.f32 %v2149_v46, %v2097_v0 }
 0x244   :  { %v2920_v37 = vpack.c.bf16 %v2506_v1, %v2504_v49  ;;  %v2351_v10 = vmul.f32 %v4840_v3, %v6406_v30  ;;  %v2353_v8 = vmul.f32 %v4840_v3, %v6407_v17  ;;  %v786_v34 = vadd.f32 %v4818_v40, %v734_v4 }
 0x245   :  { %v788_v9 = vadd.f32 %v4818_v40, %v736_v55  ;;  %v2299_v51 = vadd.f32 %v2249_v41, %v2197_v63  ;;  %v433_v15 = vmul.f32 %v4779_v45, %v6408_v53  ;;  %v2301_v44 = vadd.f32 %v2251_v6, %v2199_v36 }
 0x246   :  { %2921 = vmatprep.subr.bf16.mxu0 %v2920_v37  ;;  %v435_v13 = vmul.f32 %v4779_v45, %v6409_v61  ;;  %v485_v19 = vmul.f32 %v4782_v56, %v6410_v18  ;;  %v487_v11 = vmul.f32 %v4782_v56, %v4608_v5  ;;  %v836_v22 = vmax.f32 %v786_v34, 0.0 }
 0x247   :  { %v838_v12 = vmax.f32 %v788_v9, 0.0  ;;  %v2401_v28 = vadd.f32 %v2351_v10, %v2299_v51  ;;  %v587_v29 = vmul.f32 %v4802_v32, %v4610_v7  ;;  %v2403_v23 = vadd.f32 %v2353_v8, %v2301_v44  ;;  %v6411_v44 = vld [vmem:[#allocation177_spill] sm:$0xff] }
 0x248   :  { %v535_v30 = vadd.f32 %v485_v19, %v433_v15  ;;  %v537_v16 = vadd.f32 %v487_v11, %v435_v13  ;;  %v589_v31 = vmul.f32 %v4802_v32, %v4612_v33  ;;  %v689_v24 = vmul.f32 %v4809_v47, %v4615_v43  ;;  %v6413_v19 = vld [vmem:[#allocation179_spill] sm:$0xff] }
 0x249   :  { %v2826_v35 = vpack.c.bf16 %v838_v12, %v836_v22  ;;  %v2453_v17 = vadd.f32 %v4843_v50, %v2401_v28  ;;  %v691_v25 = vmul.f32 %v4809_v47, %v4617_v48  ;;  %v2455_v52 = vadd.f32 %v4843_v50, %v2403_v23 }
 0x24a   :  { %v637_v57 = vadd.f32 %v587_v29, %v535_v30  ;;  %v639_v0 = vadd.f32 %v589_v31, %v537_v16  ;;  %v2100_v59 = vmul.f32 %v4822_v14, %v6408_v53  ;;  %v2102_v1 = vmul.f32 %v4822_v14, %v6409_v61  ;;  %v6415_v29 = vld [vmem:[#allocation181_spill] sm:$0xff] }
 0x24b   :  { %2827 = vmatpush1.bf16.msra.mxu1 %v2826_v35  ;;  %v2503_v49 = vmax.f32 %v2453_v17, 0.0  ;;  %v2152_v46 = vmul.f32 %v4829_v39, %v6410_v18  ;;  %v2154_v41 = vmul.f32 %v4829_v39, %v4608_v5  ;;  %v2505_v4 = vmax.f32 %v2455_v52, 0.0  ;;  %v6416_v35 = vld [vmem:[#allocation182_spill] sm:$0xff] }
 0x24c   :  { %v739_v55 = vadd.f32 %v689_v24, %v637_v57  ;;  %v741_v63 = vadd.f32 %v691_v25, %v639_v0  ;;  %v2254_v6 = vmul.f32 %v4837_v62, %v4610_v7  ;;  %v2256_v10 = vmul.f32 %v4837_v62, %v4612_v33 }
 0x24d   :  { %v2202_v37 = vadd.f32 %v2152_v46, %v2100_v59  ;;  %v2204_v36 = vadd.f32 %v2154_v41, %v2102_v1  ;;  %v2356_v8 = vmul.f32 %v4840_v3, %v4615_v43  ;;  %v2922_v34 = vpack.c.bf16 %v2505_v4, %v2503_v49  ;;  %v6412_v43 = vld [vmem:[#allocation178_spill] sm:$0xff] }
 0x24e   :  { %v791_v9 = vadd.f32 %v4818_v40, %v739_v55  ;;  %v793_v51 = vadd.f32 %v4818_v40, %v741_v63  ;;  %v2358_v5 = vmul.f32 %v4840_v3, %v4617_v48  ;;  %v432_v7 = vmul.f32 %v4779_v45, %v4654_v54  ;;  %v6414_v48 = vld [vmem:[#allocation180_spill] sm:$0xff] }
 0x24f   :  { %v2304_v53 = vadd.f32 %v2254_v6, %v2202_v37  ;;  %v2306_v15 = vadd.f32 %v2256_v10, %v2204_v36  ;;  %v434_v61 = vmul.f32 %v4779_v45, %v6411_v44  ;;  %2923 = vmatpush1.bf16.msra.mxu0 %v2922_v34  ;;  %v484_v18 = vmul.f32 %v4782_v56, %v6412_v43 }
 0x250   :  { %v841_v33 = vmax.f32 %v791_v9, 0.0  ;;  %v843_v13 = vmax.f32 %v793_v51, 0.0  ;;  %v486_v11 = vmul.f32 %v4782_v56, %v6413_v19  ;;  %v586_v28 = vmul.f32 %v4802_v32, %v6414_v48 }
 0x251   :  { %v2406_v22 = vadd.f32 %v2356_v8, %v2304_v53  ;;  %v2408_v12 = vadd.f32 %v2358_v5, %v2306_v15  ;;  %v588_v23 = vmul.f32 %v4802_v32, %v6415_v29  ;;  %v534_v16 = vadd.f32 %v484_v18, %v432_v7 }
 0x252   :  { %v2828_v30 = vpack.c.bf16 %v843_v13, %v841_v33  ;;  %v536_v31 = vadd.f32 %v486_v11, %v434_v61  ;;  %v688_v17 = vmul.f32 %v4809_v47, %v6416_v35  ;;  %v690_v52 = vmul.f32 %v4809_v47, %v4674_v38 }
 0x253   :  { %v2458_v24 = vadd.f32 %v4843_v50, %v2406_v22  ;;  %v2460_v25 = vadd.f32 %v4843_v50, %v2408_v12  ;;  %v2099_v57 = vmul.f32 %v4822_v14, %v4654_v54  ;;  %v636_v0 = vadd.f32 %v586_v28, %v534_v16 }
 0x254   :  { %2829 = vmatprep.subr.bf16.mxu1 %v2828_v30  ;;  %v638_v59 = vadd.f32 %v588_v23, %v536_v31  ;;  %v2101_v49 = vmul.f32 %v4822_v14, %v6411_v44  ;;  %v2151_v1 = vmul.f32 %v4829_v39, %v6412_v43  ;;  %v2153_v4 = vmul.f32 %v4829_v39, %v6413_v19 }
 0x255   :  { %v2508_v46 = vmax.f32 %v2458_v24, 0.0  ;;  %v2510_v41 = vmax.f32 %v2460_v25, 0.0  ;;  %v2253_v55 = vmul.f32 %v4837_v62, %v6414_v48  ;;  %v738_v63 = vadd.f32 %v688_v17, %v636_v0  ;;  %v2612_v25 = vld [vmem:[#allocation11 + $0x8] sm:$0x3] }
 0x256   :  { %v740_v6 = vadd.f32 %v690_v52, %v638_v59  ;;  %v2201_v54 = vadd.f32 %v2151_v1, %v2099_v57  ;;  %v2255_v37 = vmul.f32 %v4837_v62, %v6415_v29  ;;  %v2203_v10 = vadd.f32 %v2153_v4, %v2101_v49 }
 0x257   :  { %v2924_v36 = vpack.c.bf16 %v2510_v41, %v2508_v46  ;;  %v2355_v8 = vmul.f32 %v4840_v3, %v6416_v35  ;;  %v2357_v34 = vmul.f32 %v4840_v3, %v4674_v38  ;;  %v790_v9 = vadd.f32 %v4818_v40, %v738_v63 }
 0x258   :  { %v792_v51 = vadd.f32 %v4818_v40, %v740_v6  ;;  %v2303_v5 = vadd.f32 %v2253_v55, %v2201_v54  ;;  %v437_v53 = vmul.f32 %v4779_v45, %v4710_v26  ;;  %v2305_v15 = vadd.f32 %v2255_v37, %v2203_v10  ;;  %v846_v55 = vld [vmem:[#allocation9] sm:$0xff]  ;;  %v2517_v54 = vld [vmem:[#allocation9 + $0x78] sm:$0x3]  ;;  %v848_v37 = vld [vmem:[#allocation9 + $0x10] sm:$0x3] }
 0x259   :  { %2925 = vmatprep.subr.bf16.mxu0 %v2924_v36  ;;  %v489_v7 = vmul.f32 %v4782_v56, %v4712_v2  ;;  %v591_v44 = vmul.f32 %v4802_v32, %v4714_v27  ;;  %v693_v61 = vmul.f32 %v4809_v47, %v4718_v21  ;;  %v840_v38 = vmax.f32 %v790_v9, 0.0  ;;  %v2514_v6 = vld [vmem:[#allocation9 + $0x60] sm:$0xff] }
 0x25a   :  { %v842_v33 = vmax.f32 %v792_v51, 0.0  ;;  %v2405_v13 = vadd.f32 %v2355_v8, %v2303_v5  ;;  %v2104_v43 = vmul.f32 %v4822_v14, %v4710_v26  ;;  %v2407_v18 = vadd.f32 %v2357_v34, %v2305_v15 }
 0x25b   :  { %v539_v19 = vadd.f32 %v489_v7, %v437_v53  ;;  %v2156_v11 = vmul.f32 %v4829_v39, %v4712_v2  ;;  %v2258_v22 = vmul.f32 %v4837_v62, %v4714_v27  ;;  %v2360_v28 = vmul.f32 %v4840_v3, %v4718_v21 }
 0x25c   :  { %v2830_v12 = vpack.c.bf16 %v842_v33, %v840_v38  ;;  %v2457_v48 = vadd.f32 %v4843_v50, %v2405_v13  ;;  %v436_v29 = vmul.f32 %v4779_v45, %v4742_v60  ;;  %v2459_v23 = vadd.f32 %v4843_v50, %v2407_v18 }
 0x25d   :  { %v641_v26 = vadd.f32 %v591_v44, %v539_v19  ;;  %v2206_v30 = vadd.f32 %v2156_v11, %v2104_v43  ;;  %v488_v16 = vmul.f32 %v4782_v56, %v4746_v20  ;;  %v590_v27 = vmul.f32 %v4802_v32, %v4748_v58 }
 0x25e   :  { %2831 = vmatpush1.bf16.msra.mxu1 %v2830_v12  ;;  %v2507_v2 = vmax.f32 %v2457_v48, 0.0  ;;  %v692_v31 = vmul.f32 %v4809_v47, %v4750_v42  ;;  %v2103_v21 = vmul.f32 %v4822_v14, %v4742_v60  ;;  %v2509_v35 = vmax.f32 %v2459_v23, 0.0 }
 0x25f   :  { %v743_v45 = vadd.f32 %v693_v61, %v641_v26  ;;  %v2308_v17 = vadd.f32 %v2258_v22, %v2206_v30  ;;  %v538_v24 = vadd.f32 %v488_v16, %v436_v29  ;;  %v2155_v52 = vmul.f32 %v4829_v39, %v4746_v20  ;;  %v2611_v39 = vld [vmem:[#allocation11] sm:$0xff] }
 0x260   :  { %v2257_v56 = vmul.f32 %v4837_v62, %v4748_v58  ;;  %v2926_v57 = vpack.c.bf16 %v2509_v35, %v2507_v2  ;;  %v3091_v47 = vmov 0   ;;  %v2359_v60 = vmul.f32 %v4840_v3, %v4750_v42  ;;  %v849_v3 = vld [vmem:[#allocation9 + $0x18] sm:$0x3] }
 0x261   :  { %v795_v32 = vadd.f32 %v4818_v40, %v743_v45  ;;  %v2410_v0 = vadd.f32 %v2360_v28, %v2308_v17  ;;  %v640_v59 = vadd.f32 %v590_v27, %v538_v24  ;;  %2951 = vset.pattern.permute.xlu0 %v3091_v47  ;;  %v2205_v49 = vadd.f32 %v2155_v52, %v2103_v21 }
 0x262   :  { %2620 = vperm.xlu0 %2951, %v2612_v25   ;;  %2927 = vmatpush1.bf16.msra.mxu0 %v2926_v57 }
 0x263   :  { %v845_v14 = vmax.f32 %v795_v32, 0.0  ;;  %v2462_v1 = vadd.f32 %v4843_v50, %v2410_v0  ;;  %v742_v20 = vadd.f32 %v692_v31, %v640_v59  ;;  %v2307_v46 = vadd.f32 %v2257_v56, %v2205_v49 }
 0x265   :  { %2714 = vmatprep.subr.msk.mxu1 %vm1322_vm0, %v845_v14  ;;  %v2512_v58 = vmax.f32 %v2462_v1, 0.0  ;;  %v794_v62 = vadd.f32 %v4818_v40, %v742_v20  ;;  %v2409_v41 = vadd.f32 %v2359_v60, %v2307_v46  ;;  %v2516_v40 = vld [vmem:[#allocation9 + $0x70] sm:$0x3] }
 0x266   :  { %2615 = vperm.xlu0 %2951, %v2611_v39  }
 0x267   :  { %2732 = vmatprep.subr.msk.mxu0 %vm1322_vm0, %v2512_v58  ;;  %v844_v4 = vmax.f32 %v794_v62, 0.0  ;;  %v2461_v42 = vadd.f32 %v4843_v50, %v2409_v41 }
 0x269   :  { %2715 = vmatpush1.msk.msra.mxu1 %vm1322_vm0, %v844_v4  ;;  %v2511_v63 = vmax.f32 %v2461_v42, 0.0 }
 0x26a   :  { %1483 = vmatmul.mubr.f32.vlgmr.msra.gmra.mrb[0].mxu1 %v846_v55 }
 0x26b   :  { %2717 = vmatprep.mubr.msk.f32.mxu1 %vm1315_vm1, %v849_v3  ;;  %2733 = vmatpush1.msk.msra.mxu0 %vm1322_vm0, %v2511_v63 }
 0x26c   :  { %2595 = vmatmul.mubr.f32.vlgmr.msra.gmra.mrb[0].mxu0 %v2514_v6 }
 0x26d   :  { %2735 = vmatprep.mubr.msk.f32.mxu0 %vm1315_vm1, %v2517_v54 }
 0x26e   :  { %1489 = vmatmul.mubr.f32.gmra.mrb[2].mxu1 %v848_v37 }
 0x270   :  { %2601 = vmatmul.mubr.f32.gmra.mrb[2].mxu0 %v2516_v40 }
 0x2e1   :  { %v2621_v10 = vpop.permute.xlu0 %2620 }
 0x2e5   :  { %v2616_v7 = vpop.permute.xlu0 %2615 }
 0x33d   :  { %v1484_v36 = vpop.f32.mrb[0].mxu1 }
 0x33e   :  { %v1486_v50 = vpop.f32.mrb[1].mxu1 }
 0x33f   :  { %v2596_v8 = vpop.f32.mrb[0].mxu0 }
 0x340   :  { %v2928_v34 = vadd.f32 %v2596_v8, %v1484_v36  ;;  %v2598_v9 = vpop.f32.mrb[1].mxu0 }
 0x341   :  { %v1490_v51 = vpop.f32.mrb[2].mxu1  ;;  %v2929_v5 = vadd.f32 %v2598_v9, %v1486_v50 }
 0x342   :  { %v1492_v53 = vpop.f32.mrb[3].mxu1  ;;  %v2623_v13 = vadd.f32 %v2928_v34, %v2616_v7 }
 0x343   :  { %v2602_v15 = vpop.f32.mrb[2].mxu0  ;;  %v2624_v18 = vadd.f32 %v2929_v5, %v2616_v7 }
 0x344   :  { %v2930_v44 = vadd.f32 %v2602_v15, %v1490_v51  ;;  %v2604_v61 = vpop.f32.mrb[3].mxu0 }
 0x345   :  { %v2931_v38 = vadd.f32 %v2604_v61, %v1492_v53 }
 0x346   :  { %v2625_v33 = vadd.f32 %v2930_v44, %v2621_v10 }
 0x347   :  { %v2626_v43 = vadd.f32 %v2931_v38, %v2621_v10 }
 0x348   :  { %v2628_v19 = vsel %vm2627_vm2, %v2625_v33, -inf }
 0x349   :  { %v2629_v11 = vmax.f32 %v2623_v13, %v2628_v19  ;;  %v2636_v22 = vsel %vm2627_vm2, %v2626_v43, -inf }
 0x34a   :  { %v2637_v12 = vmax.f32 %v2624_v18, %v2636_v22 }
 0x34b   :  { %v2630_v48 = vrot.slane %v2629_v11, 4 }
 0x34c   :  { %v2638_v28 = vrot.slane %v2637_v12, 4 }
 0x34d   :  { %v2631_v29 = vmax.f32 %v2629_v11, %v2630_v48 }
 0x34e   :  { %v2639_v23 = vmax.f32 %v2637_v12, %v2638_v28 }
 0x34f   :  { %v2632_v26 = vrot.slane %v2631_v29, 2 }
 0x350   :  { %v2640_v30 = vrot.slane %v2639_v23, 2 }
 0x351   :  { %v2633_v16 = vmax.f32 %v2631_v29, %v2632_v26 }
 0x352   :  { %v2641_v2 = vmax.f32 %v2639_v23, %v2640_v30 }
 0x353   :  { %v2634_v27 = vrot.slane %v2633_v16, 1 }
 0x354   :  { %v2642_v31 = vrot.slane %v2641_v2, 1 }
 0x355   :  { %v2635_v21 = vmax.f32 %v2633_v16, %v2634_v27 }
 0x356   :  { %v2643_v35 = vmax.f32 %v2641_v2, %v2642_v31 }
 0x357   :  { %v2644_v45 = vsub.f32 %v2623_v13, %v2635_v21  ;;  %v2646_v17 = vsub.f32 %v2625_v33, %v2635_v21 }
 0x358   :  { %v2645_v24 = vsub.f32 %v2624_v18, %v2643_v35  ;;  %v2647_v25 = vsub.f32 %v2626_v43, %v2643_v35 }
 0x359   :  { %v2648_v52 = vmul.f32 1.442695, %v2644_v45  ;;  %v2652_v56 = vmul.f32 1.442695, %v2646_v17 }
 0x35a   :  { %v2650_v57 = vmul.f32 1.442695, %v2645_v24  ;;  %v2654_v32 = vmul.f32 1.442695, %v2647_v25 }
 0x35b   :  { %2952 = vpow2.f32 %v2648_v52 }
 0x35c   :  { %2954 = vpow2.f32 %v2652_v56 }
 0x35d   :  { %2956 = vpow2.f32 %v2650_v57 }
 0x35e   :  { %2958 = vpow2.f32 %v2654_v32 }
 0x365   :  { %v2953_v0 = vpop.eup %2952 }
 0x366   :  { %v2955_v59 = vpop.eup %2954 }
 0x367   :  { %v2957_v47 = vpop.eup %2956  ;;  %v2656_v49 = vsel %vm2627_vm2, %v2955_v59, 0.0 }
 0x368   :  { %v2959_v60 = vpop.eup %2958  ;;  %v2657_v14 = vadd.f32 %v2953_v0, %v2656_v49 }
 0x369   :  { %v2664_v1 = vsel %vm2627_vm2, %v2959_v60, 0.0 }
 0x36a   :  { %v2658_v20 = vrot.slane %v2657_v14, 4  ;;  %v2665_v39 = vadd.f32 %v2957_v47, %v2664_v1 }
 0x36c   :  { %v2659_v46 = vadd.f32 %v2658_v20, %v2657_v14  ;;  %v2666_v58 = vrot.slane %v2665_v39, 4 }
 0x36e   :  { %v2660_v62 = vrot.slane %v2659_v46, 2  ;;  %v2667_v41 = vadd.f32 %v2666_v58, %v2665_v39 }
 0x370   :  { %v2661_v4 = vadd.f32 %v2660_v62, %v2659_v46  ;;  %v2668_v55 = vrot.slane %v2667_v41, 2 }
 0x372   :  { %v2662_v42 = vrot.slane %v2661_v4, 1  ;;  %v2669_v3 = vadd.f32 %v2668_v55, %v2667_v41 }
 0x374   :  { %v2663_v63 = vadd.f32 %v2662_v42, %v2661_v4  ;;  %v2670_v6 = vrot.slane %v2669_v3, 1 }
 0x376   :  { %v2671_v54 = vadd.f32 %v2670_v6, %v2669_v3  ;;  %2960 = vrcp.f32 %v2663_v63 }
 0x378   :  { %2962 = vrcp.f32 %v2671_v54 }
 0x380   :  { %v2961_v37 = vpop.eup %2960 }
 0x381   :  { %v2674_v40 = vmul.f32 %v2961_v37, %v2953_v0  ;;  %v2676_v36 = vmul.f32 %v2961_v37, %v2955_v59 }
 0x382   :  { %v2963_v50 = vpop.eup %2962 }
 0x383   :  { %v2675_v10 = vmul.f32 %v2963_v50, %v2957_v47  ;;  %v2677_v8 = vmul.f32 %v2963_v50, %v2959_v60  ;;  %2678 = vst [vmem:[#allocation12] sm:$0xff] %v2674_v40  ;;  %2680 = vst [vmem:[#allocation12 + $0x10] sm:$0x3] %v2676_v36 }
 0x385   :  { %2679 = vst [vmem:[#allocation12 + $0x8] sm:$0xff] %v2675_v10  ;;  %2681 = vst [vmem:[#allocation12 + $0x18] sm:$0x3] %v2677_v8 }
 0x386   :  { %3061 = shalt.err (!%p3058_p6)
}
 0x387   :  { %s3062_s25 = scalar_lea.hbm %s5756_s5, 512 }
 0x388   :  { %p3063_p7 = scmp.ne.s32.totalorder %s5756_s5, %s3062_s25  ;;  %p3066_p8 = scmp.lt.u32.totalorder %s3062_s25, %s5756_s5 }
 0x38a   :  { %p3068_p9 = pnand %p3066_p8, %p3063_p7 }
 0x38c   :  { %3071 = shalt.err (!%p3068_p9)
}
 0x38d   :  { %2693 = dma.vmem_to_hbm [thread:$0]  %s2688_s21, 512, %s5756_s5, [#allocation4], %s3083_s28, %s3083_s28, %s3084_s29  }
 0x38e   :  { %3080 = dma.done.wait [#allocation4], 512  }
 0x38f   :  { %3081 = vsyncadd [#allocation4], 4294966784 }
 0x390   :  { %2697 = vsyncpa [#allocation3], 1 }
 0x391   :  { %2698 = vsyncpa [#allocation10], 1 }
 0x392   :  { %2699 = vsyncpa [#allocation4], 1 }
 0x393   :  { %2700 = vsyncpa [#allocation5], 1 }
 0x394   :  { %2701 = vsyncpa [#allocation8], 1 }

</bundles_post_ra>
